<compile_context>
chip_gen: v7x
topology: tpu7x:2x2x1
jax: 0.10.0
libtpu: 0.0.40
codegen_flags: <defaults>
</compile_context>

<pallas_src>
import functools

import jax
import jax.numpy as jnp
from jax.experimental import pallas as pl
from jax.experimental.pallas import tpu as pltpu

BN_EPS = 1e-5
_NEG = -1e30                 # effectively -inf for max-pool boundary padding
MXU_DTYPE = jnp.bfloat16     # MXU operand dtype (accumulation stays f32)


# --------------------------- in-kernel helpers ---------------------------

def _gelu(x):
    # tanh-approximate GELU: the transcendental runs on the EUP slot.
    c = 0.7978845608028654   # sqrt(2/pi)
    return 0.5 * x * (1.0 + jnp.tanh(c * (x + 0.044715 * x * x * x)))


def _col_index(h, w):
    """(h*w, 1) int32 within-row column index (the w coordinate), no integer rem."""
    return jax.lax.broadcasted_iota(jnp.int32, (h, w, 1), 1).reshape(h * w, 1)


def _spc(x_flat, bnw, wcat, *, h, w, step):
    """Folded SPC on a flat (H*W, Cin) activation.

    GELU(BN(x)) -> ONE (M,Cin)@(Cin,4*cout) MXU matmul (branch convs and fuse1
    pre-folded + concatenated) -> the 4 spatial shifts applied to the matmul
    output (valid: folded branch convs are bias-free 1x1), accumulated as a
    running sum.  The folded bias beff is NOT added here; it is absorbed into
    the post-BN bias in the wrapper.
    """
    m = h * w
    c = wcat.shape[1] // 4
    a = _gelu(x_flat * bnw[0:1, :] + bnw[1:2, :])                     # (M, Cin) f32
    q = jnp.dot(a.astype(MXU_DTYPE), wcat,
                preferred_element_type=jnp.float32)                  # (M, 4*cout)
    s = step * w
    zs = jnp.zeros((s, c), jnp.float32)
    z1 = jnp.zeros((step, c), jnp.float32)
    col = _col_index(h, w)                                            # (M, 1)
    # t: out[f] = q_t[f + step*W]   (zero at bottom `step` rows)
    z = jnp.concatenate([q[s:, 0:c], zs], axis=0)
    # b: out[f] = q_b[f - step*W]   (zero at top `step` rows)
    z += jnp.concatenate([zs, q[:m - s, c:2 * c]], axis=0)
    # r: out[f] = q_r[f - step]     (zero where w < step)
    qr = jnp.concatenate([z1, q[:m - step, 2 * c:3 * c]], axis=0)
    z += jnp.where(col >= step, qr, 0.0)
    # l: out[f] = q_l[f + step]     (zero where w >= W - step)
    ql = jnp.concatenate([q[step:, 3 * c:4 * c], z1], axis=0)
    z += jnp.where(col < w - step, ql, 0.0)
    return z                                                          # (M, cout)


def _maxpool_3x3_s2(z_flat, scratch, *, h, w):
    """MaxPool2d(k=3, stride=2, pad=1) on a flat (H*W, C) VMEM-resident map.

    Separable 3-max along W, then 3-max along H fused with the row downsample
    (leading-dim reshape); the column downsample is a single sublane-stride-2
    read from VMEM scratch (valid because W is even).  Returns (Ho*Wo, C).
    """
    c = z_flat.shape[1]
    ho, wo = h // 2, w // 2
    z = z_flat.reshape(h, w, c)
    neg_col = jnp.full((h, 1, c), _NEG, jnp.float32)
    left = jnp.concatenate([neg_col, z[:, :w - 1, :]], axis=1)
    right = jnp.concatenate([z[:, 1:, :], neg_col], axis=1)
    mw = jnp.maximum(jnp.maximum(left, z), right)                     # (H, W, C)
    r4 = mw.reshape(ho, 2, w, c)
    even, odd = r4[:, 0], r4[:, 1]                                    # rows 2i, 2i+1
    prev_odd = jnp.concatenate(
        [jnp.full((1, w, c), _NEG, jnp.float32), odd[:ho - 1]], axis=0)
    mh = jnp.maximum(jnp.maximum(even, odd), prev_odd)                # (Ho, W, C)
    scratch[...] = mh.reshape(ho * w, c)
    return scratch[pl.ds(0, ho * wo, 2), :]                           # (Ho*Wo, C)


# ------------------------------ fused kernel ------------------------------

def _block_kernel(*refs, stride, step, h, w, planes, downsample, pack_lanes):
    if downsample:
        (x_ref, bnw1, wcat1, post1,
         bnw2, wcat2, post2,
         bnw3, wcat3, post3, o_ref, pool) = refs
    else:
        (x_ref, bnw1, wcat1, post1,
         bnw2, wcat2, post2, o_ref, pool) = refs

    x = x_ref[0].astype(jnp.float32)                                  # (H*W, Cin)
    ho, wo = (h // 2, w // 2) if stride != 1 else (h, w)

    # ---- SPC1 (stride) -> optional maxpool -> BN1 (beff folded in) + ReLU ----
    z1 = _spc(x, bnw1[...], wcat1[...], h=h, w=w, step=step)
    if stride != 1:
        z1 = _maxpool_3x3_s2(z1, pool, h=h, w=w)
    p1 = post1[...]
    o1 = jnp.maximum(z1 * p1[0:1, :] + p1[1:2, :], 0.0)               # (Ho*Wo, planes)

    # ---- SPC2 (stride 1) -> BN2 + ReLU ----
    z2 = _spc(o1, bnw2[...], wcat2[...], h=ho, w=wo, step=step)
    p2 = post2[...]
    o2 = jnp.maximum(z2 * p2[0:1, :] + p2[1:2, :], 0.0)

    # ---- residual branch ----
    if downsample:
        z3 = _spc(x, bnw3[...], wcat3[...], h=h, w=w, step=step)
        if stride != 1:
            z3 = _maxpool_3x3_s2(z3, pool, h=h, w=w)
        p3 = post3[...]
        res = z3 * p3[0:1, :] + p3[1:2, :]                            # res BN (no act)
    else:
        res = x                                                       # identity

    y = o2 + res                                                      # (Ho*Wo, planes)

    if pack_lanes:
        # lane-dense output slab (Ho, Wo*planes) for small channel counts
        y3 = y.reshape(ho, wo, planes)
        o_ref[0] = jnp.concatenate([y3[:, j, :] for j in range(wo)],
                                   axis=-1).astype(o_ref.dtype)
    else:
        o_ref[0] = y.reshape(ho, wo, planes).astype(o_ref.dtype)


# --------------------------- parameter folding ---------------------------

def _fold_bn(p):
    scale = p["gamma"] * jax.lax.rsqrt(p["var"] + BN_EPS)
    bias = p["beta"] - p["mean"] * scale
    return scale, bias


def _fold_post(bn_params, beff):
    # BN(z + beff) = z*scale + (bias + scale*beff); maxpool commutes with +beff.
    scale, bias = _fold_bn(bn_params)
    return jnp.stack([scale, bias + scale * beff], axis=0).astype(jnp.float32)


def _fold_spc(p):
    """Fold the SPC internal BN, the 4 branch 1x1 convs and fuse1 into
       bn_pre (2, Cin) f32, w_cat (Cin, 4*cout) bf16, beff (cout,) f32."""
    cr = p["wt"].shape[1]
    w1 = p["w1"]
    names = ("t", "b", "r", "l")   # matches torch.cat([x_t, x_b, x_r, x_l], dim=1)
    w_cat = jnp.concatenate(
        [p["w" + nm] @ w1[i * cr:(i + 1) * cr] for i, nm in enumerate(names)], axis=1)
    beff = sum(p["b" + nm] @ w1[i * cr:(i + 1) * cr]
               for i, nm in enumerate(names)) + p["b1"]
    scale, bias = _fold_bn(p["bn"])
    bn_pre = jnp.stack([scale, bias], axis=0).astype(jnp.float32)
    return bn_pre, w_cat.astype(MXU_DTYPE), beff.astype(jnp.float32)


# --------------------------- module forward ------------------------------

@functools.partial(jax.jit, static_argnums=(2, 3, 4))
def basic_block_spc(x_nchw, params, in_planes, planes, stride):
    n, cin, h, w = x_nchw.shape
    downsample = (stride != 1) or (in_planes != planes)
    if stride != 1:
        if (h % 2) or (w % 2):
            # TODO(synk): odd spatial sizes need explicit ceil-mode pool handling.
            raise NotImplementedError("stride != 1 requires even H and W")
        ho, wo = h // 2, w // 2
    else:
        ho, wo = h, w

    # NCHW -> flat NHWC (N, H*W, C); the kernel works on the flat layout.
    x = jnp.transpose(x_nchw, (0, 2, 3, 1)).reshape(n, h * w, cin)

    ins = [x]
    specs = [pl.BlockSpec((1, h * w, cin), lambda i: (i, 0, 0))]

    def add(*arrs):
        for a in arrs:
            ins.append(a)
            # grid-invariant weight/BN blocks (constant index_map).
            # TODO(synk): pipeline_mode=pl.Buffered(1) on v7x at realistic C.
            specs.append(pl.BlockSpec(a.shape, lambda i, _r=a.ndim: (0,) * _r))

    bnw1, wcat1, beff1 = _fold_spc(params["conv1"])
    add(bnw1, wcat1, _fold_post(params["bn1"], beff1))
    bnw2, wcat2, beff2 = _fold_spc(params["conv2"])
    add(bnw2, wcat2, _fold_post(params["bn2"], beff2))
    if downsample:
        bnw3, wcat3, beff3 = _fold_spc(params["res_spc"])
        add(bnw3, wcat3, _fold_post(params["res_bn"], beff3))

    pack_lanes = planes < 128
    if pack_lanes:
        out_shape = jax.ShapeDtypeStruct((n, ho, wo * planes), x_nchw.dtype)
        out_spec = pl.BlockSpec((1, ho, wo * planes), lambda i: (i, 0, 0))
    else:
        out_shape = jax.ShapeDtypeStruct((n, ho, wo, planes), x_nchw.dtype)
        out_spec = pl.BlockSpec((1, ho, wo, planes), lambda i: (i, 0, 0, 0))

    kernel = functools.partial(
        _block_kernel, stride=stride, step=1, h=h, w=w, planes=planes,
        downsample=downsample, pack_lanes=pack_lanes)

    # TODO(synk): at realistic channel counts on v7x, add an H-row grid axis
    # (with +/-step shift halo and +1 row for the pool) so blocks fit 64 MiB VMEM.
    out = pl.pallas_call(
        kernel,
        out_shape=out_shape,
        grid=(n,),   # N=2 -> even number of parallel iterations (v7x 2 TCs)
        in_specs=specs,
        out_specs=out_spec,
        scratch_shapes=[pltpu.VMEM((max(h // 2, 1) * w, planes), jnp.float32)],
        compiler_params=pltpu.CompilerParams(
            dimension_semantics=("parallel",),
            vmem_limit_bytes=64 * 1024 * 1024),
    )(*ins)

    if pack_lanes:
        out = out.reshape(n, ho, wo, planes)
    return jnp.transpose(out, (0, 3, 1, 2))                           # NHWC -> NCHW


# ------------------------- deterministic params ---------------------------

def init_bn(key, c):
    k1, k2, k3, k4 = jax.random.split(key, 4)
    return {
        "gamma": 1.0 + 0.1 * jax.random.normal(k1, (c,), jnp.float32),
        "beta": 0.05 * jax.random.normal(k2, (c,), jnp.float32),
        "mean": 0.1 * jax.random.normal(k3, (c,), jnp.float32),
        "var": 1.0 + 0.1 * jnp.abs(jax.random.normal(k4, (c,), jnp.float32)),
    }


def init_spc(key, channels, reduce_rate, out_channels):
    cr = channels // reduce_rate
    ks = jax.random.split(key, 11)
    p = {"bn": init_bn(ks[0], channels)}
    for i, name in enumerate("tbrl"):
        p["w" + name] = 0.2 * jax.random.normal(ks[1 + i], (channels, cr), jnp.float32)
        p["b" + name] = 0.05 * jax.random.normal(ks[5 + i], (cr,), jnp.float32)
    p["w1"] = 0.2 * jax.random.normal(ks[9], (4 * cr, out_channels), jnp.float32)
    p["b1"] = 0.05 * jax.random.normal(ks[10], (out_channels,), jnp.float32)
    return p


# --------------------------------- main -----------------------------------

if __name__ == "__main__":
    key = jax.random.PRNGKey(0)
    kx, kp = jax.random.split(key)
    in_planes, planes, stride = 4, 8, 2
    x = jax.random.normal(kx, (2, in_planes, 16, 16), jnp.float32)  # NCHW, like PyTorch

    pk = jax.random.split(kp, 6)
    params = {
        "conv1": init_spc(pk[0], in_planes, 4, planes),   # SPC(in_planes -> planes, stride)
        "bn1": init_bn(pk[1], planes),
        "conv2": init_spc(pk[2], planes, 4, planes),      # SPC(planes -> planes, stride=1)
        "bn2": init_bn(pk[3], planes),
        "res_spc": init_spc(pk[4], in_planes, 4, planes), # residual SPC
        "res_bn": init_bn(pk[5], planes),
    }

    out = basic_block_spc(x, params, in_planes, planes, stride)
    jax.block_until_ready(out)
    assert out.shape == (2, planes, 8, 8), out.shape
    print("KERNEL_OK")
</pallas_src>

<mosaic_0001>
module attributes {stable_mosaic.version = 11 : i64} {
  func.func @_block_kernel(%arg0: i32, %arg1: memref<1x256x4xf32, #tpu.memory_space<vmem>>, %arg2: memref<2x4xf32, #tpu.memory_space<vmem>>, %arg3: memref<4x32xbf16, #tpu.memory_space<vmem>>, %arg4: memref<2x8xf32, #tpu.memory_space<vmem>>, %arg5: memref<2x8xf32, #tpu.memory_space<vmem>>, %arg6: memref<8x32xbf16, #tpu.memory_space<vmem>>, %arg7: memref<2x8xf32, #tpu.memory_space<vmem>>, %arg8: memref<2x4xf32, #tpu.memory_space<vmem>>, %arg9: memref<4x32xbf16, #tpu.memory_space<vmem>>, %arg10: memref<2x8xf32, #tpu.memory_space<vmem>>, %arg11: memref<1x8x64xf32, #tpu.memory_space<vmem>>, %arg12: memref<128x8xf32, #tpu.memory_space<vmem>>) attributes {dimension_semantics = [#tpu.dimension_semantics<parallel>], iteration_bounds = array<i64: 2>, scalar_prefetch = 0 : i64, scratch_operands = 1 : i64, tpu.core_type = #tpu.core_type<tc>, window_params = [{transform_indices = @transform_0, window_bounds = array<i64: 1, 256, 4>}, {pipeline_mode = #tpu.pipeline_mode<synchronous>, transform_indices = @transform_1, window_bounds = array<i64: 2, 4>}, {pipeline_mode = #tpu.pipeline_mode<synchronous>, transform_indices = @transform_2, window_bounds = array<i64: 4, 32>}, {pipeline_mode = #tpu.pipeline_mode<synchronous>, transform_indices = @transform_3, window_bounds = array<i64: 2, 8>}, {pipeline_mode = #tpu.pipeline_mode<synchronous>, transform_indices = @transform_4, window_bounds = array<i64: 2, 8>}, {pipeline_mode = #tpu.pipeline_mode<synchronous>, transform_indices = @transform_5, window_bounds = array<i64: 8, 32>}, {pipeline_mode = #tpu.pipeline_mode<synchronous>, transform_indices = @transform_6, window_bounds = array<i64: 2, 8>}, {pipeline_mode = #tpu.pipeline_mode<synchronous>, transform_indices = @transform_7, window_bounds = array<i64: 2, 4>}, {pipeline_mode = #tpu.pipeline_mode<synchronous>, transform_indices = @transform_8, window_bounds = array<i64: 4, 32>}, {pipeline_mode = #tpu.pipeline_mode<synchronous>, transform_indices = @transform_9, window_bounds = array<i64: 2, 8>}, {transform_indices = @transform_10, window_bounds = array<i64: 1, 8, 64>}]} {
    %c0 = arith.constant 0 : index
    %c0_0 = arith.constant 0 : index
    %c0_1 = arith.constant 0 : index
    %0 = vector.load %arg1[%c0, %c0_0, %c0_1] : memref<1x256x4xf32, #tpu.memory_space<vmem>>, vector<1x256x4xf32>
    %1 = vector.shape_cast %0 : vector<1x256x4xf32> to vector<256x4xf32>
    %c0_2 = arith.constant 0 : index
    %c0_3 = arith.constant 0 : index
    %2 = vector.load %arg2[%c0_2, %c0_3] : memref<2x4xf32, #tpu.memory_space<vmem>>, vector<2x4xf32>
    %c0_4 = arith.constant 0 : index
    %c0_5 = arith.constant 0 : index
    %3 = vector.load %arg3[%c0_4, %c0_5] : memref<4x32xbf16, #tpu.memory_space<vmem>>, vector<4x32xbf16>
    %4 = vector.extract_strided_slice %2 {offsets = [0, 0], sizes = [1, 4], strides = [1, 1]} : vector<2x4xf32> to vector<1x4xf32>
    %5 = vector.broadcast %4 : vector<1x4xf32> to vector<256x4xf32>
    %6 = arith.mulf %1, %5 : vector<256x4xf32>
    %7 = vector.extract_strided_slice %2 {offsets = [1, 0], sizes = [1, 4], strides = [1, 1]} : vector<2x4xf32> to vector<1x4xf32>
    %8 = vector.broadcast %7 : vector<1x4xf32> to vector<256x4xf32>
    %9 = arith.addf %6, %8 : vector<256x4xf32>
    %cst = arith.constant 5.000000e-01 : f32
    %10 = vector.broadcast %cst : f32 to vector<256x4xf32>
    %11 = arith.mulf %10, %9 : vector<256x4xf32>
    %cst_6 = arith.constant 4.471500e-02 : f32
    %12 = vector.broadcast %cst_6 : f32 to vector<256x4xf32>
    %13 = arith.mulf %12, %9 : vector<256x4xf32>
    %14 = arith.mulf %13, %9 : vector<256x4xf32>
    %15 = arith.mulf %14, %9 : vector<256x4xf32>
    %16 = arith.addf %9, %15 : vector<256x4xf32>
    %cst_7 = arith.constant 0.797884583 : f32
    %17 = vector.broadcast %cst_7 : f32 to vector<256x4xf32>
    %18 = arith.mulf %17, %16 : vector<256x4xf32>
    %19 = math.tanh %18 : vector<256x4xf32>
    %cst_8 = arith.constant 1.000000e+00 : f32
    %20 = vector.broadcast %cst_8 : f32 to vector<256x4xf32>
    %21 = arith.addf %20, %19 : vector<256x4xf32>
    %22 = arith.mulf %11, %21 : vector<256x4xf32>
    %23 = arith.truncf %22 : vector<256x4xf32> to vector<256x4xbf16>
    %cst_9 = arith.constant dense<0.000000e+00> : vector<256x32xf32>
    %24 = tpu.matmul %23, %3, %cst_9 {dimension_numbers = #tpu.dot_dimension_numbers<[1], [0], [0], [1], [0, 0, 1, 1], [], []>} : vector<256x4xbf16>, vector<4x32xbf16>, vector<256x32xf32> -> vector<256x32xf32>
    %cst_10 = arith.constant 0.000000e+00 : f32
    %25 = vector.broadcast %cst_10 : f32 to vector<16x8xf32>
    %cst_11 = arith.constant 0.000000e+00 : f32
    %26 = vector.broadcast %cst_11 : f32 to vector<1x8xf32>
    %27 = tpu.iota {dimensions = array<i32: 1>} : vector<16x16x1xi32>
    %28 = vector.shape_cast %27 : vector<16x16x1xi32> to vector<256x1xi32>
    %29 = vector.extract_strided_slice %24 {offsets = [16, 0], sizes = [240, 8], strides = [1, 1]} : vector<256x32xf32> to vector<240x8xf32>
    %30 = tpu.concatenate %29, %25 in 0 : vector<240x8xf32>, vector<16x8xf32> -> vector<256x8xf32>
    %31 = vector.extract_strided_slice %24 {offsets = [0, 8], sizes = [240, 8], strides = [1, 1]} : vector<256x32xf32> to vector<240x8xf32>
    %32 = tpu.concatenate %25, %31 in 0 : vector<16x8xf32>, vector<240x8xf32> -> vector<256x8xf32>
    %33 = arith.addf %30, %32 : vector<256x8xf32>
    %34 = vector.extract_strided_slice %24 {offsets = [0, 16], sizes = [255, 8], strides = [1, 1]} : vector<256x32xf32> to vector<255x8xf32>
    %35 = tpu.concatenate %26, %34 in 0 : vector<1x8xf32>, vector<255x8xf32> -> vector<256x8xf32>
    %c1_i32 = arith.constant 1 : i32
    %36 = vector.broadcast %c1_i32 : i32 to vector<256x1xi32>
    %37 = arith.cmpi sge, %28, %36 : vector<256x1xi32>
    %cst_12 = arith.constant 0.000000e+00 : f32
    %38 = vector.shape_cast %37 : vector<256x1xi1> to vector<256x1xi1>
    %39 = vector.broadcast %38 : vector<256x1xi1> to vector<256x8xi1>
    %40 = vector.broadcast %cst_12 : f32 to vector<256x8xf32>
    %41 = arith.select %39, %35, %40 : vector<256x8xi1>, vector<256x8xf32>
    %42 = arith.addf %33, %41 : vector<256x8xf32>
    %43 = vector.extract_strided_slice %24 {offsets = [1, 24], sizes = [255, 8], strides = [1, 1]} : vector<256x32xf32> to vector<255x8xf32>
    %44 = tpu.concatenate %43, %26 in 0 : vector<255x8xf32>, vector<1x8xf32> -> vector<256x8xf32>
    %c15_i32 = arith.constant 15 : i32
    %45 = vector.broadcast %c15_i32 : i32 to vector<256x1xi32>
    %46 = arith.cmpi slt, %28, %45 : vector<256x1xi32>
    %cst_13 = arith.constant 0.000000e+00 : f32
    %47 = vector.shape_cast %46 : vector<256x1xi1> to vector<256x1xi1>
    %48 = vector.broadcast %47 : vector<256x1xi1> to vector<256x8xi1>
    %49 = vector.broadcast %cst_13 : f32 to vector<256x8xf32>
    %50 = arith.select %48, %44, %49 : vector<256x8xi1>, vector<256x8xf32>
    %51 = arith.addf %42, %50 : vector<256x8xf32>
    %52 = vector.shape_cast %51 : vector<256x8xf32> to vector<16x16x8xf32>
    %cst_14 = arith.constant -1.000000e+30 : f32
    %53 = vector.broadcast %cst_14 : f32 to vector<16x1x8xf32>
    %54 = vector.extract_strided_slice %52 {offsets = [0, 0, 0], sizes = [16, 15, 8], strides = [1, 1, 1]} : vector<16x16x8xf32> to vector<16x15x8xf32>
    %55 = tpu.concatenate %53, %54 in 1 : vector<16x1x8xf32>, vector<16x15x8xf32> -> vector<16x16x8xf32>
    %56 = vector.extract_strided_slice %52 {offsets = [0, 1, 0], sizes = [16, 15, 8], strides = [1, 1, 1]} : vector<16x16x8xf32> to vector<16x15x8xf32>
    %57 = tpu.concatenate %56, %53 in 1 : vector<16x15x8xf32>, vector<16x1x8xf32> -> vector<16x16x8xf32>
    %58 = arith.maximumf %55, %52 : vector<16x16x8xf32>
    %59 = arith.maximumf %58, %57 : vector<16x16x8xf32>
    %60 = vector.shape_cast %59 : vector<16x16x8xf32> to vector<8x2x16x8xf32>
    %61 = vector.extract_strided_slice %60 {offsets = [0, 0, 0, 0], sizes = [8, 1, 16, 8], strides = [1, 1, 1, 1]} : vector<8x2x16x8xf32> to vector<8x1x16x8xf32>
    %62 = vector.shape_cast %61 : vector<8x1x16x8xf32> to vector<8x16x8xf32>
    %63 = vector.extract_strided_slice %60 {offsets = [0, 1, 0, 0], sizes = [8, 1, 16, 8], strides = [1, 1, 1, 1]} : vector<8x2x16x8xf32> to vector<8x1x16x8xf32>
    %64 = vector.shape_cast %63 : vector<8x1x16x8xf32> to vector<8x16x8xf32>
    %cst_15 = arith.constant -1.000000e+30 : f32
    %65 = vector.broadcast %cst_15 : f32 to vector<1x16x8xf32>
    %66 = vector.extract_strided_slice %64 {offsets = [0, 0, 0], sizes = [7, 16, 8], strides = [1, 1, 1]} : vector<8x16x8xf32> to vector<7x16x8xf32>
    %67 = tpu.concatenate %65, %66 in 0 : vector<1x16x8xf32>, vector<7x16x8xf32> -> vector<8x16x8xf32>
    %68 = arith.maximumf %62, %64 : vector<8x16x8xf32>
    %69 = arith.maximumf %68, %67 : vector<8x16x8xf32>
    %70 = vector.shape_cast %69 : vector<8x16x8xf32> to vector<128x8xf32>
    %c0_16 = arith.constant 0 : index
    %c0_17 = arith.constant 0 : index
    %71 = vector.load %arg12[%c0_16, %c0_17] : memref<128x8xf32, #tpu.memory_space<vmem>>, vector<128x8xf32>
    tpu.vector_store %arg12[%c0_16, %c0_17], %70 {strides = array<i32>} : memref<128x8xf32, #tpu.memory_space<vmem>>, vector<128x8xf32>,
    %c0_18 = arith.constant 0 : index
    %c0_19 = arith.constant 0 : index
    %72 = tpu.strided_load %arg12[%c0_18, %c0_19] {strides = array<i32: 2, 1>} : memref<128x8xf32, #tpu.memory_space<vmem>>, vector<64x8xf32>
    %c0_20 = arith.constant 0 : index
    %c0_21 = arith.constant 0 : index
    %73 = vector.load %arg4[%c0_20, %c0_21] : memref<2x8xf32, #tpu.memory_space<vmem>>, vector<2x8xf32>
    %74 = vector.extract_strided_slice %73 {offsets = [0, 0], sizes = [1, 8], strides = [1, 1]} : vector<2x8xf32> to vector<1x8xf32>
    %75 = vector.broadcast %74 : vector<1x8xf32> to vector<64x8xf32>
    %76 = arith.mulf %72, %75 : vector<64x8xf32>
    %77 = vector.extract_strided_slice %73 {offsets = [1, 0], sizes = [1, 8], strides = [1, 1]} : vector<2x8xf32> to vector<1x8xf32>
    %78 = vector.broadcast %77 : vector<1x8xf32> to vector<64x8xf32>
    %79 = arith.addf %76, %78 : vector<64x8xf32>
    %cst_22 = arith.constant 0.000000e+00 : f32
    %80 = vector.broadcast %cst_22 : f32 to vector<64x8xf32>
    %81 = arith.maximumf %79, %80 : vector<64x8xf32>
    %c0_23 = arith.constant 0 : index
    %c0_24 = arith.constant 0 : index
    %82 = vector.load %arg5[%c0_23, %c0_24] : memref<2x8xf32, #tpu.memory_space<vmem>>, vector<2x8xf32>
    %c0_25 = arith.constant 0 : index
    %c0_26 = arith.constant 0 : index
    %83 = vector.load %arg6[%c0_25, %c0_26] : memref<8x32xbf16, #tpu.memory_space<vmem>>, vector<8x32xbf16>
    %84 = vector.extract_strided_slice %82 {offsets = [0, 0], sizes = [1, 8], strides = [1, 1]} : vector<2x8xf32> to vector<1x8xf32>
    %85 = vector.broadcast %84 : vector<1x8xf32> to vector<64x8xf32>
    %86 = arith.mulf %81, %85 : vector<64x8xf32>
    %87 = vector.extract_strided_slice %82 {offsets = [1, 0], sizes = [1, 8], strides = [1, 1]} : vector<2x8xf32> to vector<1x8xf32>
    %88 = vector.broadcast %87 : vector<1x8xf32> to vector<64x8xf32>
    %89 = arith.addf %86, %88 : vector<64x8xf32>
    %cst_27 = arith.constant 5.000000e-01 : f32
    %90 = vector.broadcast %cst_27 : f32 to vector<64x8xf32>
    %91 = arith.mulf %90, %89 : vector<64x8xf32>
    %cst_28 = arith.constant 4.471500e-02 : f32
    %92 = vector.broadcast %cst_28 : f32 to vector<64x8xf32>
    %93 = arith.mulf %92, %89 : vector<64x8xf32>
    %94 = arith.mulf %93, %89 : vector<64x8xf32>
    %95 = arith.mulf %94, %89 : vector<64x8xf32>
    %96 = arith.addf %89, %95 : vector<64x8xf32>
    %cst_29 = arith.constant 0.797884583 : f32
    %97 = vector.broadcast %cst_29 : f32 to vector<64x8xf32>
    %98 = arith.mulf %97, %96 : vector<64x8xf32>
    %99 = math.tanh %98 : vector<64x8xf32>
    %cst_30 = arith.constant 1.000000e+00 : f32
    %100 = vector.broadcast %cst_30 : f32 to vector<64x8xf32>
    %101 = arith.addf %100, %99 : vector<64x8xf32>
    %102 = arith.mulf %91, %101 : vector<64x8xf32>
    %103 = arith.truncf %102 : vector<64x8xf32> to vector<64x8xbf16>
    %cst_31 = arith.constant dense<0.000000e+00> : vector<64x32xf32>
    %104 = tpu.matmul %103, %83, %cst_31 {dimension_numbers = #tpu.dot_dimension_numbers<[1], [0], [0], [1], [0, 0, 1, 1], [], []>} : vector<64x8xbf16>, vector<8x32xbf16>, vector<64x32xf32> -> vector<64x32xf32>
    %cst_32 = arith.constant 0.000000e+00 : f32
    %105 = vector.broadcast %cst_32 : f32 to vector<8x8xf32>
    %cst_33 = arith.constant 0.000000e+00 : f32
    %106 = vector.broadcast %cst_33 : f32 to vector<1x8xf32>
    %107 = tpu.iota {dimensions = array<i32: 1>} : vector<8x8x1xi32>
    %108 = vector.shape_cast %107 : vector<8x8x1xi32> to vector<64x1xi32>
    %109 = vector.extract_strided_slice %104 {offsets = [8, 0], sizes = [56, 8], strides = [1, 1]} : vector<64x32xf32> to vector<56x8xf32>
    %110 = tpu.concatenate %109, %105 in 0 : vector<56x8xf32>, vector<8x8xf32> -> vector<64x8xf32>
    %111 = vector.extract_strided_slice %104 {offsets = [0, 8], sizes = [56, 8], strides = [1, 1]} : vector<64x32xf32> to vector<56x8xf32>
    %112 = tpu.concatenate %105, %111 in 0 : vector<8x8xf32>, vector<56x8xf32> -> vector<64x8xf32>
    %113 = arith.addf %110, %112 : vector<64x8xf32>
    %114 = vector.extract_strided_slice %104 {offsets = [0, 16], sizes = [63, 8], strides = [1, 1]} : vector<64x32xf32> to vector<63x8xf32>
    %115 = tpu.concatenate %106, %114 in 0 : vector<1x8xf32>, vector<63x8xf32> -> vector<64x8xf32>
    %c1_i32_34 = arith.constant 1 : i32
    %116 = vector.broadcast %c1_i32_34 : i32 to vector<64x1xi32>
    %117 = arith.cmpi sge, %108, %116 : vector<64x1xi32>
    %cst_35 = arith.constant 0.000000e+00 : f32
    %118 = vector.shape_cast %117 : vector<64x1xi1> to vector<64x1xi1>
    %119 = vector.broadcast %118 : vector<64x1xi1> to vector<64x8xi1>
    %120 = vector.broadcast %cst_35 : f32 to vector<64x8xf32>
    %121 = arith.select %119, %115, %120 : vector<64x8xi1>, vector<64x8xf32>
    %122 = arith.addf %113, %121 : vector<64x8xf32>
    %123 = vector.extract_strided_slice %104 {offsets = [1, 24], sizes = [63, 8], strides = [1, 1]} : vector<64x32xf32> to vector<63x8xf32>
    %124 = tpu.concatenate %123, %106 in 0 : vector<63x8xf32>, vector<1x8xf32> -> vector<64x8xf32>
    %c7_i32 = arith.constant 7 : i32
    %125 = vector.broadcast %c7_i32 : i32 to vector<64x1xi32>
    %126 = arith.cmpi slt, %108, %125 : vector<64x1xi32>
    %cst_36 = arith.constant 0.000000e+00 : f32
    %127 = vector.shape_cast %126 : vector<64x1xi1> to vector<64x1xi1>
    %128 = vector.broadcast %127 : vector<64x1xi1> to vector<64x8xi1>
    %129 = vector.broadcast %cst_36 : f32 to vector<64x8xf32>
    %130 = arith.select %128, %124, %129 : vector<64x8xi1>, vector<64x8xf32>
    %131 = arith.addf %122, %130 : vector<64x8xf32>
    %c0_37 = arith.constant 0 : index
    %c0_38 = arith.constant 0 : index
    %132 = vector.load %arg7[%c0_37, %c0_38] : memref<2x8xf32, #tpu.memory_space<vmem>>, vector<2x8xf32>
    %133 = vector.extract_strided_slice %132 {offsets = [0, 0], sizes = [1, 8], strides = [1, 1]} : vector<2x8xf32> to vector<1x8xf32>
    %134 = vector.broadcast %133 : vector<1x8xf32> to vector<64x8xf32>
    %135 = arith.mulf %131, %134 : vector<64x8xf32>
    %136 = vector.extract_strided_slice %132 {offsets = [1, 0], sizes = [1, 8], strides = [1, 1]} : vector<2x8xf32> to vector<1x8xf32>
    %137 = vector.broadcast %136 : vector<1x8xf32> to vector<64x8xf32>
    %138 = arith.addf %135, %137 : vector<64x8xf32>
    %cst_39 = arith.constant 0.000000e+00 : f32
    %139 = vector.broadcast %cst_39 : f32 to vector<64x8xf32>
    %140 = arith.maximumf %138, %139 : vector<64x8xf32>
    %c0_40 = arith.constant 0 : index
    %c0_41 = arith.constant 0 : index
    %141 = vector.load %arg8[%c0_40, %c0_41] : memref<2x4xf32, #tpu.memory_space<vmem>>, vector<2x4xf32>
    %c0_42 = arith.constant 0 : index
    %c0_43 = arith.constant 0 : index
    %142 = vector.load %arg9[%c0_42, %c0_43] : memref<4x32xbf16, #tpu.memory_space<vmem>>, vector<4x32xbf16>
    %143 = vector.extract_strided_slice %141 {offsets = [0, 0], sizes = [1, 4], strides = [1, 1]} : vector<2x4xf32> to vector<1x4xf32>
    %144 = vector.broadcast %143 : vector<1x4xf32> to vector<256x4xf32>
    %145 = arith.mulf %1, %144 : vector<256x4xf32>
    %146 = vector.extract_strided_slice %141 {offsets = [1, 0], sizes = [1, 4], strides = [1, 1]} : vector<2x4xf32> to vector<1x4xf32>
    %147 = vector.broadcast %146 : vector<1x4xf32> to vector<256x4xf32>
    %148 = arith.addf %145, %147 : vector<256x4xf32>
    %cst_44 = arith.constant 5.000000e-01 : f32
    %149 = vector.broadcast %cst_44 : f32 to vector<256x4xf32>
    %150 = arith.mulf %149, %148 : vector<256x4xf32>
    %cst_45 = arith.constant 4.471500e-02 : f32
    %151 = vector.broadcast %cst_45 : f32 to vector<256x4xf32>
    %152 = arith.mulf %151, %148 : vector<256x4xf32>
    %153 = arith.mulf %152, %148 : vector<256x4xf32>
    %154 = arith.mulf %153, %148 : vector<256x4xf32>
    %155 = arith.addf %148, %154 : vector<256x4xf32>
    %cst_46 = arith.constant 0.797884583 : f32
    %156 = vector.broadcast %cst_46 : f32 to vector<256x4xf32>
    %157 = arith.mulf %156, %155 : vector<256x4xf32>
    %158 = math.tanh %157 : vector<256x4xf32>
    %cst_47 = arith.constant 1.000000e+00 : f32
    %159 = vector.broadcast %cst_47 : f32 to vector<256x4xf32>
    %160 = arith.addf %159, %158 : vector<256x4xf32>
    %161 = arith.mulf %150, %160 : vector<256x4xf32>
    %162 = arith.truncf %161 : vector<256x4xf32> to vector<256x4xbf16>
    %cst_48 = arith.constant dense<0.000000e+00> : vector<256x32xf32>
    %163 = tpu.matmul %162, %142, %cst_48 {dimension_numbers = #tpu.dot_dimension_numbers<[1], [0], [0], [1], [0, 0, 1, 1], [], []>} : vector<256x4xbf16>, vector<4x32xbf16>, vector<256x32xf32> -> vector<256x32xf32>
    %cst_49 = arith.constant 0.000000e+00 : f32
    %164 = vector.broadcast %cst_49 : f32 to vector<16x8xf32>
    %cst_50 = arith.constant 0.000000e+00 : f32
    %165 = vector.broadcast %cst_50 : f32 to vector<1x8xf32>
    %166 = tpu.iota {dimensions = array<i32: 1>} : vector<16x16x1xi32>
    %167 = vector.shape_cast %166 : vector<16x16x1xi32> to vector<256x1xi32>
    %168 = vector.extract_strided_slice %163 {offsets = [16, 0], sizes = [240, 8], strides = [1, 1]} : vector<256x32xf32> to vector<240x8xf32>
    %169 = tpu.concatenate %168, %164 in 0 : vector<240x8xf32>, vector<16x8xf32> -> vector<256x8xf32>
    %170 = vector.extract_strided_slice %163 {offsets = [0, 8], sizes = [240, 8], strides = [1, 1]} : vector<256x32xf32> to vector<240x8xf32>
    %171 = tpu.concatenate %164, %170 in 0 : vector<16x8xf32>, vector<240x8xf32> -> vector<256x8xf32>
    %172 = arith.addf %169, %171 : vector<256x8xf32>
    %173 = vector.extract_strided_slice %163 {offsets = [0, 16], sizes = [255, 8], strides = [1, 1]} : vector<256x32xf32> to vector<255x8xf32>
    %174 = tpu.concatenate %165, %173 in 0 : vector<1x8xf32>, vector<255x8xf32> -> vector<256x8xf32>
    %c1_i32_51 = arith.constant 1 : i32
    %175 = vector.broadcast %c1_i32_51 : i32 to vector<256x1xi32>
    %176 = arith.cmpi sge, %167, %175 : vector<256x1xi32>
    %cst_52 = arith.constant 0.000000e+00 : f32
    %177 = vector.shape_cast %176 : vector<256x1xi1> to vector<256x1xi1>
    %178 = vector.broadcast %177 : vector<256x1xi1> to vector<256x8xi1>
    %179 = vector.broadcast %cst_52 : f32 to vector<256x8xf32>
    %180 = arith.select %178, %174, %179 : vector<256x8xi1>, vector<256x8xf32>
    %181 = arith.addf %172, %180 : vector<256x8xf32>
    %182 = vector.extract_strided_slice %163 {offsets = [1, 24], sizes = [255, 8], strides = [1, 1]} : vector<256x32xf32> to vector<255x8xf32>
    %183 = tpu.concatenate %182, %165 in 0 : vector<255x8xf32>, vector<1x8xf32> -> vector<256x8xf32>
    %c15_i32_53 = arith.constant 15 : i32
    %184 = vector.broadcast %c15_i32_53 : i32 to vector<256x1xi32>
    %185 = arith.cmpi slt, %167, %184 : vector<256x1xi32>
    %cst_54 = arith.constant 0.000000e+00 : f32
    %186 = vector.shape_cast %185 : vector<256x1xi1> to vector<256x1xi1>
    %187 = vector.broadcast %186 : vector<256x1xi1> to vector<256x8xi1>
    %188 = vector.broadcast %cst_54 : f32 to vector<256x8xf32>
    %189 = arith.select %187, %183, %188 : vector<256x8xi1>, vector<256x8xf32>
    %190 = arith.addf %181, %189 : vector<256x8xf32>
    %191 = vector.shape_cast %190 : vector<256x8xf32> to vector<16x16x8xf32>
    %cst_55 = arith.constant -1.000000e+30 : f32
    %192 = vector.broadcast %cst_55 : f32 to vector<16x1x8xf32>
    %193 = vector.extract_strided_slice %191 {offsets = [0, 0, 0], sizes = [16, 15, 8], strides = [1, 1, 1]} : vector<16x16x8xf32> to vector<16x15x8xf32>
    %194 = tpu.concatenate %192, %193 in 1 : vector<16x1x8xf32>, vector<16x15x8xf32> -> vector<16x16x8xf32>
    %195 = vector.extract_strided_slice %191 {offsets = [0, 1, 0], sizes = [16, 15, 8], strides = [1, 1, 1]} : vector<16x16x8xf32> to vector<16x15x8xf32>
    %196 = tpu.concatenate %195, %192 in 1 : vector<16x15x8xf32>, vector<16x1x8xf32> -> vector<16x16x8xf32>
    %197 = arith.maximumf %194, %191 : vector<16x16x8xf32>
    %198 = arith.maximumf %197, %196 : vector<16x16x8xf32>
    %199 = vector.shape_cast %198 : vector<16x16x8xf32> to vector<8x2x16x8xf32>
    %200 = vector.extract_strided_slice %199 {offsets = [0, 0, 0, 0], sizes = [8, 1, 16, 8], strides = [1, 1, 1, 1]} : vector<8x2x16x8xf32> to vector<8x1x16x8xf32>
    %201 = vector.shape_cast %200 : vector<8x1x16x8xf32> to vector<8x16x8xf32>
    %202 = vector.extract_strided_slice %199 {offsets = [0, 1, 0, 0], sizes = [8, 1, 16, 8], strides = [1, 1, 1, 1]} : vector<8x2x16x8xf32> to vector<8x1x16x8xf32>
    %203 = vector.shape_cast %202 : vector<8x1x16x8xf32> to vector<8x16x8xf32>
    %cst_56 = arith.constant -1.000000e+30 : f32
    %204 = vector.broadcast %cst_56 : f32 to vector<1x16x8xf32>
    %205 = vector.extract_strided_slice %203 {offsets = [0, 0, 0], sizes = [7, 16, 8], strides = [1, 1, 1]} : vector<8x16x8xf32> to vector<7x16x8xf32>
    %206 = tpu.concatenate %204, %205 in 0 : vector<1x16x8xf32>, vector<7x16x8xf32> -> vector<8x16x8xf32>
    %207 = arith.maximumf %201, %203 : vector<8x16x8xf32>
    %208 = arith.maximumf %207, %206 : vector<8x16x8xf32>
    %209 = vector.shape_cast %208 : vector<8x16x8xf32> to vector<128x8xf32>
    %c0_57 = arith.constant 0 : index
    %c0_58 = arith.constant 0 : index
    %210 = vector.load %arg12[%c0_57, %c0_58] : memref<128x8xf32, #tpu.memory_space<vmem>>, vector<128x8xf32>
    tpu.vector_store %arg12[%c0_57, %c0_58], %209 {strides = array<i32>} : memref<128x8xf32, #tpu.memory_space<vmem>>, vector<128x8xf32>,
    %c0_59 = arith.constant 0 : index
    %c0_60 = arith.constant 0 : index
    %211 = tpu.strided_load %arg12[%c0_59, %c0_60] {strides = array<i32: 2, 1>} : memref<128x8xf32, #tpu.memory_space<vmem>>, vector<64x8xf32>
    %c0_61 = arith.constant 0 : index
    %c0_62 = arith.constant 0 : index
    %212 = vector.load %arg10[%c0_61, %c0_62] : memref<2x8xf32, #tpu.memory_space<vmem>>, vector<2x8xf32>
    %213 = vector.extract_strided_slice %212 {offsets = [0, 0], sizes = [1, 8], strides = [1, 1]} : vector<2x8xf32> to vector<1x8xf32>
    %214 = vector.broadcast %213 : vector<1x8xf32> to vector<64x8xf32>
    %215 = arith.mulf %211, %214 : vector<64x8xf32>
    %216 = vector.extract_strided_slice %212 {offsets = [1, 0], sizes = [1, 8], strides = [1, 1]} : vector<2x8xf32> to vector<1x8xf32>
    %217 = vector.broadcast %216 : vector<1x8xf32> to vector<64x8xf32>
    %218 = arith.addf %215, %217 : vector<64x8xf32>
    %219 = arith.addf %140, %218 : vector<64x8xf32>
    %220 = vector.shape_cast %219 : vector<64x8xf32> to vector<8x8x8xf32>
    %221 = vector.extract_strided_slice %220 {offsets = [0, 0, 0], sizes = [8, 1, 8], strides = [1, 1, 1]} : vector<8x8x8xf32> to vector<8x1x8xf32>
    %222 = vector.shape_cast %221 : vector<8x1x8xf32> to vector<8x8xf32>
    %223 = vector.extract_strided_slice %220 {offsets = [0, 1, 0], sizes = [8, 1, 8], strides = [1, 1, 1]} : vector<8x8x8xf32> to vector<8x1x8xf32>
    %224 = vector.shape_cast %223 : vector<8x1x8xf32> to vector<8x8xf32>
    %225 = vector.extract_strided_slice %220 {offsets = [0, 2, 0], sizes = [8, 1, 8], strides = [1, 1, 1]} : vector<8x8x8xf32> to vector<8x1x8xf32>
    %226 = vector.shape_cast %225 : vector<8x1x8xf32> to vector<8x8xf32>
    %227 = vector.extract_strided_slice %220 {offsets = [0, 3, 0], sizes = [8, 1, 8], strides = [1, 1, 1]} : vector<8x8x8xf32> to vector<8x1x8xf32>
    %228 = vector.shape_cast %227 : vector<8x1x8xf32> to vector<8x8xf32>
    %229 = vector.extract_strided_slice %220 {offsets = [0, 4, 0], sizes = [8, 1, 8], strides = [1, 1, 1]} : vector<8x8x8xf32> to vector<8x1x8xf32>
    %230 = vector.shape_cast %229 : vector<8x1x8xf32> to vector<8x8xf32>
    %231 = vector.extract_strided_slice %220 {offsets = [0, 5, 0], sizes = [8, 1, 8], strides = [1, 1, 1]} : vector<8x8x8xf32> to vector<8x1x8xf32>
    %232 = vector.shape_cast %231 : vector<8x1x8xf32> to vector<8x8xf32>
    %233 = vector.extract_strided_slice %220 {offsets = [0, 6, 0], sizes = [8, 1, 8], strides = [1, 1, 1]} : vector<8x8x8xf32> to vector<8x1x8xf32>
    %234 = vector.shape_cast %233 : vector<8x1x8xf32> to vector<8x8xf32>
    %235 = vector.extract_strided_slice %220 {offsets = [0, 7, 0], sizes = [8, 1, 8], strides = [1, 1, 1]} : vector<8x8x8xf32> to vector<8x1x8xf32>
    %236 = vector.shape_cast %235 : vector<8x1x8xf32> to vector<8x8xf32>
    %237 = tpu.concatenate %222, %224, %226, %228, %230, %232, %234, %236 in 1 : vector<8x8xf32>, vector<8x8xf32>, vector<8x8xf32>, vector<8x8xf32>, vector<8x8xf32>, vector<8x8xf32>, vector<8x8xf32>, vector<8x8xf32> -> vector<8x64xf32>
    %c0_63 = arith.constant 0 : index
    %c0_64 = arith.constant 0 : index
    %c0_65 = arith.constant 0 : index
    %238 = vector.load %arg11[%c0_63, %c0_64, %c0_65] : memref<1x8x64xf32, #tpu.memory_space<vmem>>, vector<1x8x64xf32>
    %239 = vector.shape_cast %238 : vector<1x8x64xf32> to vector<8x64xf32>
    %240 = vector.shape_cast %237 : vector<8x64xf32> to vector<1x8x64xf32>
    tpu.vector_store %arg11[%c0_63, %c0_64, %c0_65], %240 {strides = array<i32>} : memref<1x8x64xf32, #tpu.memory_space<vmem>>, vector<1x8x64xf32>,
    return
  }
  func.func @transform_0(%arg0: i32) -> (i32, i32, i32) {
    %c0_i32 = arith.constant 0 : i32
    %c0_i32_0 = arith.constant 0 : i32
    %c0_i32_1 = arith.constant 0 : i32
    return %arg0, %c0_i32, %c0_i32_0 : i32, i32, i32
  }
  func.func @transform_1(%arg0: i32) -> (i32, i32) {
    %c0_i32 = arith.constant 0 : i32
    %c0_i32_0 = arith.constant 0 : i32
    %c0_i32_1 = arith.constant 0 : i32
    return %c0_i32, %c0_i32_0 : i32, i32
  }
  func.func @transform_2(%arg0: i32) -> (i32, i32) {
    %c0_i32 = arith.constant 0 : i32
    %c0_i32_0 = arith.constant 0 : i32
    %c0_i32_1 = arith.constant 0 : i32
    return %c0_i32, %c0_i32_0 : i32, i32
  }
  func.func @transform_3(%arg0: i32) -> (i32, i32) {
    %c0_i32 = arith.constant 0 : i32
    %c0_i32_0 = arith.constant 0 : i32
    %c0_i32_1 = arith.constant 0 : i32
    return %c0_i32, %c0_i32_0 : i32, i32
  }
  func.func @transform_4(%arg0: i32) -> (i32, i32) {
    %c0_i32 = arith.constant 0 : i32
    %c0_i32_0 = arith.constant 0 : i32
    %c0_i32_1 = arith.constant 0 : i32
    return %c0_i32, %c0_i32_0 : i32, i32
  }
  func.func @transform_5(%arg0: i32) -> (i32, i32) {
    %c0_i32 = arith.constant 0 : i32
    %c0_i32_0 = arith.constant 0 : i32
    %c0_i32_1 = arith.constant 0 : i32
    return %c0_i32, %c0_i32_0 : i32, i32
  }
  func.func @transform_6(%arg0: i32) -> (i32, i32) {
    %c0_i32 = arith.constant 0 : i32
    %c0_i32_0 = arith.constant 0 : i32
    %c0_i32_1 = arith.constant 0 : i32
    return %c0_i32, %c0_i32_0 : i32, i32
  }
  func.func @transform_7(%arg0: i32) -> (i32, i32) {
    %c0_i32 = arith.constant 0 : i32
    %c0_i32_0 = arith.constant 0 : i32
    %c0_i32_1 = arith.constant 0 : i32
    return %c0_i32, %c0_i32_0 : i32, i32
  }
  func.func @transform_8(%arg0: i32) -> (i32, i32) {
    %c0_i32 = arith.constant 0 : i32
    %c0_i32_0 = arith.constant 0 : i32
    %c0_i32_1 = arith.constant 0 : i32
    return %c0_i32, %c0_i32_0 : i32, i32
  }
  func.func @transform_9(%arg0: i32) -> (i32, i32) {
    %c0_i32 = arith.constant 0 : i32
    %c0_i32_0 = arith.constant 0 : i32
    %c0_i32_1 = arith.constant 0 : i32
    return %c0_i32, %c0_i32_0 : i32, i32
  }
  func.func @transform_10(%arg0: i32) -> (i32, i32, i32) {
    %c0_i32 = arith.constant 0 : i32
    %c0_i32_0 = arith.constant 0 : i32
    %c0_i32_1 = arith.constant 0 : i32
    return %arg0, %c0_i32, %c0_i32_0 : i32, i32, i32
  }
}

</mosaic_0001>

<bundles_post_ra>
// kernel: basic_block_spc.1
= control target key start
LH: loop header
LB: loop body
LE: loop exit
PB: predicated region body
PF: predicated region fallthrough
CT: control target
= control target key end

     0   :  { %s8621_s0 = inlined_call_operand.hbm [shape: f32[2,256,4], index: 0, kind: input, shape index: {}]   ;;  %s8622_s1 = inlined_call_operand.hbm [shape: f32[2,4], index: 1, kind: input, shape index: {}]   ;;  %s8623_s2 = inlined_call_operand.hbm [shape: bf16[4,32], index: 2, kind: input, shape index: {}]   ;;  %s8624_s3 = inlined_call_operand.hbm [shape: f32[2,8], index: 3, kind: input, shape index: {}]   ;;  %s8625_s4 = inlined_call_operand.hbm [shape: f32[2,8], index: 4, kind: input, shape index: {}]   ;;  %s8626_s5 = inlined_call_operand.hbm [shape: bf16[8,32], index: 5, kind: input, shape index: {}]   ;;  %s8627_s6 = inlined_call_operand.hbm [shape: f32[2,8], index: 6, kind: input, shape index: {}]   ;;  %s8628_s7 = inlined_call_operand.hbm [shape: f32[2,4], index: 7, kind: input, shape index: {}]   ;;  %s8629_s8 = inlined_call_operand.hbm [shape: bf16[4,32], index: 8, kind: input, shape index: {}]   ;;  %s8630_s9 = inlined_call_operand.hbm [shape: f32[2,8], index: 9, kind: input, shape index: {}]   ;;  %s8631_s10 = inlined_call_operand.hbm [shape: f32[2,8,64], index: 10, kind: output, shape index: {}]  }
   0x1   :  { %8695 = sst [smem:[#allocation68_spill]] %s8622_s1 }
   0x2   :  { %8696 = sst [smem:[#allocation69_spill]] %s8631_s10 }
   0x3   :  { %15 = vsyncpa [#allocation4], 0 }
   0x4   :  { %17 = vsyncpa [#allocation4 + $0x1], 0 }
   0x5   :  { %18 = vsyncpa [#allocation7], 0 }
   0x6   :  { %19 = vsyncpa [#allocation10], 0 }
   0x7   :  { %20 = vsyncpa [#allocation13], 0 }
   0x8   :  { %21 = vsyncpa [#allocation16], 0 }
   0x9   :  { %22 = vsyncpa [#allocation19], 0 }
   0xa   :  { %23 = vsyncpa [#allocation5], 0 }
   0xb   :  { %25 = vsyncpa [#allocation5 + $0x1], 0  ;;  %s5499_s13 = smov 0   ;;  %s5501_s14 = smov 0  }
   0xc   :  { %s5503_s15 = smov 0   ;;  %s5505_s16 = smov 0  }
   0xd LB: > { %s5421_s17 = smov [#allocation6]   ;;  %s5520_s19 = sadd.s32 4294967295, %s5419_s16   ;;  %s5419_s16 = sphi %s5505_s16, %s8918_s16   ;;  %s5415_s15 = sphi %s5503_s15, %s8917_s15   ;;  %s5411_s14 = sphi %s5501_s14, %s8916_s14   ;;  %s5407_s13 = sphi %s5499_s13, %s8915_s13  }
   0xe   : > { %s290_s18 = sshll.u32 %s5421_s17, 4  ;;  %p4536_p0 = scmp.ge.s32.totalorder %s5419_s16, 1  ;;  %s5525_s18 = int_to_ptr.vmem [resolvable:$true] %s290_s18 }
   0xf   : > { %p8633_p1 = scmp.eq.s32.totalorder %s5520_s19, 0  ;;  %p277_p2 = scmp.lt.s32.totalorder %s5419_s16, 3 }
  0x10   : > { %s5422_s21 = smov [#allocation9]   ;;  %s5423_s23 = smov [#allocation12]  }
  0x11   : > { %p5527_p3 = pnand %p4536_p0, %p277_p2  ;;  %s312_s22 = sshll.u32 %s5422_s21, 4  ;;  %s5534_s22 = int_to_ptr.vmem [resolvable:$true] %s312_s22 }
  0x12   : > { %s334_s24 = sshll.u32 %s5423_s23, 4  ;;  %s5424_s26 = smov [#allocation15]   ;;  %s5542_s24 = int_to_ptr.vmem [resolvable:$true] %s334_s24 }
  0x13   : > { %s8697_s20 = scalar_select %p5527_p3, 1, 0 }
  0x14   : > { %p4766_p5 = pneg %p5527_p3  ;;  %s5544_s27 = sshll.u32 %s5424_s26, 4  ;;  %s357_s27 = int_to_ptr.vmem [resolvable:$true] %s5544_s27 }
  0x15   : > { %s8699_s1 = sld [smem:[#allocation68_spill]] }
  0x16   : > { %p5538_p6 = pnand %p4766_p5, %p8633_p1 }
  0x18   : > { %p5554_p8 = pneg %p5538_p6 }
  0x1b   : > { %s5051_s30 = scalar_lea.hbm %s8699_s1, 32 }
  0x1c   : > { %p5052_p7 = scmp.ne.s32.totalorder %s8699_s1, %s5051_s30  ;;  %p5058_p11 = scmp.lt.u32.totalorder %s5051_s30, %s8699_s1 }
  0x1e   : > { %p5054_p9 = pnand %p5554_p8, %p5052_p7 }
  0x20   : > { %p5055_p10 = pneg %p5054_p9 }
  0x22   : > { %p5060_p12 = pnand %p5058_p11, %p5055_p10 }
  0x24   : > { %5063 = shalt.err (!%p5060_p12)
}
  0x25   : > { %s5064_s26 = scalar_lea.vmem %s5525_s18, 32  ;;  %p5072_p5 = scmp.lt.s32.totalorder %s5525_s18, %s5525_s18 }
  0x26   : > { %p5065_p13 = scmp.ne.s32.totalorder %s5525_s18, %s5064_s26  ;;  %p5073_p4 = scmp.lt.s32.totalorder %s5064_s26, %s5064_s26 }
  0x28   : > { %p5067_p0 = pnand %p5065_p13, %p5554_p8  ;;  %p5074_p7 = por %p5073_p4, %p5072_p5 }
  0x2a   : > { %p5068_p2 = pneg %p5067_p0 }
  0x2c   : > { %p5075_p9 = pnand %p5074_p7, %p5068_p2 }
  0x2e   : > { %5078 = shalt.err (!%p5075_p9)
}
  0x2f   : > { %4769 = dma.hbm_to_vmem [thread:$0]  (!%p5538_p6), %s8699_s1, 32, %s5525_s18, [#allocation7]  }
  0x30   : > { %s5079_s12 = scalar_lea.hbm %s8624_s3, 32 }
  0x31   : > { %p5080_p10 = scmp.ne.s32.totalorder %s8624_s3, %s5079_s12  ;;  %p5086_p12 = scmp.lt.u32.totalorder %s5079_s12, %s8624_s3 }
  0x33   : > { %p5082_p4 = pnand %p5080_p10, %p5554_p8 }
  0x35   : > { %p5083_p11 = pneg %p5082_p4 }
  0x37   : > { %p5088_p13 = pnand %p5086_p12, %p5083_p11 }
  0x39   : > { %5091 = shalt.err (!%p5088_p13)
}
  0x3a   : > { %s5092_s18 = scalar_lea.vmem %s5534_s22, 32  ;;  %p5100_p7 = scmp.lt.s32.totalorder %s5534_s22, %s5534_s22 }
  0x3b   : > { %p5093_p0 = scmp.ne.s32.totalorder %s5534_s22, %s5092_s18  ;;  %p5101_p9 = scmp.lt.s32.totalorder %s5092_s18, %s5092_s18 }
  0x3d   : > { %p5095_p2 = pnand %p5093_p0, %p5554_p8  ;;  %p5102_p10 = por %p5101_p9, %p5100_p7 }
  0x3f   : > { %p5096_p5 = pneg %p5095_p2 }
  0x41   : > { %p5103_p4 = pnand %p5102_p10, %p5096_p5 }
  0x43   : > { %5106 = shalt.err (!%p5103_p4)
}
  0x44   : > { %4775 = dma.hbm_to_vmem [thread:$0]  (!%p5538_p6), %s8624_s3, 32, %s5534_s22, [#allocation10]  }
  0x45   : > { %s5107_s11 = scalar_lea.hbm %s8626_s5, 64 }
  0x46   : > { %p5108_p11 = scmp.ne.s32.totalorder %s8626_s5, %s5107_s11  ;;  %p5114_p0 = scmp.lt.u32.totalorder %s5107_s11, %s8626_s5 }
  0x48   : > { %p5110_p12 = pnand %p5108_p11, %p5554_p8 }
  0x4a   : > { %p5111_p13 = pneg %p5110_p12 }
  0x4c   : > { %p5116_p2 = pnand %p5114_p0, %p5111_p13 }
  0x4e   : > { %5119 = shalt.err (!%p5116_p2)
}
  0x4f   : > { %s5120_s22 = scalar_lea.vmem %s5542_s24, 64  ;;  %p5128_p10 = scmp.lt.s32.totalorder %s5542_s24, %s5542_s24 }
  0x50   : > { %p5121_p5 = scmp.ne.s32.totalorder %s5542_s24, %s5120_s22  ;;  %p5129_p4 = scmp.lt.s32.totalorder %s5120_s22, %s5120_s22 }
  0x52   : > { %p5123_p7 = pnand %p5121_p5, %p5554_p8  ;;  %p5130_p11 = por %p5129_p4, %p5128_p10 }
  0x54   : > { %p5124_p9 = pneg %p5123_p7 }
  0x56   : > { %p5131_p12 = pnand %p5130_p11, %p5124_p9 }
  0x58   : > { %5134 = shalt.err (!%p5131_p12)
}
  0x59   : > { %4781 = dma.hbm_to_vmem [thread:$0]  (!%p5538_p6), %s8626_s5, 64, %s5542_s24, [#allocation13]  }
  0x5a   : > { %s5425_s28 = smov [#allocation8]   ;;  %s5135_s12 = scalar_lea.hbm %s8628_s7, 32 }
  0x5b   : > { %s301_s29 = sshll.u32 %s5425_s28, 4  ;;  %p5136_p13 = scmp.ne.s32.totalorder %s8628_s7, %s5135_s12  ;;  %s302_s29 = int_to_ptr.vmem [resolvable:$true] %s301_s29 }
  0x5c   : > { %p5142_p5 = scmp.lt.u32.totalorder %s5135_s12, %s8628_s7 }
  0x5d   : > { %p5138_p0 = pnand %p5136_p13, %p5554_p8 }
  0x5f   : > { %p5139_p2 = pneg %p5138_p0 }
  0x61   : > { %p5144_p7 = pnand %p5142_p5, %p5139_p2 }
  0x63   : > { %5147 = shalt.err (!%p5144_p7)
}
  0x64   : > { %s5148_s24 = scalar_lea.vmem %s357_s27, 32  ;;  %p5156_p11 = scmp.lt.s32.totalorder %s357_s27, %s357_s27 }
  0x65   : > { %p5149_p9 = scmp.ne.s32.totalorder %s357_s27, %s5148_s24  ;;  %p5157_p12 = scmp.lt.s32.totalorder %s5148_s24, %s5148_s24 }
  0x67   : > { %p5151_p10 = pnand %p5149_p9, %p5554_p8  ;;  %p5158_p1 = por %p5157_p12, %p5156_p11 }
  0x69   : > { %p5152_p4 = pneg %p5151_p10 }
  0x6b   : > { %p5159_p3 = pnand %p5158_p1, %p5152_p4 }
  0x6d   : > { %5162 = shalt.err (!%p5159_p3)
}
  0x6e   : > { %4787 = dma.hbm_to_vmem [thread:$0]  (!%p5538_p6), %s8628_s7, 32, %s357_s27, [#allocation16]  }
  0x6f   : > { %s5163_s11 = scalar_lea.hbm %s8623_s2, 32 }
  0x70   : > { %p5164_p13 = scmp.ne.s32.totalorder %s8623_s2, %s5163_s11  ;;  %p5170_p3 = scmp.lt.u32.totalorder %s5163_s11, %s8623_s2 }
  0x72   : > { %p5166_p0 = pnand %p5164_p13, %p5554_p8 }
  0x74   : > { %p5167_p1 = pneg %p5166_p0 }
  0x76   : > { %p5172_p2 = pnand %p5170_p3, %p5167_p1 }
  0x78   : > { %5175 = shalt.err (!%p5172_p2)
}
  0x79   : > { %s5176_s22 = scalar_lea.vmem %s302_s29, 32  ;;  %p5184_p10 = scmp.lt.s32.totalorder %s302_s29, %s302_s29 }
  0x7a   : > { %p5177_p5 = scmp.ne.s32.totalorder %s302_s29, %s5176_s22  ;;  %p5185_p4 = scmp.lt.s32.totalorder %s5176_s22, %s5176_s22 }
  0x7c   : > { %p5179_p7 = pnand %p5177_p5, %p5554_p8  ;;  %p5186_p11 = por %p5185_p4, %p5184_p10 }
  0x7e   : > { %p5180_p9 = pneg %p5179_p7 }
  0x80   : > { %p5187_p12 = pnand %p5186_p11, %p5180_p9 }
  0x82   : > { %5190 = shalt.err (!%p5187_p12)
}
  0x83   : > { %4772 = dma.hbm_to_vmem [thread:$0]  (!%p5538_p6), %s8623_s2, 32, %s302_s29, [#allocation7]  }
  0x84   : > { %s5426_s18 = smov [#allocation11]   ;;  %s5427_s28 = smov [#allocation14]  }
  0x85   : > { %s323_s10 = sshll.u32 %s5426_s18, 4  ;;  %s345_s30 = sshll.u32 %s5427_s28, 4  ;;  %s324_s10 = int_to_ptr.vmem [resolvable:$true] %s323_s10  ;;  %s346_s30 = int_to_ptr.vmem [resolvable:$true] %s345_s30 }
  0x86   : > { %s5191_s21 = scalar_lea.hbm %s8625_s4, 32 }
  0x87   : > { %p5192_p13 = scmp.ne.s32.totalorder %s8625_s4, %s5191_s21  ;;  %p5198_p3 = scmp.lt.u32.totalorder %s5191_s21, %s8625_s4 }
  0x89   : > { %p5194_p0 = pnand %p5192_p13, %p5554_p8 }
  0x8b   : > { %p5195_p1 = pneg %p5194_p0 }
  0x8d   : > { %p5200_p2 = pnand %p5198_p3, %p5195_p1 }
  0x8f   : > { %5203 = shalt.err (!%p5200_p2)
}
  0x90   : > { %s5204_s29 = scalar_lea.vmem %s324_s10, 32  ;;  %p5212_p10 = scmp.lt.s32.totalorder %s324_s10, %s324_s10 }
  0x91   : > { %p5205_p5 = scmp.ne.s32.totalorder %s324_s10, %s5204_s29  ;;  %p5213_p4 = scmp.lt.s32.totalorder %s5204_s29, %s5204_s29 }
  0x93   : > { %p5207_p7 = pnand %p5205_p5, %p5554_p8  ;;  %p5214_p11 = por %p5213_p4, %p5212_p10 }
  0x95   : > { %p5208_p9 = pneg %p5207_p7 }
  0x97   : > { %p5215_p12 = pnand %p5214_p11, %p5208_p9 }
  0x99   : > { %5218 = shalt.err (!%p5215_p12)
}
  0x9a   : > { %4778 = dma.hbm_to_vmem [thread:$0]  (!%p5538_p6), %s8625_s4, 32, %s324_s10, [#allocation10]  }
  0x9b   : > { %s5219_s12 = scalar_lea.hbm %s8627_s6, 32 }
  0x9c   : > { %p5220_p13 = scmp.ne.s32.totalorder %s8627_s6, %s5219_s12  ;;  %p5226_p3 = scmp.lt.u32.totalorder %s5219_s12, %s8627_s6 }
  0x9e   : > { %p5222_p0 = pnand %p5220_p13, %p5554_p8 }
  0xa0   : > { %p5223_p1 = pneg %p5222_p0 }
  0xa2   : > { %p5228_p2 = pnand %p5226_p3, %p5223_p1 }
  0xa4   : > { %5231 = shalt.err (!%p5228_p2)
}
  0xa5   : > { %s5232_s27 = scalar_lea.vmem %s346_s30, 32  ;;  %p5240_p10 = scmp.lt.s32.totalorder %s346_s30, %s346_s30 }
  0xa6   : > { %p5233_p5 = scmp.ne.s32.totalorder %s346_s30, %s5232_s27  ;;  %p5241_p4 = scmp.lt.s32.totalorder %s5232_s27, %s5232_s27 }
  0xa8   : > { %p5235_p7 = pnand %p5233_p5, %p5554_p8  ;;  %p5242_p11 = por %p5241_p4, %p5240_p10 }
  0xaa   : > { %p5236_p9 = pneg %p5235_p7 }
  0xac   : > { %p5243_p12 = pnand %p5242_p11, %p5236_p9 }
  0xae   : > { %5246 = shalt.err (!%p5243_p12)
}
  0xaf   : > { %4784 = dma.hbm_to_vmem [thread:$0]  (!%p5538_p6), %s8627_s6, 32, %s346_s30, [#allocation13]  }
  0xb0   : > { %s5428_s24 = smov [#allocation17]   ;;  %s5429_s28 = smov [#allocation18]  }
  0xb1   : > { %s367_s18 = sshll.u32 %s5428_s24, 4  ;;  %s378_s11 = sshll.u32 %s5429_s28, 4  ;;  %s368_s18 = int_to_ptr.vmem [resolvable:$true] %s367_s18  ;;  %s379_s11 = int_to_ptr.vmem [resolvable:$true] %s378_s11 }
  0xb2   : > { %s5247_s23 = scalar_lea.hbm %s8629_s8, 32 }
  0xb3   : > { %p5248_p13 = scmp.ne.s32.totalorder %s8629_s8, %s5247_s23  ;;  %p5254_p3 = scmp.lt.u32.totalorder %s5247_s23, %s8629_s8 }
  0xb5   : > { %p5250_p0 = pnand %p5248_p13, %p5554_p8 }
  0xb7   : > { %p5251_p1 = pneg %p5250_p0 }
  0xb9   : > { %p5256_p2 = pnand %p5254_p3, %p5251_p1 }
  0xbb   : > { %5259 = shalt.err (!%p5256_p2)
}
  0xbc   : > { %s5260_s30 = scalar_lea.vmem %s368_s18, 32  ;;  %p5268_p10 = scmp.lt.s32.totalorder %s368_s18, %s368_s18 }
  0xbd   : > { %p5261_p5 = scmp.ne.s32.totalorder %s368_s18, %s5260_s30  ;;  %p5269_p4 = scmp.lt.s32.totalorder %s5260_s30, %s5260_s30 }
  0xbf   : > { %p5263_p7 = pnand %p5261_p5, %p5554_p8  ;;  %p5270_p11 = por %p5269_p4, %p5268_p10 }
  0xc1   : > { %p5264_p9 = pneg %p5263_p7 }
  0xc3   : > { %p5271_p12 = pnand %p5270_p11, %p5264_p9 }
  0xc5   : > { %5274 = shalt.err (!%p5271_p12)
}
  0xc6   : > { %4790 = dma.hbm_to_vmem [thread:$0]  (!%p5538_p6), %s8629_s8, 32, %s368_s18, [#allocation16]  }
  0xc7   : > { %s5275_s21 = scalar_lea.hbm %s8630_s9, 32 }
  0xc8   : > { %p5276_p13 = scmp.ne.s32.totalorder %s8630_s9, %s5275_s21  ;;  %p5282_p3 = scmp.lt.u32.totalorder %s5275_s21, %s8630_s9 }
  0xca   : > { %p5278_p0 = pnand %p5276_p13, %p5554_p8 }
  0xcc   : > { %p5279_p1 = pneg %p5278_p0 }
  0xce   : > { %p5284_p2 = pnand %p5282_p3, %p5279_p1 }
  0xd0   : > { %5287 = shalt.err (!%p5284_p2)
}
  0xd1   : > { %s5288_s10 = scalar_lea.vmem %s379_s11, 32  ;;  %p5296_p10 = scmp.lt.s32.totalorder %s379_s11, %s379_s11 }
  0xd2   : > { %p5289_p5 = scmp.ne.s32.totalorder %s379_s11, %s5288_s10  ;;  %p5297_p4 = scmp.lt.s32.totalorder %s5288_s10, %s5288_s10 }
  0xd4   : > { %p5291_p7 = pnand %p5289_p5, %p5554_p8  ;;  %p5298_p11 = por %p5297_p4, %p5296_p10 }
  0xd6   : > { %p5292_p9 = pneg %p5291_p7 }
  0xd8   : > { %p5299_p12 = pnand %p5298_p11, %p5292_p9 }
  0xda   : > { %5302 = shalt.err (!%p5299_p12)
}
  0xdb   : > { %4793 = dma.hbm_to_vmem [thread:$0]  (!%p5538_p6), %s8630_s9, 32, %s379_s11, [#allocation19]  }
  0xdc   : > { %s4535_s17 = sadd.s32 4294967294, %s5419_s16   ;;  %s5732_s25 = sadd.s32 1, %s5419_s16  }
  0xdd   : > { %s38_s29 = sadd.s32 1, %s5415_s15  ;;  %s35_s24 = ssub.s32 %s5419_s16, %s5732_s25 }
  0xde   : > { %p45_p8 = scmp.ne.s32.totalorder %s5415_s15, %s5411_s14  ;;  %p36_p13 = scmp.eq.s32.totalorder %s35_s24, 0 }
  0xdf   : > { %p46_p0 = scmp.eq.s32.totalorder %s5419_s16, 0  ;;  %p51_p1 = scmp.ne.s32.totalorder %s5411_s14, %s5407_s13 }
  0xe0   : > { %p264_p3 = scmp.eq.s32.totalorder %s5520_s19, 1  ;;  %p8701_p5 = scmp.eq.s32.totalorder %s5520_s19, 0 }
  0xe1   : > { %s5744_s28 = scalar_select %p36_p13, %s5415_s15, %s38_s29  }
  0xe2   : > { %p47_p2 = por %p46_p0, %p45_p8  ;;  %p5748_p7 = por %p8701_p5, %p51_p1 }
  0xe3   : > { %p5752_p6 = por %p264_p3, %p45_p8  ;;  %p270_p9 = scmp.eq.s32.totalorder %s4535_s17, 1 }
  0xe4   : > { %p4811_p10 = scmp.lt.s32.totalorder %s5419_s16, 2  ;;  %s389_s21 = sand.u32 1, %s5415_s15  }
  0xe5   : > { %s8703_s11 = scalar_select %p5752_p6, 1, 0 }
  0xe6   : > { %p5758_p4 = por %p270_p9, %p51_p1  ;;  %s4547_s26 = sshll.u32 %s389_s21, 8 }
  0xe7   : > { %s4602_s22 = sshll.u32 %s5419_s16, 12  ;;  %s393_s30 = scalar_lea.vmem [#allocation3], %s4547_s26 }
  0xe8   : > { %s8704_s23 = scalar_select %p5758_p4, 1, 0 }
  0xe9   : > { %s5766_s18 = scalar_lea.hbm %s8621_s0, %s4602_s22  ;;  %s400_s29 = sshll.u32 %s393_s30, 4  ;;  %s5772_s29 = int_to_ptr.vmem [resolvable:$true] %s400_s29 }
  0xea   : > { %p5768_p11 = pnand %p4811_p10, %p47_p2  ;;  %s5774_s24 = scalar_lea.sflag [#allocation4], %s389_s21 }
  0xeb   : > { %s5303_s1 = scalar_lea.hbm %s5766_s18, 4096  ;;  %s5308_s27 = scalar_lea.hbm %s8621_s0, 8192 }
  0xec   : > { %p5304_p12 = scmp.ne.s32.totalorder %s5766_s18, %s5303_s1  ;;  %p5305_p8 = pneg %p5768_p11 }
  0xed   : > { %p5309_p1 = scmp.lt.u32.totalorder %s5766_s18, %s8621_s0  ;;  %p5310_p3 = scmp.lt.u32.totalorder %s5308_s27, %s5303_s1 }
  0xee   : > { %p5306_p13 = pnand %p5305_p8, %p5304_p12  ;;  %p5312_p5 = scmp.lt.u32.totalorder %s5303_s1, %s5766_s18 }
  0xef   : > { %p5311_p2 = por %p5310_p3, %p5309_p1 }
  0xf0   : > { %p5307_p0 = pneg %p5306_p13 }
  0xf1   : > { %p5313_p9 = por %p5312_p5, %p5311_p2 }
  0xf3   : > { %p5314_p10 = pnand %p5313_p9, %p5307_p0 }
  0xf5   : > { %5317 = shalt.err (!%p5314_p10)
}
  0xf6   : > { %s5318_s21 = scalar_lea.vmem %s5772_s29, 4096  ;;  %s5430_s26 = smov [#allocation3]  }
  0xf7   : > { %p5319_p12 = scmp.ne.s32.totalorder %s5772_s29, %s5318_s21  ;;  %s5323_s22 = sshll.u32 %s5430_s26, 4  ;;  %s5324_s22 = int_to_ptr.vmem [resolvable:$false] %s5323_s22 }
  0xf8   : > { %s5325_s10 = scalar_lea.vmem %s5324_s22, 8192  ;;  %p5326_p6 = scmp.lt.s32.totalorder %s5772_s29, %s5324_s22 }
  0xf9   : > { %p5321_p13 = pnand %p5319_p12, %p5305_p8  ;;  %p5327_p1 = scmp.lt.s32.totalorder %s5325_s10, %s5318_s21 }
  0xfb   : > { %p5322_p4 = pneg %p5321_p13  ;;  %p5328_p3 = por %p5327_p1, %p5326_p6 }
  0xfd   : > { %p5329_p2 = pnand %p5328_p3, %p5322_p4 }
  0xff   : > { %5332 = shalt.err (!%p5329_p2)
}
 0x100   : > { %s5431_s1 = smov 128   ;;  %s5432_s27 = smov 8  }
 0x101   : > { %4797 = dma.hbm_to_vmem [thread:$0]  (!%p5768_p11), %s5766_s18, 4096, %s5772_s29, %s5774_s24, %s5431_s1, %s5431_s1, %s5432_s27  }
 0x102   : > { %p8706_p8 = scmp.ne.s32.totalorder %s8697_s20, 0 }
 0x104   : > { %412 = sbr.rel (%p8706_p8) target bundleno = 1660 (0x67c), region = 60 }
 0x10b   : > { %s5805_s30 = sand.u32 1, %s5411_s14  }
 0x10c   : > { %s4551_s21 = sshll.u32 %s5805_s30, 8  ;;  %s415_s26 = scalar_lea.sflag [#allocation4], %s5805_s30 }
 0x10d   : > { %s5809_s22 = scalar_lea.vmem [#allocation3], %s4551_s21 }
 0x10e   : > { %5378 = dma.done.wait (%p5748_p7), %s415_s26, 4096  }
 0x10f   : > { %5380 = vsyncadd (%p5748_p7), %s415_s26, 4294963200  ;;  %p8707_p6 = scmp.eq.s32.totalorder %s5520_s19, 0 }
 0x111   : > { %5382 = dma.done.wait (%p8707_p6), [#allocation7], 64   ;;  %p8708_p4 = pmov %p8707_p6 }
 0x113   : > { %5384 = vsyncadd (%p8708_p4), [#allocation7], 4294967232  ;;  %p8709_p11 = pmov %p8708_p4 }
 0x114   : > { %p8710_p0 = pmov %p8708_p4 }
 0x115   : > { %5386 = dma.done.wait (%p8709_p11), [#allocation10], 64  }
 0x116   : > { %5388 = vsyncadd (%p8710_p0), [#allocation10], 4294967232  ;;  %p8711_p5 = pmov %p8710_p0 }
 0x117   : > { %p8712_p9 = pmov %p8710_p0 }
 0x118   : > { %5390 = dma.done.wait (%p8711_p5), [#allocation13], 96  }
 0x119   : > { %5392 = vsyncadd (%p8712_p9), [#allocation13], 4294967200  ;;  %p8713_p7 = pmov %p8710_p0 }
 0x11a   : > { %p8714_p10 = pmov %p8710_p0 }
 0x11b   : > { %5394 = dma.done.wait (%p8713_p7), [#allocation16], 64  }
 0x11c   : > { %5396 = vsyncadd (%p8714_p10), [#allocation16], 4294967232  ;;  %p8715_p12 = pmov %p8710_p0 }
 0x11d   : > { %p8716_p13 = pmov %p8710_p0 }
 0x11e   : > { %5398 = dma.done.wait (%p8715_p12), [#allocation19], 32  }
 0x11f   : > { %5400 = vsyncadd (%p8716_p13), [#allocation19], 4294967264  ;;  %v526_v0 = vlaneseq  ;;  %vm951_vm0 = vcmask 1041408   ;;  %v525_v4 = vld [vmem:[#allocation8] sm:$0x3]  ;;  %v493_v7 = vld [vmem:[%s5809_s22 + $0x8] sm:$0xff] }
 0x120   : > { %4722 = vmatprep.subr.msk.bf16.mxu0 %vm951_vm0, %v525_v4  ;;  %v953_v5 = vsel %vm951_vm0, %v525_v4, 0  ;;  %v492_v6 = vld [vmem:[%s5809_s22] sm:$0xff]  ;;  %v494_v11 = vld [vmem:[%s5809_s22 + $0x10] sm:$0xff]  ;;  %v495_v12 = vld [vmem:[%s5809_s22 + $0x18] sm:$0xff]  ;;  %vm902_vm1 = vcmask 31744   ;;  %s5433_s20 = smov 120  }
 0x121   : > { %v5835_v1 = vshrl.u32 %v526_v0, 7  ;;  %v524_v8 = vld [vmem:[#allocation6] sm:$0x3]  ;;  %4643 = vmatpush3.bf16.msra.mxu0 %v953_v5  ;;  %v497_v14 = vld [vmem:[%s5809_s22 + $0x28] sm:$0xff]  ;;  %v498_v19 = vld [vmem:[%s5809_s22 + $0x30] sm:$0xff]  ;;  %vm1273_vm2 = vcmask 1040384  }
 0x122   : > { %v496_v13 = vld [vmem:[%s5809_s22 + $0x20] sm:$0xff]  ;;  %v499_v24 = vld [vmem:[%s5809_s22 + $0x38] sm:$0xff]  ;;  %v501_v56 = vld [vmem:[%s5809_s22 + $0x48] sm:$0xff]  ;;  %vm1504_vm3 = vcmask 1046528   ;;  %s5434_s12 = smov 112   ;;  %s5435_s18 = smov 104  }
 0x123   : > { %8717 = vst [vmem:[#allocation28_spill] sm:$0xff] %v5835_v1  ;;  %v5838_v2 = vsub.s32 0, %v5835_v1  ;;  %v5841_v3 = vsub.s32 1, %v5835_v1  ;;  %v500_v47 = vld [vmem:[%s5809_s22 + $0x40] sm:$0xff]  ;;  %vm1434_vm5 = vcmp.ge.s32.totalorder %v5835_v1, 1  ;;  %vm2298_vm6 = vcmask 1043456  }
 0x124   : > { %vm2119_vm7 = vcmask 64512   ;;  %vm4210_vm9 = vcmask 1041409   ;;  %vm4213_vm10 = vcmask 1042434   ;;  %vm4216_vm11 = vcmask 1043459   ;;  %s5436_s29 = smov 16   ;;  %s5437_s17 = smov 8  }
 0x125   : > { %8718 = vst [vmem:[#allocation29_spill] sm:$0xff] %v5838_v2  ;;  %8719 = vst [vmem:[#allocation30_spill] sm:$0xff] %v5841_v3  ;;  %v5848_v9 = vrot.slane %v524_v8, %v5838_v2  ;;  %v5851_v10 = vrot.slane %v524_v8, %v5841_v3  ;;  %vm4219_vm12 = vcmask 1044484   ;;  %vm4222_vm13 = vcmask 1045509   ;;  %s5438_s24 = smov 32   ;;  %s5439_s10 = smov 24  }
 0x126   : > { %vm4225_vm14 = vcmask 1046534   ;;  %vm4228_vm15 = vcmask 1047559   ;;  %s5440_s1 = smov 48   ;;  %s5441_s27 = smov 40  }
 0x127   : > { %v530_v15 = vmul.f32 %v5848_v9, %v492_v6  ;;  %v531_v16 = vmul.f32 %v5848_v9, %v493_v7  ;;  %v532_v17 = vmul.f32 %v5848_v9, %v494_v11  ;;  %v533_v18 = vmul.f32 %v5848_v9, %v495_v12  ;;  %s5442_s21 = smov 56   ;;  %s4561_s26 = sshll.u32 %s5805_s30, 3 }
 0x128   : > { %v534_v22 = vmul.f32 %v5848_v9, %v496_v13  ;;  %v535_v23 = vmul.f32 %v5848_v9, %v497_v14  ;;  %v536_v29 = vmul.f32 %v5848_v9, %v498_v19  ;;  %v537_v32 = vmul.f32 %v5848_v9, %v499_v24  ;;  %v504_v24 = vld [vmem:[%s5809_s22 + $0x60] sm:$0xff]  ;;  %p8912_p3 = scmp.ne.s32.totalorder %s8703_s11, 0 }
 0x129   : > { %v566_v20 = vadd.f32 %v5851_v10, %v530_v15  ;;  %v567_v21 = vadd.f32 %v5851_v10, %v531_v16  ;;  %v568_v25 = vadd.f32 %v5851_v10, %v532_v17  ;;  %v569_v26 = vadd.f32 %v5851_v10, %v533_v18  ;;  %v502_v15 = vld [vmem:[%s5809_s22 + $0x50] sm:$0xff]  ;;  %v503_v16 = vld [vmem:[%s5809_s22 + $0x58] sm:$0xff] }
 0x12a   : > { %v5872_v35 = vadd.f32 %v5851_v10, %v534_v22  ;;  %v5875_v36 = vadd.f32 %v5851_v10, %v535_v23  ;;  %v5880_v42 = vadd.f32 %v5851_v10, %v536_v29  ;;  %v5888_v51 = vadd.f32 %v5851_v10, %v537_v32 }
 0x12b   : > { %v630_v27 = vmul.f32 0.044715, %v566_v20  ;;  %v631_v28 = vmul.f32 0.044715, %v567_v21  ;;  %v632_v30 = vmul.f32 0.044715, %v568_v25  ;;  %v538_v60 = vmul.f32 %v5848_v9, %v500_v47 }
 0x12c   : > { %v633_v31 = vmul.f32 0.044715, %v569_v26  ;;  %v5877_v39 = vmul.f32 0.5, %v566_v20  ;;  %v634_v45 = vmul.f32 0.044715, %v5872_v35  ;;  %v5885_v48 = vmul.f32 0.5, %v567_v21 }
 0x12d   : > { %v662_v33 = vmul.f32 %v630_v27, %v566_v20  ;;  %v663_v34 = vmul.f32 %v631_v28, %v567_v21  ;;  %v664_v37 = vmul.f32 %v632_v30, %v568_v25  ;;  %v635_v46 = vmul.f32 0.044715, %v5875_v36  ;;  %v505_v30 = vld [vmem:[%s5809_s22 + $0x68] sm:$0xff] }
 0x12e   : > { %v665_v38 = vmul.f32 %v633_v31, %v569_v26  ;;  %v666_v54 = vmul.f32 %v634_v45, %v5872_v35  ;;  %v636_v59 = vmul.f32 0.044715, %v5880_v42  ;;  %v637_v4 = vmul.f32 0.044715, %v5888_v51 }
 0x12f   : > { %v694_v40 = vmul.f32 %v662_v33, %v566_v20  ;;  %v695_v41 = vmul.f32 %v663_v34, %v567_v21  ;;  %v696_v43 = vmul.f32 %v664_v37, %v568_v25  ;;  %v667_v55 = vmul.f32 %v635_v46, %v5875_v36 }
 0x130   : > { %v697_v44 = vmul.f32 %v665_v38, %v569_v26  ;;  %v698_v63 = vmul.f32 %v666_v54, %v5872_v35  ;;  %v668_v5 = vmul.f32 %v636_v59, %v5880_v42  ;;  %v539_v6 = vmul.f32 %v5848_v9, %v501_v56 }
 0x131   : > { %v726_v49 = vadd.f32 %v694_v40, %v566_v20  ;;  %v727_v50 = vadd.f32 %v695_v41, %v567_v21  ;;  %v728_v52 = vadd.f32 %v696_v43, %v568_v25  ;;  %v699_v0 = vmul.f32 %v667_v55, %v5875_v36 }
 0x132   : > { %v729_v53 = vadd.f32 %v697_v44, %v569_v26  ;;  %v730_v7 = vadd.f32 %v698_v63, %v5872_v35  ;;  %v5903_v11 = vadd.f32 %v5851_v10, %v538_v60  ;;  %v669_v12 = vmul.f32 %v637_v4, %v5888_v51 }
 0x133   : > { %v758_v57 = vmul.f32 0.7978846, %v726_v49  ;;  %v759_v58 = vmul.f32 0.7978846, %v727_v50  ;;  %v760_v61 = vmul.f32 0.7978846, %v728_v52  ;;  %v731_v8 = vadd.f32 %v699_v0, %v5875_v36 }
 0x134   : > { %v761_v62 = vmul.f32 0.7978846, %v729_v53  ;;  %v700_v13 = vmul.f32 %v668_v5, %v5880_v42  ;;  %v5908_v14 = vadd.f32 %v5851_v10, %v539_v6  ;;  %v600_v17 = vmul.f32 0.5, %v568_v25 }
 0x135   : > { %4875 = vtanh.f32 %v758_v57  ;;  %v762_v18 = vmul.f32 0.7978846, %v730_v7  ;;  %v763_v19 = vmul.f32 0.7978846, %v731_v8  ;;  %v601_v20 = vmul.f32 0.5, %v569_v26  ;;  %v506_v7 = vld [vmem:[%s5809_s22 + $0x70] sm:$0xff] }
 0x136   : > { %4877 = vtanh.f32 %v759_v58  ;;  %v701_v21 = vmul.f32 %v669_v12, %v5888_v51  ;;  %v732_v22 = vadd.f32 %v700_v13, %v5880_v42  ;;  %v638_v23 = vmul.f32 0.044715, %v5903_v11 }
 0x137   : > { %4879 = vtanh.f32 %v760_v61  ;;  %v639_v27 = vmul.f32 0.044715, %v5908_v14  ;;  %v540_v28 = vmul.f32 %v5848_v9, %v502_v15  ;;  %v541_v29 = vmul.f32 %v5848_v9, %v503_v16 }
 0x138   : > { %4881 = vtanh.f32 %v761_v62  ;;  %v733_v25 = vadd.f32 %v701_v21, %v5888_v51  ;;  %v764_v31 = vmul.f32 0.7978846, %v732_v22  ;;  %v670_v26 = vmul.f32 %v638_v23, %v5903_v11 }
 0x139   : > { %4883 = vtanh.f32 %v762_v18  ;;  %v671_v32 = vmul.f32 %v639_v27, %v5908_v14  ;;  %v5924_v33 = vadd.f32 %v5851_v10, %v540_v28  ;;  %v5927_v34 = vadd.f32 %v5851_v10, %v541_v29 }
 0x13a   : > { %4885 = vtanh.f32 %v763_v19  ;;  %v542_v37 = vmul.f32 %v5848_v9, %v504_v24  ;;  %v765_v38 = vmul.f32 0.7978846, %v733_v25  ;;  %v702_v40 = vmul.f32 %v670_v26, %v5903_v11  ;;  %v507_v24 = vld [vmem:[%s5809_s22 + $0x78] sm:$0xff] }
 0x13b   : > { %4887 = vtanh.f32 %v764_v31  ;;  %v543_v41 = vmul.f32 %v5848_v9, %v505_v30  ;;  %v602_v43 = vmul.f32 0.5, %v5872_v35  ;;  %v603_v44 = vmul.f32 0.5, %v5875_v36 }
 0x13c   : > { %v703_v45 = vmul.f32 %v671_v32, %v5908_v14  ;;  %v640_v46 = vmul.f32 0.044715, %v5924_v33  ;;  %v604_v49 = vmul.f32 0.5, %v5880_v42  ;;  %4889 = vtanh.f32 %v765_v38 }
 0x13d   : > { %v734_v50 = vadd.f32 %v702_v40, %v5903_v11  ;;  %v641_v52 = vmul.f32 0.044715, %v5927_v34  ;;  %v5942_v36 = vadd.f32 %v5851_v10, %v542_v37  ;;  %v5946_v59 = vadd.f32 %v5851_v10, %v543_v41  ;;  %v508_v40 = vld [vmem:[%s5809_s22 + $0x80] sm:$0xff]  ;;  %v509_v41 = vld [vmem:[%s5809_s22 + $0x88] sm:$0xff] }
 0x13e   : > { %v735_v55 = vadd.f32 %v703_v45, %v5908_v14  ;;  %v672_v35 = vmul.f32 %v640_v46, %v5924_v33  ;;  %v605_v13 = vmul.f32 0.5, %v5888_v51  ;;  %v544_v27 = vmul.f32 %v5848_v9, %v506_v7  ;;  %v510_v7 = vld [vmem:[%s5809_s22 + $0x90] sm:$0xff] }
 0x13f   : > { %v4876_v47 = vpop.eup %4875  ;;  %v766_v58 = vmul.f32 0.7978846, %v734_v50  ;;  %v673_v42 = vmul.f32 %v641_v52, %v5927_v34  ;;  %v642_v23 = vmul.f32 0.044715, %v5942_v36  ;;  %v545_v37 = vmul.f32 %v5848_v9, %v507_v24 }
 0x140   : > { %v4878_v53 = vpop.eup %4877  ;;  %v822_v54 = vadd.f32 1.0, %v4876_v47  ;;  %v767_v63 = vmul.f32 0.7978846, %v735_v55  ;;  %v704_v0 = vmul.f32 %v672_v35, %v5924_v33  ;;  %v5966_v38 = vadd.f32 %v5851_v10, %v544_v27 }
 0x141   : > { %v4880_v56 = vpop.eup %4879  ;;  %v823_v57 = vadd.f32 1.0, %v4878_v53  ;;  %4891 = vtanh.f32 %v766_v58  ;;  %v705_v6 = vmul.f32 %v673_v42, %v5927_v34  ;;  %v674_v31 = vmul.f32 %v642_v23, %v5942_v36 }
 0x142   : > { %v4882_v60 = vpop.eup %4881  ;;  %v854_v61 = vmul.f32 %v822_v54, %v5877_v39  ;;  %v824_v62 = vadd.f32 1.0, %v4880_v56  ;;  %4893 = vtanh.f32 %v767_v63  ;;  %v736_v15 = vadd.f32 %v704_v0, %v5924_v33 }
 0x143   : > { %v855_v4 = vmul.f32 %v823_v57, %v5885_v48  ;;  %v825_v5 = vadd.f32 1.0, %v4882_v60  ;;  %v4884_v8 = vpop.eup %4883  ;;  %v737_v21 = vadd.f32 %v705_v6, %v5927_v34  ;;  %v706_v46 = vmul.f32 %v674_v31, %v5942_v36 }
 0x144   : > { %v856_v12 = vmul.f32 %v824_v62, %v600_v17  ;;  %v4886_v39 = vpop.eup %4885  ;;  %v826_v19 = vadd.f32 1.0, %v4884_v8  ;;  %v768_v22 = vmul.f32 0.7978846, %v736_v15  ;;  %v606_v47 = vmul.f32 0.5, %v5903_v11 }
 0x145   : > { %v886_v16 = vpack.c.bf16 %v855_v4, %v854_v61  ;;  %v857_v18 = vmul.f32 %v825_v5, %v601_v20  ;;  %v827_v48 = vadd.f32 1.0, %v4886_v39  ;;  %v4888_v28 = vpop.eup %4887  ;;  %v769_v29 = vmul.f32 0.7978846, %v737_v21 }
 0x146   : > { %v858_v17 = vmul.f32 %v826_v19, %v602_v43  ;;  %v643_v20 = vmul.f32 0.044715, %v5946_v59  ;;  %v828_v25 = vadd.f32 1.0, %v4888_v28  ;;  %4895 = vtanh.f32 %v768_v22  ;;  %v4890_v26 = vpop.eup %4889 }
 0x147   : > { %4644 = vmatprep.mubr.msk.bf16.mxu0 %vm902_vm1, %v886_v16  ;;  %v887_v51 = vpack.c.bf16 %v857_v18, %v856_v12  ;;  %v859_v30 = vmul.f32 %v827_v48, %v603_v44  ;;  %4897 = vtanh.f32 %v769_v29  ;;  %v829_v45 = vadd.f32 1.0, %v4890_v26  ;;  %v511_v18 = vld [vmem:[%s5809_s22 + $0x98] sm:$0xff] }
 0x148   : > { %v675_v32 = vmul.f32 %v643_v20, %v5946_v59  ;;  %v860_v44 = vmul.f32 %v828_v25, %v604_v49  ;;  %v5974_v52 = vadd.f32 %v5851_v10, %v545_v37  ;;  %v644_v53 = vmul.f32 0.044715, %v5966_v38 }
 0x149   : > { %4645 = vmatmul.mubr.msk.bf16.vlgmr.msra.gmra.mrb[0].mxu0 %vm902_vm1, %v887_v51  ;;  %v888_v43 = vpack.c.bf16 %v859_v30, %v858_v17  ;;  %v861_v54 = vmul.f32 %v829_v45, %v605_v13  ;;  %v738_v55 = vadd.f32 %v706_v46, %v5942_v36  ;;  %v546_v35 = vmul.f32 %v5848_v9, %v508_v40  ;;  %v512_v30 = vld [vmem:[%s5809_s22 + $0xa0] sm:$0xff] }
 0x14a   : > { %v707_v50 = vmul.f32 %v675_v32, %v5946_v59  ;;  %v547_v49 = vmul.f32 %v5848_v9, %v509_v41  ;;  %v607_v11 = vmul.f32 0.5, %v5908_v14  ;;  %v645_v58 = vmul.f32 0.044715, %v5974_v52 }
 0x14b   : > { %4648 = vmatprep.mubr.msk.bf16.mxu0 %vm902_vm1, %v888_v43  ;;  %v4892_v56 = vpop.eup %4891  ;;  %v676_v42 = vmul.f32 %v644_v53, %v5966_v38  ;;  %v889_v61 = vpack.c.bf16 %v861_v54, %v860_v44  ;;  %v770_v63 = vmul.f32 0.7978846, %v738_v55  ;;  %v5986_v0 = vadd.f32 %v5851_v10, %v546_v35  ;;  %v513_v43 = vld [vmem:[%s5809_s22 + $0xa8] sm:$0xff] }
 0x14c   : > { %v739_v57 = vadd.f32 %v707_v50, %v5946_v59  ;;  %v4894_v60 = vpop.eup %4893  ;;  %v830_v62 = vadd.f32 1.0, %v4892_v56  ;;  %v677_v6 = vmul.f32 %v645_v58, %v5974_v52  ;;  %v608_v12 = vmul.f32 0.5, %v5924_v33  ;;  %v515_v50 = vld [vmem:[%s5809_s22 + $0xb8] sm:$0xff] }
 0x14d   : > { %v831_v4 = vadd.f32 1.0, %v4894_v60  ;;  %v708_v14 = vmul.f32 %v676_v42, %v5966_v38  ;;  %4899 = vtanh.f32 %v770_v63  ;;  %v5993_v13 = vadd.f32 %v5851_v10, %v547_v49 }
 0x14e   : > { %v771_v5 = vmul.f32 0.7978846, %v739_v57  ;;  %v862_v8 = vmul.f32 %v830_v62, %v606_v47  ;;  %v709_v39 = vmul.f32 %v677_v6, %v5974_v52  ;;  %v609_v21 = vmul.f32 0.5, %v5927_v34  ;;  %v514_v47 = vld [vmem:[%s5809_s22 + $0xb0] sm:$0xff] }
 0x14f   : > { %v863_v15 = vmul.f32 %v831_v4, %v607_v11  ;;  %v740_v16 = vadd.f32 %v708_v14, %v5966_v38  ;;  %v646_v48 = vmul.f32 0.044715, %v5986_v0  ;;  %v647_v33 = vmul.f32 0.044715, %v5993_v13 }
 0x150   : > { %4901 = vtanh.f32 %v771_v5  ;;  %v4896_v19 = vpop.eup %4895  ;;  %v548_v22 = vmul.f32 %v5848_v9, %v510_v7  ;;  %v741_v28 = vadd.f32 %v709_v39, %v5974_v52  ;;  %v549_v34 = vmul.f32 %v5848_v9, %v511_v18 }
 0x151   : > { %4649 = vmatmul.mubr.msk.bf16.gmra.mrb[4].mxu0 %vm902_vm1, %v889_v61  ;;  %v4898_v23 = vpop.eup %4897  ;;  %v890_v24 = vpack.c.bf16 %v863_v15, %v862_v8  ;;  %v832_v27 = vadd.f32 1.0, %v4896_v19  ;;  %v772_v51 = vmul.f32 0.7978846, %v740_v16  ;;  %v678_v29 = vmul.f32 %v646_v48, %v5986_v0 }
 0x152   : > { %v833_v17 = vadd.f32 1.0, %v4898_v23  ;;  %v679_v20 = vmul.f32 %v647_v33, %v5993_v13  ;;  %v773_v31 = vmul.f32 0.7978846, %v741_v28  ;;  %v6010_v26 = vadd.f32 %v5851_v10, %v548_v22  ;;  %v516_v28 = vld [vmem:[%s5809_s22 + $0xc0] sm:$0xff] }
 0x153   : > { %4652 = vmatprep.mubr.msk.bf16.mxu0 %vm902_vm1, %v890_v24  ;;  %v864_v25 = vmul.f32 %v832_v27, %v608_v12  ;;  %4903 = vtanh.f32 %v772_v51  ;;  %v710_v37 = vmul.f32 %v678_v29, %v5986_v0  ;;  %v6015_v41 = vadd.f32 %v5851_v10, %v549_v34  ;;  %v517_v34 = vld [vmem:[%s5809_s22 + $0xc8] sm:$0xff] }
 0x154   : > { %v865_v32 = vmul.f32 %v833_v17, %v609_v21  ;;  %v711_v40 = vmul.f32 %v679_v20, %v5993_v13  ;;  %v610_v45 = vmul.f32 0.5, %v5942_v36  ;;  %4905 = vtanh.f32 %v773_v31 }
 0x155   : > { %v648_v44 = vmul.f32 0.044715, %v6010_v26  ;;  %v550_v46 = vmul.f32 %v5848_v9, %v512_v30  ;;  %v611_v54 = vmul.f32 0.5, %v5946_v59  ;;  %v742_v55 = vadd.f32 %v710_v37, %v5986_v0  ;;  %v518_v37 = vld [vmem:[%s5809_s22 + $0xd0] sm:$0xff] }
 0x156   : > { %v891_v53 = vpack.c.bf16 %v865_v32, %v864_v25  ;;  %v743_v35 = vadd.f32 %v711_v40, %v5993_v13  ;;  %v649_v49 = vmul.f32 0.044715, %v6015_v41  ;;  %v551_v36 = vmul.f32 %v5848_v9, %v513_v43 }
 0x157   : > { %v680_v56 = vmul.f32 %v648_v44, %v6010_v26  ;;  %v6030_v11 = vadd.f32 %v5851_v10, %v550_v46  ;;  %v4900_v57 = vpop.eup %4899  ;;  %v774_v58 = vmul.f32 0.7978846, %v742_v55  ;;  %v552_v59 = vmul.f32 %v5848_v9, %v514_v47 }
 0x158   : > { %v775_v42 = vmul.f32 0.7978846, %v743_v35  ;;  %v553_v60 = vmul.f32 %v5848_v9, %v515_v50  ;;  %v834_v62 = vadd.f32 1.0, %v4900_v57  ;;  %v681_v63 = vmul.f32 %v649_v49, %v6015_v41 }
 0x159   : > { %4653 = vmatmul.mubr.msk.bf16.gmra.mrb[8].mxu0 %vm902_vm1, %v891_v53  ;;  %v712_v4 = vmul.f32 %v680_v56, %v6010_v26  ;;  %v6038_v5 = vadd.f32 %v5851_v10, %v551_v36  ;;  %v612_v14 = vmul.f32 0.5, %v5966_v38  ;;  %4907 = vtanh.f32 %v774_v58 }
 0x15a   : > { %v4902_v61 = vpop.eup %4901  ;;  %v650_v7 = vmul.f32 0.044715, %v6030_v11  ;;  %v866_v8 = vmul.f32 %v834_v62, %v610_v45  ;;  %4909 = vtanh.f32 %v775_v42  ;;  %v713_v12 = vmul.f32 %v681_v63, %v6015_v41 }
 0x15b   : > { %v835_v6 = vadd.f32 1.0, %v4902_v61  ;;  %v744_v15 = vadd.f32 %v712_v4, %v6010_v26  ;;  %v613_v16 = vmul.f32 0.5, %v5974_v52  ;;  %v651_v18 = vmul.f32 0.044715, %v6038_v5  ;;  %v520_v4 = vld [vmem:[%s5809_s22 + $0xe0] sm:$0xff] }
 0x15c   : > { %v682_v19 = vmul.f32 %v650_v7, %v6030_v11  ;;  %v745_v38 = vadd.f32 %v713_v12, %v6015_v41  ;;  %v6049_v33 = vadd.f32 %v5851_v10, %v552_v59  ;;  %v6052_v22 = vadd.f32 %v5851_v10, %v553_v60  ;;  %v519_v60 = vld [vmem:[%s5809_s22 + $0xd8] sm:$0xff] }
 0x15d   : > { %v867_v39 = vmul.f32 %v835_v6, %v611_v54  ;;  %v4904_v21 = vpop.eup %4903  ;;  %v776_v48 = vmul.f32 0.7978846, %v744_v15  ;;  %v683_v52 = vmul.f32 %v651_v18, %v6038_v5  ;;  %v614_v17 = vmul.f32 0.5, %v5986_v0 }
 0x15e   : > { %v836_v24 = vadd.f32 1.0, %v4904_v21  ;;  %v714_v27 = vmul.f32 %v682_v19, %v6030_v11  ;;  %v4906_v51 = vpop.eup %4905  ;;  %v615_v29 = vmul.f32 0.5, %v5993_v13  ;;  %v777_v20 = vmul.f32 0.7978846, %v745_v38 }
 0x15f   : > { %v892_v23 = vpack.c.bf16 %v867_v39, %v866_v8  ;;  %4911 = vtanh.f32 %v776_v48  ;;  %v837_v30 = vadd.f32 1.0, %v4906_v51  ;;  %v715_v31 = vmul.f32 %v683_v52, %v6038_v5 }
 0x160   : > { %v868_v25 = vmul.f32 %v836_v24, %v612_v14  ;;  %v746_v32 = vadd.f32 %v714_v27, %v6030_v11  ;;  %4913 = vtanh.f32 %v777_v20  ;;  %v652_v40 = vmul.f32 0.044715, %v6049_v33 }
 0x161   : > { %4656 = vmatprep.mubr.msk.bf16.mxu0 %vm902_vm1, %v892_v23  ;;  %v653_v43 = vmul.f32 0.044715, %v6052_v22  ;;  %v554_v0 = vmul.f32 %v5848_v9, %v516_v28  ;;  %v869_v13 = vmul.f32 %v837_v30, %v613_v16  ;;  %v747_v45 = vadd.f32 %v715_v31, %v6038_v5 }
 0x162   : > { %v778_v44 = vmul.f32 0.7978846, %v746_v32  ;;  %v555_v46 = vmul.f32 %v5848_v9, %v517_v34  ;;  %v684_v47 = vmul.f32 %v652_v40, %v6049_v33  ;;  %v556_v54 = vmul.f32 %v5848_v9, %v518_v37 }
 0x163   : > { %v685_v50 = vmul.f32 %v653_v43, %v6052_v22  ;;  %v6072_v53 = vadd.f32 %v5851_v10, %v554_v0  ;;  %v4908_v55 = vpop.eup %4907  ;;  %v893_v35 = vpack.c.bf16 %v869_v13, %v868_v25  ;;  %v779_v49 = vmul.f32 0.7978846, %v747_v45 }
 0x164   : > { %4915 = vtanh.f32 %v778_v44  ;;  %v6076_v56 = vadd.f32 %v5851_v10, %v555_v46  ;;  %v4910_v36 = vpop.eup %4909  ;;  %v838_v57 = vadd.f32 1.0, %v4908_v55  ;;  %v616_v58 = vmul.f32 0.5, %v6010_v26  ;;  %v523_v55 = vld [vmem:[%s5809_s22 + $0xf8] sm:$0xff] }
 0x165   : > { %v716_v42 = vmul.f32 %v684_v47, %v6049_v33  ;;  %v717_v59 = vmul.f32 %v685_v50, %v6052_v22  ;;  %4657 = vmatmul.mubr.msk.bf16.gmra.mrb[12].mxu0 %vm902_vm1, %v893_v35  ;;  %v839_v61 = vadd.f32 1.0, %v4910_v36  ;;  %v617_v62 = vmul.f32 0.5, %v6015_v41 }
 0x166   : > { %4917 = vtanh.f32 %v779_v49  ;;  %v654_v63 = vmul.f32 0.044715, %v6072_v53  ;;  %v870_v6 = vmul.f32 %v838_v57, %v614_v17  ;;  %v655_v26 = vmul.f32 0.044715, %v6076_v56  ;;  %v521_v17 = vld [vmem:[%s5809_s22 + $0xe8] sm:$0xff] }
 0x167   : > { %v748_v14 = vadd.f32 %v716_v42, %v6049_v33  ;;  %v749_v7 = vadd.f32 %v717_v59, %v6052_v22  ;;  %v871_v8 = vmul.f32 %v839_v61, %v615_v29  ;;  %v557_v15 = vmul.f32 %v5848_v9, %v519_v60 }
 0x168   : > { %v686_v12 = vmul.f32 %v654_v63, %v6072_v53  ;;  %v6092_v39 = vadd.f32 %v5851_v10, %v556_v54  ;;  %v687_v19 = vmul.f32 %v655_v26, %v6076_v56  ;;  %v558_v21 = vmul.f32 %v5848_v9, %v520_v4  ;;  %v522_v54 = vld [vmem:[%s5809_s22 + $0xf0] sm:$0xff] }
 0x169   : > { %v4912_v41 = vpop.eup %4911  ;;  %v780_v16 = vmul.f32 0.7978846, %v748_v14  ;;  %v781_v18 = vmul.f32 0.7978846, %v749_v7  ;;  %v894_v38 = vpack.c.bf16 %v871_v8, %v870_v6  ;;  %v6098_v24 = vadd.f32 %v5851_v10, %v557_v15 }
 0x16a   : > { %v840_v48 = vadd.f32 1.0, %v4912_v41  ;;  %v718_v23 = vmul.f32 %v686_v12, %v6072_v53  ;;  %v4914_v52 = vpop.eup %4913  ;;  %v618_v27 = vmul.f32 0.5, %v6030_v11  ;;  %v719_v28 = vmul.f32 %v687_v19, %v6076_v56 }
 0x16b   : > { %4919 = vtanh.f32 %v780_v16  ;;  %v656_v51 = vmul.f32 0.044715, %v6092_v39  ;;  %4660 = vmatprep.mubr.msk.bf16.mxu0 %vm902_vm1, %v894_v38  ;;  %v841_v29 = vadd.f32 1.0, %v4914_v52  ;;  %v619_v30 = vmul.f32 0.5, %v6038_v5 }
 0x16c   : > { %v872_v20 = vmul.f32 %v840_v48, %v616_v58  ;;  %4921 = vtanh.f32 %v781_v18  ;;  %v750_v34 = vadd.f32 %v718_v23, %v6072_v53  ;;  %v751_v25 = vadd.f32 %v719_v28, %v6076_v56 }
 0x16d   : > { %v657_v11 = vmul.f32 0.044715, %v6098_v24  ;;  %v688_v31 = vmul.f32 %v656_v51, %v6092_v39  ;;  %v873_v37 = vmul.f32 %v841_v29, %v617_v62  ;;  %v559_v43 = vmul.f32 %v5848_v9, %v521_v17 }
 0x16e   : > { %v4916_v32 = vpop.eup %4915  ;;  %v782_v40 = vmul.f32 0.7978846, %v750_v34  ;;  %v6112_v0 = vadd.f32 %v5851_v10, %v558_v21  ;;  %v783_v45 = vmul.f32 0.7978846, %v751_v25  ;;  %v620_v57 = vmul.f32 0.5, %v6049_v33 }
 0x16f   : > { %v842_v13 = vadd.f32 1.0, %v4916_v32  ;;  %v689_v5 = vmul.f32 %v657_v11, %v6098_v24  ;;  %v720_v44 = vmul.f32 %v688_v31, %v6092_v39  ;;  %v895_v47 = vpack.c.bf16 %v873_v37, %v872_v20 }
 0x170   : > { %v4918_v46 = vpop.eup %4917  ;;  %4923 = vtanh.f32 %v782_v40  ;;  %v6117_v50 = vadd.f32 %v5851_v10, %v559_v43  ;;  %v658_v42 = vmul.f32 0.044715, %v6112_v0  ;;  %v560_v62 = vmul.f32 %v5848_v9, %v522_v54 }
 0x171   : > { %v843_v35 = vadd.f32 1.0, %v4918_v46  ;;  %v874_v49 = vmul.f32 %v842_v13, %v618_v27  ;;  %4925 = vtanh.f32 %v783_v45  ;;  %v721_v36 = vmul.f32 %v689_v5, %v6098_v24  ;;  %4661 = vmatmul.mubr.msk.bf16.gmra.mrb[16].mxu0 %vm902_vm1, %v895_v47 }
 0x172   : > { %v752_v58 = vadd.f32 %v720_v44, %v6092_v39  ;;  %v659_v59 = vmul.f32 0.044715, %v6117_v50  ;;  %v561_v63 = vmul.f32 %v5848_v9, %v523_v55  ;;  %v621_v4 = vmul.f32 0.5, %v6052_v22 }
 0x173   : > { %v875_v60 = vmul.f32 %v843_v35, %v619_v30  ;;  %v753_v61 = vadd.f32 %v721_v36, %v6098_v24  ;;  %v690_v14 = vmul.f32 %v658_v42, %v6112_v0  ;;  %v596_v12 = vadd.f32 %v5851_v10, %v560_v62 }
 0x174   : > { %v784_v6 = vmul.f32 0.7978846, %v752_v58  ;;  %v691_v33 = vmul.f32 %v659_v59, %v6117_v50  ;;  %v597_v15 = vadd.f32 %v5851_v10, %v561_v63  ;;  %v622_v10 = vmul.f32 0.5, %v6072_v53 }
 0x175   : > { %v4920_v7 = vpop.eup %4919  ;;  %v896_v26 = vpack.c.bf16 %v875_v60, %v874_v49  ;;  %v785_v8 = vmul.f32 0.7978846, %v753_v61  ;;  %v722_v18 = vmul.f32 %v690_v14, %v6112_v0  ;;  %v660_v48 = vmul.f32 0.044715, %v596_v12 }
 0x176   : > { %v4922_v41 = vpop.eup %4921  ;;  %v844_v16 = vadd.f32 1.0, %v4920_v7  ;;  %4927 = vtanh.f32 %v784_v6  ;;  %v723_v9 = vmul.f32 %v691_v33, %v6117_v50  ;;  %v661_v52 = vmul.f32 0.044715, %v597_v15 }
 0x177   : > { %4664 = vmatprep.mubr.msk.bf16.mxu0 %vm902_vm1, %v896_v26  ;;  %v845_v22 = vadd.f32 1.0, %v4922_v41  ;;  %4929 = vtanh.f32 %v785_v8  ;;  %v754_v21 = vadd.f32 %v722_v18, %v6112_v0  ;;  %v623_v28 = vmul.f32 0.5, %v6076_v56 }
 0x178   : > { %v876_v19 = vmul.f32 %v844_v16, %v620_v57  ;;  %v755_v38 = vadd.f32 %v723_v9, %v6117_v50  ;;  %v692_v29 = vmul.f32 %v660_v48, %v596_v12  ;;  %v693_v25 = vmul.f32 %v661_v52, %v597_v15 }
 0x179   : > { %v877_v23 = vmul.f32 %v845_v22, %v621_v4  ;;  %v786_v51 = vmul.f32 0.7978846, %v754_v21  ;;  %v624_v43 = vmul.f32 0.5, %v6092_v39  ;;  %v625_v5 = vmul.f32 0.5, %v6098_v24 }
 0x17a   : > { %v4924_v27 = vpop.eup %4923  ;;  %v787_v17 = vmul.f32 0.7978846, %v755_v38  ;;  %v724_v31 = vmul.f32 %v692_v29, %v596_v12  ;;  %v725_v37 = vmul.f32 %v693_v25, %v597_v15  ;;  %v626_v36 = vmul.f32 0.5, %v6112_v0 }
 0x17b   : > { %v4926_v20 = vpop.eup %4925  ;;  %v897_v34 = vpack.c.bf16 %v877_v23, %v876_v19  ;;  %v846_v30 = vadd.f32 1.0, %v4924_v27  ;;  %4931 = vtanh.f32 %v786_v51  ;;  %v627_v58 = vmul.f32 0.5, %v6117_v50 }
 0x17c   : > { %v847_v11 = vadd.f32 1.0, %v4926_v20  ;;  %4933 = vtanh.f32 %v787_v17  ;;  %v756_v40 = vadd.f32 %v724_v31, %v596_v12  ;;  %v757_v56 = vadd.f32 %v725_v37, %v597_v15 }
 0x17d   : > { %4665 = vmatmul.mubr.msk.bf16.gmra.mrb[20].mxu0 %vm902_vm1, %v897_v34  ;;  %v878_v32 = vmul.f32 %v846_v30, %v622_v10  ;;  %v628_v62 = vmul.f32 0.5, %v596_v12  ;;  %v629_v6 = vmul.f32 0.5, %v597_v15 }
 0x17e   : > { %v879_v53 = vmul.f32 %v847_v11, %v623_v28  ;;  %v788_v44 = vmul.f32 0.7978846, %v756_v40  ;;  %v789_v54 = vmul.f32 0.7978846, %v757_v56 }
 0x180   : > { %v4928_v13 = vpop.eup %4927  ;;  %v898_v45 = vpack.c.bf16 %v879_v53, %v878_v32  ;;  %4935 = vtanh.f32 %v788_v44 }
 0x181   : > { %v4930_v46 = vpop.eup %4929  ;;  %v848_v47 = vadd.f32 1.0, %v4928_v13  ;;  %4937 = vtanh.f32 %v789_v54 }
 0x182   : > { %4668 = vmatprep.mubr.msk.bf16.mxu0 %vm902_vm1, %v898_v45  ;;  %v849_v55 = vadd.f32 1.0, %v4930_v46 }
 0x183   : > { %v880_v35 = vmul.f32 %v848_v47, %v624_v43 }
 0x184   : > { %v881_v49 = vmul.f32 %v849_v55, %v625_v5 }
 0x185   : > { %v4932_v57 = vpop.eup %4931 }
 0x186   : > { %v899_v39 = vpack.c.bf16 %v881_v49, %v880_v35  ;;  %v4934_v42 = vpop.eup %4933  ;;  %v850_v59 = vadd.f32 1.0, %v4932_v57 }
 0x187   : > { %v851_v24 = vadd.f32 1.0, %v4934_v42 }
 0x188   : > { %4669 = vmatmul.mubr.msk.bf16.gmra.mrb[24].mxu0 %vm902_vm1, %v899_v39  ;;  %v882_v60 = vmul.f32 %v850_v59, %v626_v36 }
 0x189   : > { %v883_v61 = vmul.f32 %v851_v24, %v627_v58 }
 0x18a   : > { %v4936_v63 = vpop.eup %4935 }
 0x18b   : > { %v900_v4 = vpack.c.bf16 %v883_v61, %v882_v60  ;;  %v4938_v14 = vpop.eup %4937  ;;  %v852_v33 = vadd.f32 1.0, %v4936_v63 }
 0x18c   : > { %v853_v0 = vadd.f32 1.0, %v4938_v14 }
 0x18d   : > { %4672 = vmatprep.mubr.msk.bf16.mxu0 %vm902_vm1, %v900_v4  ;;  %v884_v7 = vmul.f32 %v852_v33, %v628_v62 }
 0x18e   : > { %v885_v26 = vmul.f32 %v853_v0, %v629_v6 }
 0x190   : > { %v901_v8 = vpack.c.bf16 %v885_v26, %v884_v7 }
 0x192   : > { %4673 = vmatmul.mubr.msk.bf16.gmra.mrb[28].mxu0 %vm902_vm1, %v901_v8 }
 0x21c   : > { %v6151_v50 = vpop.f32.mrb[0].mxu0 }
 0x21d   : > { %v6153_v41 = vpop.f32.mrb[1].mxu0  ;;  %v1277_v15 = vrot.slane %v6151_v50, 7  ;;  %v1508_v16 = vrot.slane %v6151_v50, 1 }
 0x21e   : > { %1149 = vrot.lane.b32.xlu0 %v6153_v41, %s5433_s20  ;;  %v6157_v12 = vpop.f32.mrb[2].mxu0  ;;  %v8636_v19 = vrot.slane %v6153_v41, 7  ;;  %v1505_v21 = vrot.slane %v6153_v41, 1 }
 0x21f   : > { %v1279_v18 = vrot.slane %v6157_v12, 7  ;;  %v1510_v9 = vrot.slane %v6157_v12, 1  ;;  %v992_v22 = vpop.f32.mrb[3].mxu0 }
 0x220   : > { %v1275_v38 = vrot.slane %v992_v22, 7  ;;  %v1506_v48 = vrot.slane %v992_v22, 1  ;;  %1151 = vrot.lane.b32.xlu1 %v992_v22, %s5433_s20 }
 0x221   : > { %v6167_v23 = vsel %vm1273_vm2, %v1277_v15, %v1279_v18  ;;  %v6170_v10 = vsel %vm1504_vm3, %v1508_v16, %v1510_v9 }
 0x222   : > { %8720 = vst [vmem:[#allocation31_spill] sm:$0xff] %v6170_v10  ;;  %v6173_v52 = vsel %vm1273_vm2, %v1275_v38, %v1277_v15  ;;  %v6178_v27 = vsel %vm1273_vm2, %v8636_v19, %v1275_v38  ;;  %v6181_v28 = vsel %vm1504_vm3, %v1505_v21, %v1506_v48  ;;  %v6184_v51 = vsel %vm1504_vm3, %v1506_v48, %v1508_v16 }
 0x223   : > { %8721 = vst [vmem:[#allocation32_spill] sm:$0xff] %v6181_v28  ;;  %8722 = vst [vmem:[#allocation33_spill] sm:$0xff] %v6184_v51 }
 0x224   : > { %v6186_v17 = vpop.f32.mrb[4].mxu0 }
 0x225   : > { %v6188_v29 = vpop.f32.mrb[5].mxu0  ;;  %v1285_v25 = vrot.slane %v6186_v17, 7  ;;  %v1516_v11 = vrot.slane %v6186_v17, 1 }
 0x226   : > { %v1281_v20 = vrot.slane %v6188_v29, 7  ;;  %v1512_v34 = vrot.slane %v6188_v29, 1  ;;  %v6192_v30 = vpop.f32.mrb[6].mxu0 }
 0x227   : > { %v1287_v31 = vrot.slane %v6192_v30, 7  ;;  %v1518_v32 = vrot.slane %v6192_v30, 1  ;;  %v6198_v37 = vpop.f32.mrb[7].mxu0 }
 0x228   : > { %v1283_v53 = vrot.slane %v6198_v37, 7  ;;  %v1514_v40 = vrot.slane %v6198_v37, 1  ;;  %v6203_v43 = vsel %vm1273_vm2, %v1279_v18, %v1281_v20  ;;  %v6206_v56 = vsel %vm1504_vm3, %v1510_v9, %v1512_v34 }
 0x229   : > { %8723 = vst [vmem:[#allocation34_spill] sm:$0xff] %v6206_v56  ;;  %v6209_v13 = vsel %vm1273_vm2, %v1285_v25, %v1287_v31  ;;  %v6212_v45 = vsel %vm1504_vm3, %v1516_v11, %v1518_v32 }
 0x22a   : > { %8724 = vst [vmem:[#allocation35_spill] sm:$0xff] %v6212_v45  ;;  %v6215_v5 = vsel %vm1273_vm2, %v1283_v53, %v1285_v25  ;;  %v6218_v44 = vsel %vm1273_vm2, %v1281_v20, %v1283_v53  ;;  %v6221_v46 = vsel %vm1504_vm3, %v1512_v34, %v1514_v40  ;;  %v6224_v47 = vsel %vm1504_vm3, %v1514_v40, %v1516_v11 }
 0x22b   : > { %8725 = vst [vmem:[#allocation36_spill] sm:$0xff] %v6221_v46  ;;  %8726 = vst [vmem:[#allocation37_spill] sm:$0xff] %v6224_v47 }
 0x22c   : > { %v6226_v54 = vpop.f32.mrb[8].mxu0 }
 0x22d   : > { %v6228_v55 = vpop.f32.mrb[9].mxu0  ;;  %v1293_v57 = vrot.slane %v6226_v54, 7  ;;  %v1524_v39 = vrot.slane %v6226_v54, 1 }
 0x22e   : > { %v1289_v35 = vrot.slane %v6228_v55, 7  ;;  %v1520_v49 = vrot.slane %v6228_v55, 1  ;;  %v6232_v36 = vpop.f32.mrb[10].mxu0 }
 0x22f   : > { %v1295_v58 = vrot.slane %v6232_v36, 7  ;;  %v1526_v42 = vrot.slane %v6232_v36, 1  ;;  %v6238_v59 = vpop.f32.mrb[11].mxu0 }
 0x230   : > { %v1291_v24 = vrot.slane %v6238_v59, 7  ;;  %v1522_v60 = vrot.slane %v6238_v59, 1  ;;  %v6243_v61 = vsel %vm1273_vm2, %v1287_v31, %v1289_v35  ;;  %v6246_v62 = vsel %vm1504_vm3, %v1518_v32, %v1520_v49 }
 0x231   : > { %8727 = vst [vmem:[#allocation38_spill] sm:$0xff] %v6246_v62  ;;  %v6249_v63 = vsel %vm1273_vm2, %v1293_v57, %v1295_v58  ;;  %v6252_v4 = vsel %vm1504_vm3, %v1524_v39, %v1526_v42 }
 0x232   : > { %8728 = vst [vmem:[#allocation39_spill] sm:$0xff] %v6249_v63  ;;  %8729 = vst [vmem:[#allocation40_spill] sm:$0xff] %v6252_v4  ;;  %v6255_v6 = vsel %vm1273_vm2, %v1291_v24, %v1293_v57  ;;  %v6258_v14 = vsel %vm1273_vm2, %v1289_v35, %v1291_v24  ;;  %v6261_v33 = vsel %vm1504_vm3, %v1520_v49, %v1522_v60 }
 0x233   : > { %8730 = vst [vmem:[#allocation41_spill] sm:$0xff] %v6255_v6  ;;  %8731 = vst [vmem:[#allocation42_spill] sm:$0xff] %v6258_v14  ;;  %v6264_v0 = vsel %vm1504_vm3, %v1522_v60, %v1524_v39 }
 0x234   : > { %8732 = vst [vmem:[#allocation43_spill] sm:$0xff] %v6261_v33  ;;  %8733 = vst [vmem:[#allocation44_spill] sm:$0xff] %v6264_v0 }
 0x238   : > { %v6266_v7 = vpop.f32.mrb[12].mxu0 }
 0x239   : > { %8734 = vst [vmem:[#allocation45_spill] sm:$0xff] %v6266_v7  ;;  %1177 = vrot.lane.b32.xlu0 %v6266_v7, %s5433_s20  ;;  %v6270_v26 = vpop.f32.mrb[13].mxu0  ;;  %v1301_v18 = vrot.slane %v6266_v7, 7  ;;  %v1532_v9 = vrot.slane %v6266_v7, 1 }
 0x23a   : > { %8735 = vst [vmem:[#allocation46_spill] sm:$0xff] %v6270_v26  ;;  %v1297_v8 = vrot.slane %v6270_v26, 7  ;;  %v1528_v15 = vrot.slane %v6270_v26, 1  ;;  %v6274_v16 = vpop.f32.mrb[14].mxu0 }
 0x23b   : > { %8736 = vst [vmem:[#allocation47_spill] sm:$0xff] %v6274_v16  ;;  %v1303_v22 = vrot.slane %v6274_v16, 7  ;;  %v1534_v21 = vrot.slane %v6274_v16, 1  ;;  %v6280_v38 = vpop.f32.mrb[15].mxu0 }
 0x23c   : > { %8737 = vst [vmem:[#allocation48_spill] sm:$0xff] %v6280_v38  ;;  %v1299_v48 = vrot.slane %v6280_v38, 7  ;;  %v1530_v20 = vrot.slane %v6280_v38, 1  ;;  %1175 = vrot.lane.b32.xlu1 %v6280_v38, %s5433_s20  ;;  %v6287_v34 = vsel %vm1273_vm2, %v1295_v58, %v1297_v8  ;;  %v6290_v25 = vsel %vm1504_vm3, %v1526_v42, %v1528_v15 }
 0x23d   : > { %8738 = vst [vmem:[#allocation49_spill] sm:$0xff] %v6287_v34  ;;  %8739 = vst [vmem:[#allocation50_spill] sm:$0xff] %v6290_v25  ;;  %1173 = vrot.lane.b32.xlu0 %v6270_v26, %s5433_s20  ;;  %v1304_v11 = vsel %vm1273_vm2, %v1301_v18, %v1303_v22  ;;  %v1535_v31 = vsel %vm1504_vm3, %v1532_v9, %v1534_v21 }
 0x23e   : > { %v1302_v32 = vsel %vm1273_vm2, %v1299_v48, %v1301_v18  ;;  %v6298_v53 = vsel %vm1273_vm2, %v1297_v8, %v1299_v48  ;;  %v6301_v40 = vsel %vm1504_vm3, %v1528_v15, %v1530_v20  ;;  %v6304_v35 = vsel %vm1504_vm3, %v1530_v20, %v1532_v9 }
 0x23f   : > { %8740 = vst [vmem:[#allocation51_spill] sm:$0xff] %v6298_v53  ;;  %8741 = vst [vmem:[#allocation52_spill] sm:$0xff] %v6301_v40 }
 0x240   : > { %8742 = vst [vmem:[#allocation53_spill] sm:$0xff] %v6304_v35  ;;  %1367 = vrot.lane.b32.xlu1 %v1304_v11, %s5434_s12 }
 0x241   : > { %1179 = vrot.lane.b32.xlu0 %v6274_v16, %s5433_s20 }
 0x244   : > { %v6309_v49 = vpop.f32.mrb[16].mxu0 }
 0x245   : > { %v1309_v57 = vrot.slane %v6309_v49, 7  ;;  %v1540_v39 = vrot.slane %v6309_v49, 1  ;;  %v6313_v58 = vpop.f32.mrb[17].mxu0  ;;  %1699 = vrot.lane.b32.xlu0 %v1535_v31, %s5435_s18 }
 0x246   : > { %v1305_v42 = vrot.slane %v6313_v58, 7  ;;  %v1536_v24 = vrot.slane %v6313_v58, 1  ;;  %v6318_v60 = vpop.f32.mrb[18].mxu0  ;;  %1181 = vrot.lane.b32.xlu1 %v6313_v58, %s5433_s20 }
 0x247   : > { %v1311_v8 = vrot.slane %v6318_v60, 7  ;;  %v1542_v15 = vrot.slane %v6318_v60, 1  ;;  %v6324_v18 = vpop.f32.mrb[19].mxu0 }
 0x248   : > { %v1307_v9 = vrot.slane %v6324_v18, 7  ;;  %v1538_v48 = vrot.slane %v6324_v18, 1  ;;  %v1306_v20 = vsel %vm1273_vm2, %v1303_v22, %v1305_v42  ;;  %v1537_v11 = vsel %vm1504_vm3, %v1534_v21, %v1536_v24 }
 0x249   : > { %1365 = vrot.lane.b32.xlu0 %v1302_v32, %s5434_s12  ;;  %v1312_v31 = vsel %vm1273_vm2, %v1309_v57, %v1311_v8  ;;  %v1543_v19 = vsel %vm1504_vm3, %v1540_v39, %v1542_v15  ;;  %v6344_v22 = vadd.s32 8, %v5835_v1 }
 0x24a   : > { %1187 = vrot.lane.b32.xlu1 %v6318_v60, %s5433_s20  ;;  %v1310_v7 = vsel %vm1273_vm2, %v1307_v9, %v1309_v57  ;;  %v1308_v16 = vsel %vm1273_vm2, %v1305_v42, %v1307_v9  ;;  %v1541_v26 = vsel %vm1504_vm3, %v1538_v48, %v1540_v39  ;;  %v1539_v38 = vsel %vm1504_vm3, %v1536_v24, %v1538_v48 }
 0x24b   : > { %8743 = vst [vmem:[#allocation54_spill] sm:$0xff] %v6344_v22  ;;  %vm1602_vm4 = vcmp.lt.s32.totalorder %v6344_v22, 15 }
 0x24c   : > { %v1622_v4 = vsel %vm1602_vm4, %v1537_v11, 0.0 }
 0x24d   : > { %1185 = vrot.lane.b32.xlu0 %v6309_v49, %s5433_s20 }
 0x24e   : > { %1183 = vrot.lane.b32.xlu1 %v6324_v18, %s5433_s20 }
 0x250   : > { %v6346_v21 = vpop.f32.mrb[20].mxu0 }
 0x251   : > { %8744 = vst [vmem:[#allocation55_spill] sm:$0xff] %v6346_v21  ;;  %v1317_v32 = vrot.slane %v6346_v21, 7  ;;  %v1548_v57 = vrot.slane %v6346_v21, 1  ;;  %v6350_v42 = vpop.f32.mrb[21].mxu0  ;;  %1369 = vrot.lane.b32.xlu0 %v1306_v20, %s5434_s12 }
 0x252   : > { %8745 = vst [vmem:[#allocation56_spill] sm:$0xff] %v6350_v42  ;;  %v1313_v39 = vrot.slane %v6350_v42, 7  ;;  %v1544_v24 = vrot.slane %v6350_v42, 1  ;;  %v6355_v9 = vpop.f32.mrb[22].mxu0  ;;  %1375 = vrot.lane.b32.xlu1 %v1312_v31, %s5434_s12 }
 0x253   : > { %8746 = vst [vmem:[#allocation57_spill] sm:$0xff] %v6355_v9  ;;  %v1319_v48 = vrot.slane %v6355_v9, 7  ;;  %v1550_v3 = vrot.slane %v6355_v9, 1  ;;  %v6361_v2 = vpop.f32.mrb[23].mxu0 }
 0x254   : > { %8747 = vst [vmem:[#allocation58_spill] sm:$0xff] %v6361_v2  ;;  %v1315_v35 = vrot.slane %v6361_v2, 7  ;;  %v1546_v40 = vrot.slane %v6361_v2, 1  ;;  %v1314_v25 = vsel %vm1273_vm2, %v1311_v8, %v1313_v39  ;;  %v1545_v20 = vsel %vm1504_vm3, %v1542_v15, %v1544_v24 }
 0x255   : > { %v1320_v31 = vsel %vm1273_vm2, %v1317_v32, %v1319_v48  ;;  %v1551_v0 = vsel %vm1504_vm3, %v1548_v57, %v1550_v3  ;;  %1707 = vrot.lane.b32.xlu0 %v1543_v19, %s5435_s18 }
 0x256   : > { %v1318_v33 = vsel %vm1273_vm2, %v1315_v35, %v1317_v32  ;;  %v1316_v62 = vsel %vm1273_vm2, %v1313_v39, %v1315_v35  ;;  %v1549_v45 = vsel %vm1504_vm3, %v1546_v40, %v1548_v57  ;;  %v1547_v47 = vsel %vm1504_vm3, %v1544_v24, %v1546_v40  ;;  %1701 = vrot.lane.b32.xlu1 %v1622_v4, %s5435_s18 }
 0x257   : > { %v1624_v4 = vsel %vm1602_vm4, %v1541_v26, 0.0 }
 0x259   : > { %1371 = vrot.lane.b32.xlu0 %v1308_v16, %s5434_s12 }
 0x25a   : > { %1373 = vrot.lane.b32.xlu1 %v1310_v7, %s5434_s12 }
 0x25b   : > { %v6379_v8 = vpop.f32.mrb[24].mxu0 }
 0x25c   : > { %v1325_v15 = vrot.slane %v6379_v8, 7  ;;  %v1556_v19 = vrot.slane %v6379_v8, 1  ;;  %v6383_v11 = vpop.f32.mrb[25].mxu0 }
 0x25d   : > { %v1321_v35 = vrot.slane %v6383_v11, 7  ;;  %v1552_v32 = vrot.slane %v6383_v11, 1  ;;  %v6387_v57 = vpop.f32.mrb[26].mxu0  ;;  %1703 = vrot.lane.b32.xlu0 %v1539_v38, %s5435_s18 }
 0x25e   : > { %v1327_v7 = vrot.slane %v6387_v57, 7  ;;  %v1558_v16 = vrot.slane %v6387_v57, 1  ;;  %v6394_v40 = vpop.f32.mrb[27].mxu0  ;;  %1705 = vrot.lane.b32.xlu1 %v1624_v4, %s5435_s18 }
 0x25f   : > { %v1323_v39 = vrot.slane %v6394_v40, 7  ;;  %v1554_v24 = vrot.slane %v6394_v40, 1  ;;  %v1553_v46 = vsel %vm1504_vm3, %v1550_v3, %v1552_v32  ;;  %v1322_v56 = vsel %vm1273_vm2, %v1319_v48, %v1321_v35 }
 0x260   : > { %v1328_v26 = vsel %vm1273_vm2, %v1325_v15, %v1327_v7  ;;  %v1559_v38 = vsel %vm1504_vm3, %v1556_v19, %v1558_v16 }
 0x261   : > { %v1326_v10 = vsel %vm1273_vm2, %v1323_v39, %v1325_v15  ;;  %v1324_v51 = vsel %vm1273_vm2, %v1321_v35, %v1323_v39  ;;  %v1557_v53 = vsel %vm1504_vm3, %v1554_v24, %v1556_v19  ;;  %v1555_v4 = vsel %vm1504_vm3, %v1552_v32, %v1554_v24  ;;  %1193 = vrot.lane.b32.xlu0 %v6346_v21, %s5433_s20 }
 0x262   : > { %1195 = vrot.lane.b32.xlu1 %v6355_v9, %s5433_s20 }
 0x265   : > { %1189 = vrot.lane.b32.xlu0 %v6350_v42, %s5433_s20  ;;  %v6415_v3 = vpop.f32.mrb[28].mxu0 }
 0x266   : > { %1191 = vrot.lane.b32.xlu1 %v6361_v2, %s5433_s20  ;;  %8748 = vst [vmem:[#allocation59_spill] sm:$0xff] %v6415_v3  ;;  %v1333_v48 = vrot.slane %v6415_v3, 7  ;;  %v1564_v15 = vrot.slane %v6415_v3, 1  ;;  %v6419_v19 = vpop.f32.mrb[29].mxu0 }
 0x267   : > { %v1329_v35 = vrot.slane %v6419_v19, 7  ;;  %v1560_v32 = vrot.slane %v6419_v19, 1  ;;  %v6423_v39 = vpop.f32.mrb[30].mxu0 }
 0x268   : > { %8749 = vst [vmem:[#allocation60_spill] sm:$0xff] %v6423_v39  ;;  %v1335_v24 = vrot.slane %v6423_v39, 7  ;;  %v1566_v21 = vrot.slane %v6423_v39, 1  ;;  %v6428_v9 = vpop.f32.mrb[31].mxu0 }
 0x269   : > { %1377 = vrot.lane.b32.xlu0 %v1314_v25, %s5434_s12  ;;  %v1331_v3 = vrot.slane %v6428_v9, 7  ;;  %v1562_v2 = vrot.slane %v6428_v9, 1  ;;  %v1561_v28 = vsel %vm1504_vm3, %v1558_v16, %v1560_v32  ;;  %v1330_v42 = vsel %vm1273_vm2, %v1327_v7, %v1329_v35 }
 0x26a   : > { %1383 = vrot.lane.b32.xlu1 %v1320_v31, %s5434_s12  ;;  %v1336_v14 = vsel %vm1273_vm2, %v1333_v48, %v1335_v24  ;;  %v1567_v25 = vsel %vm1504_vm3, %v1564_v15, %v1566_v21  ;;  %v1626_v31 = vsel %vm1602_vm4, %v1545_v20, 0.0  ;;  %v1628_v7 = vsel %vm1602_vm4, %v1549_v45, 0.0 }
 0x26b   : > { %v1334_v63 = vsel %vm1273_vm2, %v1331_v3, %v1333_v48  ;;  %v1332_v39 = vsel %vm1273_vm2, %v1329_v35, %v1331_v3  ;;  %v1563_v6 = vsel %vm1504_vm3, %v1560_v32, %v1562_v2  ;;  %v1565_v34 = vsel %vm1504_vm3, %v1562_v2, %v1564_v15 }
 0x26c   : > { %v1630_v2 = vsel %vm1602_vm4, %v1553_v46, 0.0  ;;  %v1632_v45 = vsel %vm1602_vm4, %v1557_v53, 0.0 }
 0x26d   : > { %1715 = vrot.lane.b32.xlu0 %v1551_v0, %s5435_s18 }
 0x26e   : > { %1709 = vrot.lane.b32.xlu1 %v1626_v31, %s5435_s18 }
 0x271   : > { %1379 = vrot.lane.b32.xlu0 %v1316_v62, %s5434_s12 }
 0x272   : > { %1381 = vrot.lane.b32.xlu1 %v1318_v33, %s5434_s12 }
 0x275   : > { %1711 = vrot.lane.b32.xlu0 %v1547_v47, %s5435_s18 }
 0x276   : > { %1713 = vrot.lane.b32.xlu1 %v1628_v7, %s5435_s18 }
 0x279   : > { %1201 = vrot.lane.b32.xlu0 %v6379_v8, %s5433_s20 }
 0x27a   : > { %1203 = vrot.lane.b32.xlu1 %v6387_v57, %s5433_s20 }
 0x27d   : > { %1197 = vrot.lane.b32.xlu0 %v6383_v11, %s5433_s20 }
 0x27e   : > { %1199 = vrot.lane.b32.xlu1 %v6394_v40, %s5433_s20 }
 0x281   : > { %1385 = vrot.lane.b32.xlu0 %v1322_v56, %s5434_s12 }
 0x282   : > { %1717 = vrot.lane.b32.xlu1 %v1630_v2, %s5435_s18 }
 0x285   : > { %1391 = vrot.lane.b32.xlu0 %v1328_v26, %s5434_s12 }
 0x286   : > { %1389 = vrot.lane.b32.xlu1 %v1326_v10, %s5434_s12  ;;  %v1634_v10 = vsel %vm1602_vm4, %v1561_v28, 0.0  ;;  %v1636_v28 = vsel %vm1602_vm4, %v1565_v34, 0.0 }
 0x289   : > { %1723 = vrot.lane.b32.xlu0 %v1559_v38, %s5435_s18 }
 0x28a   : > { %1387 = vrot.lane.b32.xlu1 %v1324_v51, %s5434_s12  ;;  %v1600_v51 = vsel %vm1504_vm3, %v1566_v21, 0.0 }
 0x28b   : > { %v1638_v56 = vsel %vm1602_vm4, %v1600_v51, 0.0 }
 0x28d   : > { %1719 = vrot.lane.b32.xlu0 %v1555_v4, %s5435_s18 }
 0x28e   : > { %1721 = vrot.lane.b32.xlu1 %v1632_v45, %s5435_s18 }
 0x290   : > { %v6493_v46 = vpop.permute.xlu0 %1149 }
 0x291   : > { %1205 = vrot.lane.b32.xlu0 %v6419_v19, %s5433_s20 }
 0x292   : > { %1207 = vrot.lane.b32.xlu1 %v6428_v9, %s5433_s20  ;;  %v6497_v47 = vpop.permute.xlu1 %1151 }
 0x295   : > { %1393 = vrot.lane.b32.xlu0 %v1330_v42, %s5434_s12 }
 0x296   : > { %1725 = vrot.lane.b32.xlu1 %v1634_v10, %s5435_s18 }
 0x299   : > { %1399 = vrot.lane.b32.xlu0 %v1336_v14, %s5434_s12 }
 0x29a   : > { %1397 = vrot.lane.b32.xlu1 %v1334_v63, %s5434_s12  ;;  %v8750_v63 = vrot.slane %v6153_v41, 7 }
 0x29d   : > { %1731 = vrot.lane.b32.xlu0 %v1567_v25, %s5435_s18 }
 0x29e   : > { %1395 = vrot.lane.b32.xlu1 %v1332_v39, %s5434_s12 }
 0x2a1   : > { %1727 = vrot.lane.b32.xlu0 %v1563_v6, %s5435_s18 }
 0x2a2   : > { %1733 = vrot.lane.b32.xlu1 %v1638_v56, %s5435_s18  ;;  %v8752_v56 = vld [vmem:[#allocation41_spill] sm:$0xff] }
 0x2a5   : > { %1153 = vrot.lane.b32.xlu0 %v6151_v50, %s5433_s20 }
 0x2a6   : > { %1729 = vrot.lane.b32.xlu1 %v1636_v28, %s5435_s18 }
 0x2a9   : > { %1157 = vrot.lane.b32.xlu0 %v6188_v29, %s5433_s20 }
 0x2aa   : > { %1155 = vrot.lane.b32.xlu1 %v6157_v12, %s5433_s20 }
 0x2ab   : > { %v1178_v62 = vpop.permute.xlu0 %1177 }
 0x2ac   : > { %v1255_v25 = vadd.f32 %v6309_v49, %v1178_v62 }
 0x2ad   : > { %1337 = vrot.lane.b32.xlu0 %v8750_v63, %s5434_s12 }
 0x2ae   : > { %1159 = vrot.lane.b32.xlu1 %v6198_v37, %s5433_s20  ;;  %v1176_v6 = vpop.permute.xlu1 %1175 }
 0x2af   : > { %v1174_v14 = vpop.permute.xlu0 %1173  ;;  %v1254_v48 = vadd.f32 %v1176_v6, %v6324_v18 }
 0x2b0   : > { %v1253_v53 = vadd.f32 %v1174_v14, %v6313_v58 }
 0x2b1   : > { %1163 = vrot.lane.b32.xlu0 %v6192_v30, %s5433_s20 }
 0x2b2   : > { %1161 = vrot.lane.b32.xlu1 %v6186_v17, %s5433_s20  ;;  %v1368_v33 = vpop.permute.xlu1 %1367 }
 0x2b3   : > { %v1180_v0 = vpop.permute.xlu0 %1179 }
 0x2b5   : > { %1167 = vrot.lane.b32.xlu0 %v6238_v59, %s5433_s20 }
 0x2b6   : > { %1165 = vrot.lane.b32.xlu1 %v6228_v55, %s5433_s20 }
 0x2b7   : > { %v1700_v41 = vpop.permute.xlu0 %1699 }
 0x2b8   : > { %v1182_v34 = vpop.permute.xlu1 %1181 }
 0x2b9   : > { %1171 = vrot.lane.b32.xlu0 %v6232_v36, %s5433_s20 }
 0x2ba   : > { %1169 = vrot.lane.b32.xlu1 %v6226_v54, %s5433_s20 }
 0x2bb   : > { %v1366_v21 = vpop.permute.xlu0 %1365 }
 0x2bc   : > { %v6520_v42 = vpop.permute.xlu1 %1187  ;;  %v1454_v20 = vsel %vm1434_vm5, %v1366_v21, 0.0  ;;  %v8754_v21 = vld [vmem:[#allocation42_spill] sm:$0xff] }
 0x2bd   : > { %v1486_v16 = vadd.f32 %v1454_v20, %v1253_v53  ;;  %1345 = vrot.lane.b32.xlu0 %v6203_v43, %s5434_s12  ;;  %v8755_v20 = vld [vmem:[#allocation56_spill] sm:$0xff] }
 0x2be   : > { %1341 = vrot.lane.b32.xlu1 %v6173_v52, %s5434_s12  ;;  %v1487_v52 = vadd.f32 %v1368_v33, %v1254_v48  ;;  %v8753_v33 = vld [vmem:[#allocation39_spill] sm:$0xff] }
 0x2bf   : > { %v6528_v26 = vpop.permute.xlu0 %1185  ;;  %v1781_v4 = vadd.f32 %v1700_v41, %v1486_v16  ;;  %v1257_v16 = vadd.f32 %v1182_v34, %v8755_v20  ;;  %v8756_v34 = vld [vmem:[#allocation32_spill] sm:$0xff]  ;;  %v8763_v20 = vld [vmem:[#allocation37_spill] sm:$0xff] }
 0x2c0   : > { %v6530_v38 = vpop.permute.xlu1 %1183 }
 0x2c1   : > { %1339 = vrot.lane.b32.xlu0 %v6178_v27, %s5434_s12  ;;  %v1852_v43 = vrot.slane %v1781_v4, 7  ;;  %v1948_v18 = vrot.slane %v1781_v4, 1 }
 0x2c2   : > { %1349 = vrot.lane.b32.xlu1 %v6215_v5, %s5434_s12  ;;  %v1256_v5 = vadd.f32 %v6318_v60, %v1180_v0  ;;  %v8751_v60 = vld [vmem:[#allocation49_spill] sm:$0xff] }
 0x2c3   : > { %v1370_v58 = vpop.permute.xlu0 %1369  ;;  %v1918_v27 = vsel %vm1273_vm2, -1e+30, %v1852_v43 }
 0x2c4   : > { %v6536_v3 = vpop.permute.xlu1 %1375  ;;  %v2037_v31 = vmax.f32 %v1918_v27, %v1781_v4 }
 0x2c5   : > { %1347 = vrot.lane.b32.xlu0 %v6218_v44, %s5434_s12  ;;  %v1456_v44 = vsel %vm1434_vm5, %v1370_v58, 0.0 }
 0x2c6   : > { %1343 = vrot.lane.b32.xlu1 %v6167_v23, %s5434_s12 }
 0x2c7   : > { %v1708_v15 = vpop.permute.xlu0 %1707 }
 0x2c8   : > { %v1702_v35 = vpop.permute.xlu1 %1701 }
 0x2c9   : > { %v1782_v32 = vadd.f32 %v1702_v35, %v1487_v52  ;;  %1353 = vrot.lane.b32.xlu0 %v6243_v61, %s5434_s12 }
 0x2ca   : > { %1351 = vrot.lane.b32.xlu1 %v6209_v13, %s5434_s12  ;;  %v1488_v13 = vadd.f32 %v1456_v44, %v1255_v25 }
 0x2cb   : > { %v1853_v39 = vrot.slane %v1782_v32, 7  ;;  %v1949_v23 = vrot.slane %v1782_v32, 1  ;;  %v1372_v24 = vpop.permute.xlu0 %1371 }
 0x2cc   : > { %v1374_v7 = vpop.permute.xlu1 %1373  ;;  %v1489_v45 = vadd.f32 %v1372_v24, %v1256_v5 }
 0x2cd   : > { %v1854_v2 = vsel %vm1273_vm2, %v1852_v43, %v1853_v39  ;;  %v1950_v61 = vsel %vm1504_vm3, %v1948_v18, %v1949_v23  ;;  %1361 = vrot.lane.b32.xlu0 %v8751_v60, %s5434_s12  ;;  %v2014_v28 = vsel %vm1504_vm3, %v1949_v23, -1e+30  ;;  %v1458_v0 = vsel %vm1434_vm5, %v1374_v7, 0.0  ;;  %v2185_v43 = vld [vmem:[#allocation12] sm:$0xf]  ;;  %v8757_v23 = vld [vmem:[#allocation51_spill] sm:$0xff] }
 0x2ce   : > { %v2038_v10 = vmax.f32 %v1854_v2, %v1782_v32  ;;  %v6556_v51 = vmax.f32 %v2037_v31, %v1950_v61  ;;  %1357 = vrot.lane.b32.xlu1 %v8752_v56, %s5434_s12  ;;  %4724 = vmatprep.subr.msk.bf16.mxu1 %vm2298_vm6, %v2185_v43  ;;  %v2300_v27 = vsel %vm2298_vm6, %v2185_v43, 0  ;;  %v1490_v32 = vadd.f32 %v1458_v0, %v1257_v16  ;;  %v8764_v16 = vld [vmem:[#allocation35_spill] sm:$0xff] }
 0x2cf   : > { %v1704_v49 = vpop.permute.xlu0 %1703  ;;  %4723 = vmatprep.subr.msk.bf16.mxu0 %vm2298_vm6, %v2185_v43  ;;  %4721 = vmatpush3.bf16.msra.mxu1 %v2300_v27  ;;  %vm4363_vm6 = vcmask 523264  }
 0x2d0   : > { %v6561_v62 = vmax.f32 %v2038_v10, %v2014_v28  ;;  %v1706_v63 = vpop.permute.xlu1 %1705  ;;  %v1783_v6 = vadd.f32 %v1704_v49, %v1488_v13  ;;  %4677 = vmatpush3.bf16.msra.mxu0 %v2300_v27  ;;  %v1785_v61 = vadd.f32 %v1708_v15, %v1490_v32  ;;  %v8759_v13 = vld [vmem:[#allocation31_spill] sm:$0xff]  ;;  %v8760_v28 = vld [vmem:[#allocation58_spill] sm:$0xff] }
 0x2d1   : > { %v1784_v14 = vadd.f32 %v1706_v63, %v1489_v45  ;;  %1359 = vrot.lane.b32.xlu0 %v8753_v33, %s5434_s12  ;;  %v8758_v45 = vld [vmem:[#allocation33_spill] sm:$0xff]  ;;  %v1258_v49 = vadd.f32 %v6530_v38, %v8760_v28  ;;  %v1612_v38 = vsel %vm1602_vm4, %v8763_v20, 0.0 }
 0x2d2   : > { %v1855_v41 = vrot.slane %v1783_v6, 7  ;;  %v1951_v53 = vrot.slane %v1783_v6, 1  ;;  %1355 = vrot.lane.b32.xlu1 %v8754_v21, %s5434_s12  ;;  %v1608_v60 = vsel %vm1602_vm4, %v8758_v45, 0.0  ;;  %v1858_v63 = vrot.slane %v1785_v61, 7 }
 0x2d3   : > { %v1856_v4 = vrot.slane %v1784_v14, 7  ;;  %v1952_v58 = vrot.slane %v1784_v14, 1  ;;  %v6570_v48 = vpop.permute.xlu0 %1193  ;;  %v1491_v33 = vadd.f32 %v6536_v3, %v1258_v49  ;;  %v1954_v43 = vrot.slane %v1785_v61, 1 }
 0x2d4   : > { %v1919_v52 = vsel %vm1273_vm2, -1e+30, %v1855_v41  ;;  %v6573_v35 = vpop.permute.xlu1 %1195 }
 0x2d5   : > { %v1857_v5 = vsel %vm1273_vm2, %v1855_v41, %v1856_v4  ;;  %v1953_v18 = vsel %vm1504_vm3, %v1951_v53, %v1952_v58  ;;  %1671 = vrot.lane.b32.xlu0 %v8756_v34, %s5435_s18  ;;  %v2039_v44 = vmax.f32 %v1919_v52, %v1783_v6  ;;  %v2015_v24 = vsel %vm1504_vm3, %v1952_v58, -1e+30  ;;  %v8761_v6 = vld [vmem:[#allocation34_spill] sm:$0xff]  ;;  %v8765_v4 = vld [vmem:[#allocation57_spill] sm:$0xff] }
 0x2d6   : > { %v2040_v39 = vmax.f32 %v1857_v5, %v1784_v14  ;;  %1363 = vrot.lane.b32.xlu1 %v8757_v23, %s5434_s12  ;;  %v1610_v15 = vsel %vm1602_vm4, %v8761_v6, 0.0  ;;  %v8762_v14 = vld [vmem:[#allocation36_spill] sm:$0xff]  ;;  %v1920_v53 = vsel %vm1273_vm2, -1e+30, %v1858_v63  ;;  %v1260_v58 = vadd.f32 %v8765_v4, %v6520_v42  ;;  %v8766_v5 = vld [vmem:[#allocation55_spill] sm:$0xff]  ;;  %v8767_v42 = vld [vmem:[#allocation38_spill] sm:$0xff] }
 0x2d7   : > { %v1190_v25 = vpop.permute.xlu0 %1189  ;;  %v2071_v31 = vmax.f32 %v2039_v44, %v1953_v18  ;;  %v1259_v18 = vadd.f32 %v8766_v5, %v6528_v26  ;;  %v2041_v34 = vmax.f32 %v1920_v53, %v1785_v61  ;;  %v1614_v45 = vsel %vm1602_vm4, %v8767_v42, 0.0  ;;  %v8771_v5 = vld [vmem:[#allocation50_spill] sm:$0xff]  ;;  %v2151_v42 = vld [vmem:[#allocation9] sm:$0x3] }
 0x2d8   : > { %v6582_v7 = vpop.permute.xlu1 %1191  ;;  %v2072_v2 = vmax.f32 %v2040_v39, %v2015_v24  ;;  %v1261_v61 = vadd.f32 %v1190_v25, %v6383_v11 }
 0x2d9   : > { %1675 = vrot.lane.b32.xlu0 %v8759_v13, %s5435_s18 }
 0x2da   : > { %1673 = vrot.lane.b32.xlu1 %v1608_v60, %s5435_s18  ;;  %v8768_v60 = vld [vmem:[#allocation43_spill] sm:$0xff] }
 0x2db   : > { %v1378_v10 = vpop.permute.xlu0 %1377 }
 0x2dc   : > { %v6590_v56 = vpop.permute.xlu1 %1383  ;;  %v1460_v3 = vsel %vm1434_vm5, %v1378_v10, 0.0 }
 0x2dd   : > { %1679 = vrot.lane.b32.xlu0 %v8762_v14, %s5435_s18  ;;  %v1492_v13 = vadd.f32 %v1460_v3, %v1259_v18  ;;  %v1618_v18 = vsel %vm1602_vm4, %v8771_v5, 0.0 }
 0x2de   : > { %1677 = vrot.lane.b32.xlu1 %v1610_v15, %s5435_s18 }
 0x2df   : > { %v1716_v0 = vpop.permute.xlu0 %1715 }
 0x2e0   : > { %v1710_v41 = vpop.permute.xlu1 %1709 }
 0x2e1   : > { %v1786_v21 = vadd.f32 %v1710_v41, %v1491_v33  ;;  %1683 = vrot.lane.b32.xlu0 %v8764_v16, %s5435_s18 }
 0x2e2   : > { %1681 = vrot.lane.b32.xlu1 %v1612_v38, %s5435_s18  ;;  %v8770_v38 = vld [vmem:[#allocation40_spill] sm:$0xff] }
 0x2e3   : > { %v1859_v52 = vrot.slane %v1786_v21, 7  ;;  %v1955_v27 = vrot.slane %v1786_v21, 1  ;;  %v1380_v32 = vpop.permute.xlu0 %1379 }
 0x2e4   : > { %v1382_v44 = vpop.permute.xlu1 %1381  ;;  %v1493_v24 = vadd.f32 %v1380_v32, %v1260_v58 }
 0x2e5   : > { %v1860_v39 = vsel %vm1273_vm2, %v1858_v63, %v1859_v52  ;;  %v1956_v23 = vsel %vm1504_vm3, %v1954_v43, %v1955_v27  ;;  %1687 = vrot.lane.b32.xlu0 %v8768_v60, %s5435_s18  ;;  %v1462_v26 = vsel %vm1434_vm5, %v1382_v44, 0.0  ;;  %v2016_v49 = vsel %vm1504_vm3, %v1955_v27, -1e+30 }
 0x2e6   : > { %v2042_v10 = vmax.f32 %v1860_v39, %v1786_v21  ;;  %v6621_v28 = vmax.f32 %v2041_v34, %v1956_v23  ;;  %1685 = vrot.lane.b32.xlu1 %v1614_v45, %s5435_s18  ;;  %v1494_v41 = vadd.f32 %v1462_v26, %v1261_v61  ;;  %v8769_v21 = vld [vmem:[#allocation44_spill] sm:$0xff]  ;;  %v8773_v61 = vld [vmem:[#allocation53_spill] sm:$0xff] }
 0x2e7   : > { %v1712_v63 = vpop.permute.xlu0 %1711  ;;  %v1616_v20 = vsel %vm1602_vm4, %v8769_v21, 0.0  ;;  %v8772_v34 = vld [vmem:[#allocation52_spill] sm:$0xff] }
 0x2e8   : > { %v6628_v6 = vmax.f32 %v2042_v10, %v2016_v49  ;;  %v2095_v15 = vmax.f32 %v2071_v31, %v6621_v28  ;;  %v1714_v14 = vpop.permute.xlu1 %1713  ;;  %v1787_v33 = vadd.f32 %v1712_v63, %v1492_v13  ;;  %v1789_v27 = vadd.f32 %v1716_v0, %v1494_v41  ;;  %v8774_v63 = vld [vmem:[#allocation29_spill] sm:$0xff] }
 0x2e9   : > { %v1788_v53 = vadd.f32 %v1714_v14, %v1493_v24  ;;  %1691 = vrot.lane.b32.xlu0 %v8770_v38, %s5435_s18  ;;  %v1262_v10 = vadd.f32 %v6582_v7, %v6394_v40  ;;  %v1620_v49 = vsel %vm1602_vm4, %v8773_v61, 0.0  ;;  %v2184_v38 = vld [vmem:[#allocation11] sm:$0x3] }
 0x2ea   : > { %v2096_v11 = vmax.f32 %v2072_v2, %v6628_v6  ;;  %v2111_v25 = vmax.f32 %v2095_v15, %v6556_v51  ;;  %1689 = vrot.lane.b32.xlu1 %v1616_v20, %s5435_s18  ;;  %v1861_v4 = vrot.slane %v1787_v33, 7  ;;  %v1957_v58 = vrot.slane %v1787_v33, 1 }
 0x2eb   : > { %v1862_v16 = vrot.slane %v1788_v53, 7  ;;  %v1958_v31 = vrot.slane %v1788_v53, 1  ;;  %v6639_v43 = vpop.permute.xlu0 %1201  ;;  %v1864_v26 = vrot.slane %v1789_v27, 7  ;;  %v6663_v15 = vrot.slane %v2151_v42, %v8774_v63 }
 0x2ec   : > { %v2112_v3 = vmax.f32 %v2096_v11, %v6561_v62  ;;  %2128 = vst.msk [vmem:[#allocation2 + $0x40] sm:$0xff] %vm2119_vm7, %v2111_v25  ;;  %v6643_v52 = vpop.permute.xlu1 %1203  ;;  %v1921_v2 = vsel %vm1273_vm2, -1e+30, %v1861_v4  ;;  %v1495_v14 = vadd.f32 %v6590_v56, %v1262_v10  ;;  %v1960_v25 = vrot.slane %v1789_v27, 1 }
 0x2ed   : > { %v1863_v32 = vsel %vm1273_vm2, %v1861_v4, %v1862_v16  ;;  %1695 = vrot.lane.b32.xlu0 %v8772_v34, %s5435_s18  ;;  %v1959_v44 = vsel %vm1504_vm3, %v1957_v58, %v1958_v31  ;;  %v2043_v39 = vmax.f32 %v1921_v2, %v1787_v33  ;;  %v2017_v0 = vsel %vm1504_vm3, %v1958_v31, -1e+30 }
 0x2ee   : > { %2129 = vst.msk [vmem:[#allocation2 + $0x48] sm:$0xff] %vm2119_vm7, %v2112_v3  ;;  %v2044_v23 = vmax.f32 %v1863_v32, %v1788_v53  ;;  %1693 = vrot.lane.b32.xlu1 %v1618_v18, %s5435_s18  ;;  %v8775_v53 = vld [vmem:[#allocation30_spill] sm:$0xff]  ;;  %v1922_v20 = vsel %vm1273_vm2, -1e+30, %v1864_v26  ;;  %v6673_v32 = vrot.slane %v2184_v38, %v8774_v63 }
 0x2ef   : > { %v1198_v24 = vpop.permute.xlu0 %1197  ;;  %v2075_v45 = vmax.f32 %v2043_v39, %v1959_v44  ;;  %v6667_v21 = vrot.slane %v2151_v42, %v8775_v53  ;;  %v2045_v58 = vmax.f32 %v1922_v20, %v1789_v27  ;;  %v1263_v39 = vadd.f32 %v6379_v8, %v6570_v48 }
 0x2f0   : > { %v1200_v60 = vpop.permute.xlu1 %1199  ;;  %v2076_v13 = vmax.f32 %v2044_v23, %v2017_v0  ;;  %v6685_v42 = vrot.slane %v2184_v38, %v8775_v53  ;;  %v1264_v8 = vadd.f32 %v6387_v57, %v6573_v35  ;;  %v1265_v48 = vadd.f32 %v1198_v24, %v6419_v19 }
 0x2f2   : > { %1697 = vrot.lane.b32.xlu1 %v1620_v49, %s5435_s18 }
 0x2f3   : > { %v1386_v33 = vpop.permute.xlu0 %1385 }
 0x2f4   : > { %v1718_v41 = vpop.permute.xlu1 %1717  ;;  %v1464_v27 = vsel %vm1434_vm5, %v1386_v33, 0.0 }
 0x2f5   : > { %v1790_v40 = vadd.f32 %v1718_v41, %v1495_v14  ;;  %v2144_v7 = vld [vmem:[#allocation2 + $0x40] ss:$2 sm:$0xff]  ;;  %v1496_v20 = vadd.f32 %v1464_v27, %v1263_v39 }
 0x2f6   : > { %v2160_v11 = vmul.f32 %v6663_v15, %v2144_v7 }
 0x2f7   : > { %v1865_v16 = vrot.slane %v1790_v40, 7  ;;  %v1961_v31 = vrot.slane %v1790_v40, 1  ;;  %v1392_v4 = vpop.permute.xlu0 %1391 }
 0x2f8   : > { %v1390_v3 = vpop.permute.xlu1 %1389  ;;  %v2172_v56 = vadd.f32 %v6667_v21, %v2160_v11 }
 0x2f9   : > { %v1866_v2 = vsel %vm1273_vm2, %v1864_v26, %v1865_v16  ;;  %v1962_v5 = vsel %vm1504_vm3, %v1960_v25, %v1961_v31  ;;  %v2018_v23 = vsel %vm1504_vm3, %v1961_v31, -1e+30  ;;  %v1466_v61 = vsel %vm1434_vm5, %v1390_v3, 0.0 }
 0x2fa   : > { %v2046_v18 = vmax.f32 %v1866_v2, %v1790_v40  ;;  %v6677_v34 = vmax.f32 %v2045_v58, %v1962_v5  ;;  %v2180_v44 = vmax.f32 %v2172_v56, 0.0  ;;  %v1498_v40 = vadd.f32 %v1466_v61, %v1265_v48 }
 0x2fb   : > { %v1724_v0 = vpop.permute.xlu0 %1723  ;;  %v1266_v56 = vadd.f32 %v1200_v60, %v6428_v9 }
 0x2fc   : > { %v6687_v10 = vmax.f32 %v2046_v18, %v2018_v23  ;;  %v2097_v26 = vmax.f32 %v2075_v45, %v6677_v34  ;;  %v1388_v49 = vpop.permute.xlu1 %1387  ;;  %v2194_v14 = vmul.f32 %v6673_v32, %v2180_v44  ;;  %v1793_v57 = vadd.f32 %v1724_v0, %v1498_v40 }
 0x2fd   : > { %v1497_v7 = vadd.f32 %v1388_v49, %v1264_v8  ;;  %v1499_v0 = vadd.f32 %v1392_v4, %v1266_v56 }
 0x2fe   : > { %v2098_v33 = vmax.f32 %v2076_v13, %v6687_v10  ;;  %v2113_v41 = vmax.f32 %v2097_v26, %v6621_v28  ;;  %v6699_v45 = vadd.f32 %v6685_v42, %v2194_v14  ;;  %v1870_v5 = vrot.slane %v1793_v57, 7 }
 0x2ff   : > { %v1720_v38 = vpop.permute.xlu0 %1719  ;;  %v1966_v40 = vrot.slane %v1793_v57, 1 }
 0x300   : > { %v2114_v11 = vmax.f32 %v2098_v33, %v6628_v6  ;;  %2130 = vst.msk [vmem:[#allocation2 + $0x50] sm:$0xff] %vm2119_vm7, %v2113_v41  ;;  %v1722_v25 = vpop.permute.xlu1 %1721  ;;  %v1791_v16 = vadd.f32 %v1720_v38, %v1496_v20  ;;  %v2222_v19 = vmul.f32 0.044715, %v6699_v45  ;;  %v1924_v60 = vsel %vm1273_vm2, -1e+30, %v1870_v5 }
 0x301   : > { %v1792_v35 = vadd.f32 %v1722_v25, %v1497_v7  ;;  %v2049_v4 = vmax.f32 %v1924_v60, %v1793_v57  ;;  %v8776_v57 = vld [vmem:[#allocation59_spill] sm:$0xff] }
 0x302   : > { %2131 = vst.msk [vmem:[#allocation2 + $0x58] sm:$0xff] %vm2119_vm7, %v2114_v11  ;;  %v1867_v28 = vrot.slane %v1791_v16, 7  ;;  %v1963_v24 = vrot.slane %v1791_v16, 1  ;;  %v2230_v3 = vmul.f32 %v2222_v19, %v6699_v45 }
 0x303   : > { %v1868_v13 = vrot.slane %v1792_v35, 7  ;;  %v1964_v31 = vrot.slane %v1792_v35, 1  ;;  %v1206_v58 = vpop.permute.xlu0 %1205 }
 0x304   : > { %v1923_v6 = vsel %vm1273_vm2, -1e+30, %v1867_v28  ;;  %v1208_v2 = vpop.permute.xlu1 %1207  ;;  %v2238_v27 = vmul.f32 %v2230_v3, %v6699_v45 }
 0x305   : > { %v1869_v18 = vsel %vm1273_vm2, %v1867_v28, %v1868_v13  ;;  %v1965_v44 = vsel %vm1504_vm3, %v1963_v24, %v1964_v31  ;;  %v2047_v39 = vmax.f32 %v1923_v6, %v1791_v16  ;;  %v2019_v26 = vsel %vm1504_vm3, %v1964_v31, -1e+30  ;;  %v6720_v24 = vld [vmem:[#allocation15] sm:$0x3] }
 0x306   : > { %v2048_v23 = vmax.f32 %v1869_v18, %v1792_v35  ;;  %v2246_v9 = vadd.f32 %v2238_v27, %v6699_v45  ;;  %v1267_v6 = vadd.f32 %v8776_v57, %v6639_v43 }
 0x307   : > { %v2079_v61 = vmax.f32 %v2047_v39, %v1965_v44  ;;  %v1394_v49 = vpop.permute.xlu0 %1393 }
 0x308   : > { %v2080_v14 = vmax.f32 %v2048_v23, %v2019_v26  ;;  %v1726_v8 = vpop.permute.xlu1 %1725  ;;  %v2254_v20 = vmul.f32 0.7978846, %v2246_v9  ;;  %v6735_v26 = vrot.slane %v6720_v24, %v8774_v63 }
 0x309   : > { %v1794_v48 = vadd.f32 %v1726_v8, %v1499_v0  ;;  %v2146_v33 = vld [vmem:[#allocation2 + $0x50] ss:$2 sm:$0xff] }
 0x30a   : > { %v2161_v41 = vmul.f32 %v6663_v15, %v2146_v33  ;;  %4939 = vtanh.f32 %v2254_v20 }
 0x30b   : > { %v1871_v7 = vrot.slane %v1794_v48, 7  ;;  %v1967_v38 = vrot.slane %v1794_v48, 1  ;;  %v1400_v11 = vpop.permute.xlu0 %1399 }
 0x30c   : > { %v1398_v25 = vpop.permute.xlu1 %1397  ;;  %v2173_v16 = vadd.f32 %v6667_v21, %v2161_v41  ;;  %v1503_v60 = vadd.f32 %v1400_v11, %v1208_v2 }
 0x30d   : > { %v1872_v35 = vsel %vm1273_vm2, %v1870_v5, %v1871_v7  ;;  %v1968_v19 = vsel %vm1504_vm3, %v1966_v40, %v1967_v38  ;;  %v1470_v28 = vsel %vm1434_vm5, %v1398_v25, 0.0  ;;  %v2020_v18 = vsel %vm1504_vm3, %v1967_v38, -1e+30  ;;  %v5019_v40 = vld [vmem:[%s5809_s22] sm:$0xff] }
 0x30e   : > { %v2050_v13 = vmax.f32 %v1872_v35, %v1794_v48  ;;  %v6722_v31 = vmax.f32 %v2049_v4, %v1968_v19  ;;  %v1502_v3 = vadd.f32 %v1470_v28, %v1206_v58  ;;  %v2181_v56 = vmax.f32 %v2173_v16, 0.0  ;;  %v5021_v4 = vld [vmem:[%s5809_s22 + $0x10] sm:$0xff]  ;;  %v5022_v28 = vld [vmem:[%s5809_s22 + $0x18] sm:$0xff] }
 0x30f   : > { %v1468_v5 = vsel %vm1434_vm5, %v1394_v49, 0.0  ;;  %v1732_v44 = vpop.permute.xlu0 %1731  ;;  %v6744_v7 = vmul.f32 %v5019_v40, %v6735_v26  ;;  %v6752_v25 = vmul.f32 %v5021_v4, %v6735_v26  ;;  %v2214_v40 = vmul.f32 0.5, %v6699_v45 }
 0x310   : > { %v6729_v39 = vmax.f32 %v2050_v13, %v2020_v18  ;;  %v2099_v23 = vmax.f32 %v2079_v61, %v6722_v31  ;;  %v1396_v27 = vpop.permute.xlu1 %1395  ;;  %v1797_v0 = vadd.f32 %v1732_v44, %v1502_v3  ;;  %v2195_v58 = vmul.f32 %v6673_v32, %v2181_v56 }
 0x311   : > { %v1500_v49 = vadd.f32 %v1468_v5, %v1267_v6  ;;  %v6760_v13 = vmul.f32 %v5022_v28, %v6735_v26  ;;  %v6764_v18 = vadd.f32 %v6493_v46, %v6188_v29 }
 0x312   : > { %v2100_v43 = vmax.f32 %v2080_v14, %v6729_v39  ;;  %v2115_v8 = vmax.f32 %v2099_v23, %v6677_v34  ;;  %v1876_v9 = vrot.slane %v1797_v0, 7  ;;  %v2207_v61 = vadd.f32 %v6685_v42, %v2195_v58  ;;  %v5020_v14 = vld [vmem:[%s5809_s22 + $0x8] sm:$0xff] }
 0x313   : > { %v1728_v48 = vpop.permute.xlu0 %1727  ;;  %v6748_v34 = vmul.f32 %v5020_v14, %v6735_v26  ;;  %v1972_v44 = vrot.slane %v1797_v0, 1  ;;  %v6769_v58 = vadd.f32 %v6497_v47, %v6198_v37 }
 0x314   : > { %v2116_v33 = vmax.f32 %v2100_v43, %v6687_v10  ;;  %2132 = vst.msk [vmem:[#allocation2 + $0x60] sm:$0xff] %vm2119_vm7, %v2115_v8  ;;  %v1734_v41 = vpop.permute.xlu1 %1733  ;;  %v1795_v20 = vadd.f32 %v1728_v48, %v1500_v49  ;;  %v2223_v2 = vmul.f32 0.044715, %v2207_v61  ;;  %v4940_v11 = vpop.eup %4939  ;;  %v8777_v10 = vld [vmem:[#allocation60_spill] sm:$0xff]  ;;  %v1926_v35 = vsel %vm1273_vm2, -1e+30, %v1876_v9 }
 0x315   : > { %v1798_v38 = vadd.f32 %v1734_v41, %v1503_v60  ;;  %v1268_v16 = vadd.f32 %v8777_v10, %v6643_v52  ;;  %v2053_v43 = vmax.f32 %v1926_v35, %v1797_v0  ;;  %v2270_v49 = vadd.f32 1.0, %v4940_v11 }
 0x316   : > { %2133 = vst.msk [vmem:[#allocation2 + $0x68] sm:$0xff] %vm2119_vm7, %v2116_v33  ;;  %v1873_v19 = vrot.slane %v1795_v20, 7  ;;  %v2231_v6 = vmul.f32 %v2223_v2, %v2207_v61  ;;  %v1969_v29 = vrot.slane %v1795_v20, 1  ;;  %v6774_v14 = vmul.f32 0.5, %v2207_v61 }
 0x317   : > { %v1877_v3 = vrot.slane %v1798_v38, 7  ;;  %v1973_v56 = vrot.slane %v1798_v38, 1  ;;  %v1154_v57 = vpop.permute.xlu0 %1153  ;;  %v1501_v5 = vadd.f32 %v1396_v27, %v1268_v16  ;;  %v6780_v10 = vmul.f32 %v2270_v49, %v2214_v40 }
 0x318   : > { %v1925_v52 = vsel %vm1273_vm2, -1e+30, %v1873_v19  ;;  %v1730_v23 = vpop.permute.xlu1 %1729  ;;  %v2239_v41 = vmul.f32 %v2231_v6, %v2207_v61  ;;  %v6778_v0 = vadd.f32 %v6186_v17, %v1154_v57  ;;  %v2569_v6 = vld [vmem:[#allocation17] sm:$0x3] }
 0x319   : > { %v1878_v8 = vsel %vm1273_vm2, %v1876_v9, %v1877_v3  ;;  %v1974_v60 = vsel %vm1504_vm3, %v1972_v44, %v1973_v56  ;;  %v1796_v33 = vadd.f32 %v1730_v23, %v1501_v5  ;;  %v2051_v46 = vmax.f32 %v1925_v52, %v1795_v20  ;;  %4725 = vmatprep.subr.msk.bf16.mxu1 %vm951_vm0, %v2569_v6 }
 0x31a   : > { %v2054_v48 = vmax.f32 %v1878_v8, %v1798_v38  ;;  %v2022_v2 = vsel %vm1504_vm3, %v1973_v56, -1e+30  ;;  %v2085_v11 = vmax.f32 %v2053_v43, %v1974_v60  ;;  %v2247_v38 = vadd.f32 %v2239_v41, %v2207_v61  ;;  %v5023_v60 = vld [vmem:[%s5809_s22 + $0x20] sm:$0xff] }
 0x31b   : > { %v1158_v27 = vpop.permute.xlu0 %1157  ;;  %v1874_v37 = vrot.slane %v1796_v33, 7  ;;  %v1970_v47 = vrot.slane %v1796_v33, 1  ;;  %v6790_v61 = vrot.slane %v6720_v24, %v8775_v53  ;;  %v6802_v24 = vsel %vm951_vm0, %v2569_v6, 0 }
 0x31c   : > { %v1156_v9 = vpop.permute.xlu1 %1155  ;;  %v2086_v4 = vmax.f32 %v2054_v48, %v2022_v2  ;;  %v6785_v35 = vadd.f32 %v1158_v27, %v6228_v55  ;;  %v2255_v57 = vmul.f32 0.7978846, %v2247_v38  ;;  %v2578_v48 = vmul.f32 %v5023_v60, %v6735_v26 }
 0x31d   : > { %v2148_v16 = vld [vmem:[#allocation2 + $0x60] ss:$2 sm:$0xff]  ;;  %v1875_v20 = vsel %vm1273_vm2, %v1873_v19, %v1874_v37  ;;  %v1971_v45 = vsel %vm1504_vm3, %v1969_v29, %v1970_v47  ;;  %8778 = vst [vmem:[#allocation49_spill] sm:$0xff] %v6790_v61  ;;  %v2021_v5 = vsel %vm1504_vm3, %v1970_v47, -1e+30  ;;  %v6794_v19 = vadd.f32 %v6192_v30, %v1156_v9 }
 0x31e   : > { %v2162_v28 = vmul.f32 %v6663_v15, %v2148_v16  ;;  %v2052_v3 = vmax.f32 %v1875_v20, %v1796_v33  ;;  %v2083_v56 = vmax.f32 %v2051_v46, %v1971_v45  ;;  %4941 = vtanh.f32 %v2255_v57  ;;  %v5024_v20 = vld [vmem:[%s5809_s22 + $0x28] sm:$0xff] }
 0x31f   : > { %v1338_v17 = vpop.permute.xlu0 %1337  ;;  %v2610_v30 = vadd.f32 %v6790_v61, %v6744_v7  ;;  %v2611_v46 = vadd.f32 %v6790_v61, %v6748_v34  ;;  %v2612_v27 = vadd.f32 %v6790_v61, %v6752_v25  ;;  %v2579_v45 = vmul.f32 %v5024_v20, %v6735_v26  ;;  %v8779_v57 = vld [vmem:[#allocation48_spill] sm:$0xff] }
 0x320   : > { %v1160_v44 = vpop.permute.xlu1 %1159  ;;  %v1433_v55 = vsel %vm1273_vm2, 0.0, %v1338_v17  ;;  %v2174_v52 = vadd.f32 %v6667_v21, %v2162_v28  ;;  %v2084_v23 = vmax.f32 %v2052_v3, %v2021_v5  ;;  %v2101_v43 = vmax.f32 %v2083_v56, %v2085_v11 }
 0x321   : > { %v1440_v8 = vsel %vm1434_vm5, %v1433_v55, 0.0  ;;  %v6814_v40 = vadd.f32 %v1160_v44, %v6238_v59  ;;  %v2674_v47 = vmul.f32 0.044715, %v2610_v30  ;;  %v6825_v9 = vmul.f32 0.5, %v2610_v30  ;;  %v8780_v55 = vld [vmem:[#allocation46_spill] sm:$0xff] }
 0x322   : > { %v2182_v49 = vmax.f32 %v2174_v52, 0.0  ;;  %v2102_v33 = vmax.f32 %v2084_v23, %v2086_v4  ;;  %v2117_v41 = vmax.f32 %v2101_v43, %v6722_v31  ;;  %v6817_v37 = vadd.f32 %v6151_v50, %v1440_v8 }
 0x323   : > { %v1164_v29 = vpop.permute.xlu0 %1163  ;;  %v2675_v25 = vmul.f32 0.044715, %v2611_v46  ;;  %v2706_v11 = vmul.f32 %v2674_v47, %v2610_v30  ;;  %v2613_v4 = vadd.f32 %v6790_v61, %v6760_v13  ;;  %v6834_v38 = vmul.f32 0.5, %v2611_v46 }
 0x324   : > { %v1162_v2 = vpop.permute.xlu1 %1161  ;;  %v2196_v7 = vmul.f32 %v6673_v32, %v2182_v49  ;;  %v2118_v31 = vmax.f32 %v2102_v33, %v6729_v39  ;;  %2134 = vst.msk [vmem:[#allocation2 + $0x70] sm:$0xff] %vm2119_vm7, %v2117_v41  ;;  %v6823_v34 = vadd.f32 %v6232_v36, %v1164_v29  ;;  %v2676_v36 = vmul.f32 0.044715, %v2612_v27 }
 0x325   : > { %v6828_v59 = vadd.f32 %v6226_v54, %v1162_v2  ;;  %v2707_v16 = vmul.f32 %v2675_v25, %v2611_v46  ;;  %v2738_v54 = vmul.f32 %v2706_v11, %v2610_v30  ;;  %v6838_v56 = vmul.f32 0.5, %v2612_v27 }
 0x326   : > { %v2208_v50 = vadd.f32 %v6685_v42, %v2196_v7  ;;  %2135 = vst.msk [vmem:[#allocation2 + $0x78] sm:$0xff] %vm2119_vm7, %v2118_v31  ;;  %v2614_v17 = vadd.f32 %v6790_v61, %v2578_v48  ;;  %v2677_v44 = vmul.f32 0.044715, %v2613_v4  ;;  %v2708_v8 = vmul.f32 %v2676_v36, %v2612_v27 }
 0x327   : > { %v1168_v39 = vpop.permute.xlu0 %1167  ;;  %v2739_v5 = vmul.f32 %v2707_v16, %v2611_v46  ;;  %v2770_v43 = vadd.f32 %v2738_v54, %v2610_v30  ;;  %v6849_v33 = vmul.f32 0.5, %v2613_v4  ;;  %v2615_v48 = vadd.f32 %v6790_v61, %v2579_v45  ;;  %v8781_v30 = vld [vmem:[#allocation47_spill] sm:$0xff] }
 0x328   : > { %v1166_v28 = vpop.permute.xlu1 %1165  ;;  %v2224_v3 = vmul.f32 0.044715, %v2208_v50  ;;  %v6842_v6 = vadd.f32 %v1168_v39, %v8779_v57  ;;  %v6844_v13 = vmul.f32 0.5, %v2208_v50  ;;  %v2709_v41 = vmul.f32 %v2677_v44, %v2613_v4  ;;  %v4942_v29 = vpop.eup %4941  ;;  %v8782_v44 = vld [vmem:[#allocation45_spill] sm:$0xff] }
 0x329   : > { %v6847_v52 = vadd.f32 %v1166_v28, %v8780_v55  ;;  %v2771_v60 = vadd.f32 %v2739_v5, %v2611_v46  ;;  %v2802_v47 = vmul.f32 0.7978846, %v2770_v43  ;;  %v2740_v31 = vmul.f32 %v2708_v8, %v2612_v27 }
 0x32a   : > { %v2232_v23 = vmul.f32 %v2224_v3, %v2208_v50  ;;  %v2678_v25 = vmul.f32 0.044715, %v2614_v17  ;;  %v2271_v11 = vadd.f32 1.0, %v4942_v29  ;;  %v2741_v16 = vmul.f32 %v2709_v41, %v2613_v4 }
 0x32b   : > { %v1172_v49 = vpop.permute.xlu0 %1171  ;;  %v2803_v39 = vmul.f32 0.7978846, %v2771_v60  ;;  %v6852_v20 = vmul.f32 0.5, %v2614_v17  ;;  %4943 = vtanh.f32 %v2802_v47  ;;  %v2772_v3 = vadd.f32 %v2740_v31, %v2612_v27  ;;  %v5025_v47 = vld [vmem:[%s5809_s22 + $0x30] sm:$0xff] }
 0x32c   : > { %v1170_v2 = vpop.permute.xlu1 %1169  ;;  %v2240_v7 = vmul.f32 %v2232_v23, %v2208_v50  ;;  %v6855_v36 = vadd.f32 %v8781_v30, %v1172_v49  ;;  %v2279_v45 = vmul.f32 %v2271_v11, %v6774_v14  ;;  %v2773_v5 = vadd.f32 %v2741_v16, %v2613_v4  ;;  %v5026_v16 = vld [vmem:[%s5809_s22 + $0x38] sm:$0xff] }
 0x32d   : > { %v2150_v46 = vld [vmem:[#allocation2 + $0x70] ss:$2 sm:$0xff]  ;;  %4945 = vtanh.f32 %v2803_v39  ;;  %v6860_v55 = vadd.f32 %v8782_v44, %v1170_v2  ;;  %v2804_v8 = vmul.f32 0.7978846, %v2772_v3  ;;  %v2710_v49 = vmul.f32 %v2678_v25, %v2614_v17 }
 0x32e   : > { %v2248_v28 = vadd.f32 %v2240_v7, %v2208_v50  ;;  %v2163_v57 = vmul.f32 %v6663_v15, %v2150_v46  ;;  %v2284_v60 = vpack.c.bf16 %v2279_v45, %v6780_v10  ;;  %v6866_v50 = vmul.f32 0.5, %v2615_v48 }
 0x32f   : > { %v1346_v54 = vpop.permute.xlu0 %1345  ;;  %v2805_v41 = vmul.f32 0.7978846, %v2773_v5  ;;  %v2679_v29 = vmul.f32 0.044715, %v2615_v48  ;;  %v2742_v10 = vmul.f32 %v2710_v49, %v2614_v17  ;;  %v2580_v31 = vmul.f32 %v5025_v47, %v6735_v26 }
 0x330   : > { %v1342_v23 = vpop.permute.xlu1 %1341  ;;  %v2256_v43 = vmul.f32 0.7978846, %v2248_v28  ;;  %v1444_v27 = vsel %vm1434_vm5, %v1346_v54, 0.0  ;;  %v2175_v14 = vadd.f32 %v6667_v21, %v2163_v57  ;;  %4682 = vmatprep.mubr.msk.bf16.mxu1 %vm2119_vm7, %v2284_v60  ;;  %v2581_v30 = vmul.f32 %v5026_v16, %v6735_v26 }
 0x331   : > { %v1442_v4 = vsel %vm1434_vm5, %v1342_v23, 0.0  ;;  %v6874_v25 = vadd.f32 %v1444_v27, %v6778_v0  ;;  %v2711_v39 = vmul.f32 %v2679_v29, %v2615_v48  ;;  %v2774_v3 = vadd.f32 %v2742_v10, %v2614_v17 }
 0x332   : > { %4947 = vtanh.f32 %v2256_v43  ;;  %v2183_v7 = vmax.f32 %v2175_v14, 0.0  ;;  %v2616_v45 = vadd.f32 %v6790_v61, %v2580_v31  ;;  %v6883_v54 = vadd.f32 %v1442_v4, %v6764_v18  ;;  %v5027_v4 = vld [vmem:[%s5809_s22 + $0x40] sm:$0xff] }
 0x333   : > { %v1340_v2 = vpop.permute.xlu0 %1339  ;;  %4949 = vtanh.f32 %v2804_v8  ;;  %v2743_v57 = vmul.f32 %v2711_v39, %v2615_v48  ;;  %v2617_v5 = vadd.f32 %v6790_v61, %v2581_v30  ;;  %v2806_v8 = vmul.f32 0.7978846, %v2774_v3 }
 0x334   : > { %v1350_v11 = vpop.permute.xlu1 %1349  ;;  %4951 = vtanh.f32 %v2805_v41  ;;  %v2197_v28 = vmul.f32 %v6673_v32, %v2183_v7  ;;  %v6886_v0 = vadd.f32 %v6157_v12, %v1340_v2  ;;  %v2680_v17 = vmul.f32 0.044715, %v2616_v45 }
 0x335   : > { %v1446_v46 = vsel %vm1434_vm5, %v1350_v11, 0.0  ;;  %v4944_v49 = vpop.eup %4943  ;;  %v2775_v27 = vadd.f32 %v2743_v57, %v2615_v48  ;;  %v6893_v14 = vmul.f32 0.5, %v2616_v45  ;;  %v2681_v18 = vmul.f32 0.044715, %v2617_v5 }
 0x336   : > { %v6890_v44 = vadd.f32 %v1446_v46, %v6785_v35  ;;  %v2209_v43 = vadd.f32 %v6685_v42, %v2197_v28  ;;  %v2582_v12 = vmul.f32 %v5027_v4, %v6735_v26  ;;  %v2866_v2 = vadd.f32 1.0, %v4944_v49  ;;  %v5028_v49 = vld [vmem:[%s5809_s22 + $0x48] sm:$0xff] }
 0x337   : > { %v1348_v23 = vpop.permute.xlu0 %1347  ;;  %v4946_v41 = vpop.eup %4945  ;;  %v6900_v7 = vmul.f32 0.5, %v2617_v5  ;;  %v2807_v47 = vmul.f32 0.7978846, %v2775_v27  ;;  %4953 = vtanh.f32 %v2806_v8  ;;  %v2712_v31 = vmul.f32 %v2680_v17, %v2616_v45 }
 0x338   : > { %v1344_v60 = vpop.permute.xlu1 %1343  ;;  %v6898_v29 = vadd.f32 %v1348_v23, %v6794_v19  ;;  %v2225_v35 = vmul.f32 0.044715, %v2209_v43  ;;  %v2867_v10 = vadd.f32 1.0, %v4946_v41  ;;  %v6906_v16 = vmul.f32 %v2866_v2, %v6825_v9 }
 0x339   : > { %v6903_v48 = vadd.f32 %v1344_v60, %v6769_v58  ;;  %v2713_v30 = vmul.f32 %v2681_v18, %v2617_v5  ;;  %v6908_v28 = vmul.f32 0.5, %v2209_v43  ;;  %4955 = vtanh.f32 %v2807_v47 }
 0x33a   : > { %v2233_v39 = vmul.f32 %v2225_v35, %v2209_v43  ;;  %v6911_v3 = vmul.f32 %v2867_v10, %v6834_v38  ;;  %v2744_v57 = vmul.f32 %v2712_v31, %v2616_v45  ;;  %v2583_v9 = vmul.f32 %v5028_v49, %v6735_v26 }
 0x33b   : > { %v1354_v11 = vpop.permute.xlu0 %1353  ;;  %v2745_v4 = vmul.f32 %v2713_v30, %v2617_v5  ;;  %v2618_v47 = vadd.f32 %v6790_v61, %v2582_v12  ;;  %vm4351_vm0 = vcmask 130048  }
 0x33c   : > { %v4948_v19 = vpop.eup %4947  ;;  %v1352_v46 = vpop.permute.xlu1 %1351  ;;  %v1448_v58 = vsel %vm1434_vm5, %v1354_v11, 0.0  ;;  %v2241_v8 = vmul.f32 %v2233_v39, %v2209_v43  ;;  %v2776_v41 = vadd.f32 %v2744_v57, %v2616_v45 }
 0x33d   : > { %v4950_v23 = vpop.eup %4949  ;;  %v2272_v17 = vadd.f32 1.0, %v4948_v19  ;;  %v6920_v38 = vadd.f32 %v1352_v46, %v6814_v40  ;;  %v2777_v19 = vadd.f32 %v2745_v4, %v2617_v5  ;;  %v6929_v30 = vadd.f32 %v1448_v58, %v6828_v59 }
 0x33e   : > { %v4952_v60 = vpop.eup %4951  ;;  %v2868_v18 = vadd.f32 1.0, %v4950_v23  ;;  %v2249_v2 = vadd.f32 %v2241_v8, %v2209_v43  ;;  %v2808_v49 = vmul.f32 0.7978846, %v2776_v41  ;;  %v2682_v23 = vmul.f32 0.044715, %v2618_v47 }
 0x33f   : > { %v1362_v35 = vpop.permute.xlu0 %1361  ;;  %v2869_v10 = vadd.f32 1.0, %v4952_v60  ;;  %v6937_v12 = vmul.f32 %v2272_v17, %v6844_v13  ;;  %v2809_v46 = vmul.f32 0.7978846, %v2777_v19  ;;  %v6948_v8 = vmul.f32 0.5, %v2618_v47 }
 0x340   : > { %v1358_v31 = vpop.permute.xlu1 %1357  ;;  %v1452_v11 = vsel %vm1434_vm5, %v1362_v35, 0.0  ;;  %v6926_v39 = vmul.f32 %v2868_v18, %v6838_v56  ;;  %v2257_v45 = vmul.f32 0.7978846, %v2249_v2  ;;  %4957 = vtanh.f32 %v2808_v49  ;;  %v5029_v18 = vld [vmem:[%s5809_s22 + $0x50] sm:$0xff] }
 0x341   : > { %v1450_v40 = vsel %vm1434_vm5, %v1358_v31, 0.0  ;;  %v6934_v43 = vmul.f32 %v2869_v10, %v6849_v33  ;;  %v2619_v56 = vadd.f32 %v6790_v61, %v2583_v9  ;;  %v6941_v5 = vadd.f32 %v1452_v11, %v6860_v55  ;;  %v4954_v33 = vpop.eup %4953  ;;  %v5031_v31 = vld [vmem:[%s5809_s22 + $0x60] sm:$0xff] }
 0x342   : > { %4959 = vtanh.f32 %v2257_v45  ;;  %v6946_v13 = vadd.f32 %v1450_v40, %v6847_v52  ;;  %v2870_v9 = vadd.f32 1.0, %v4954_v33  ;;  %v2714_v60 = vmul.f32 %v2682_v23, %v2618_v47  ;;  %v5030_v52 = vld [vmem:[%s5809_s22 + $0x58] sm:$0xff] }
 0x343   : > { %v1360_v59 = vpop.permute.xlu0 %1359  ;;  %4961 = vtanh.f32 %v2809_v46  ;;  %v2683_v17 = vmul.f32 0.044715, %v2619_v56  ;;  %v2584_v4 = vmul.f32 %v5029_v18, %v6735_v26  ;;  %v4956_v41 = vpop.eup %4955  ;;  %v6955_v35 = vmul.f32 0.5, %v2619_v56 }
 0x344   : > { %v1356_v58 = vpop.permute.xlu1 %1355  ;;  %v6951_v55 = vadd.f32 %v1360_v59, %v6842_v6  ;;  %v2585_v10 = vmul.f32 %v5030_v52, %v6735_v26  ;;  %v2586_v11 = vmul.f32 %v5031_v31, %v6735_v26  ;;  %v2871_v49 = vadd.f32 1.0, %v4956_v41 }
 0x345   : > { %v2715_v2 = vmul.f32 %v2683_v17, %v2619_v56  ;;  %v6962_v6 = vmul.f32 %v2870_v9, %v6852_v20  ;;  %v2746_v40 = vmul.f32 %v2714_v60, %v2618_v47  ;;  %v6965_v45 = vadd.f32 %v6790_v61, %v2584_v4  ;;  %v5032_v17 = vld [vmem:[%s5809_s22 + $0x68] sm:$0xff] }
 0x346   : > { %v6969_v33 = vadd.f32 %v6790_v61, %v2585_v10  ;;  %v2587_v18 = vmul.f32 %v5032_v17, %v6735_v26  ;;  %v6974_v52 = vadd.f32 %v1356_v58, %v6823_v34  ;;  %v6977_v20 = vmul.f32 %v2871_v49, %v6866_v50 }
 0x347   : > { %v1672_v19 = vpop.permute.xlu0 %1671  ;;  %v2747_v23 = vmul.f32 %v2715_v2, %v2619_v56  ;;  %v2778_v9 = vadd.f32 %v2746_v40, %v2618_v47  ;;  %v6980_v60 = vadd.f32 %v6790_v61, %v2586_v11  ;;  %v2684_v34 = vmul.f32 0.044715, %v6965_v45 }
 0x348   : > { %v1364_v46 = vpop.permute.xlu1 %1363  ;;  %v1767_v59 = vadd.f32 %v1672_v19, %v6817_v37  ;;  %v2685_v50 = vmul.f32 0.044715, %v6969_v33  ;;  %v6992_v40 = vadd.f32 %v6790_v61, %v2587_v18 }
 0x349   : > { %v6983_v4 = vadd.f32 %v1364_v46, %v6855_v36  ;;  %v2779_v2 = vadd.f32 %v2747_v23, %v2619_v56  ;;  %v2810_v19 = vmul.f32 0.7978846, %v2778_v9 }
 0x34a   : > { %v1831_v37 = vrot.slane %v1767_v59, 7  ;;  %v1927_v41 = vrot.slane %v1767_v59, 1  ;;  %v4958_v58 = vpop.eup %4957 }
 0x34b   : > { %v1676_v10 = vpop.permute.xlu0 %1675  ;;  %v2811_v36 = vmul.f32 0.7978846, %v2779_v2  ;;  %v2872_v17 = vadd.f32 1.0, %v4958_v58  ;;  %4963 = vtanh.f32 %v2810_v19 }
 0x34c   : > { %v1911_v47 = vsel %vm1273_vm2, -1e+30, %v1831_v37  ;;  %v1674_v11 = vpop.permute.xlu1 %1673  ;;  %v1769_v49 = vadd.f32 %v1676_v10, %v6883_v54  ;;  %v4960_v56 = vpop.eup %4959  ;;  %v2716_v10 = vmul.f32 %v2684_v34, %v6965_v45 }
 0x34d   : > { %v2023_v46 = vmax.f32 %v1911_v47, %v1767_v59  ;;  %v1768_v23 = vadd.f32 %v1674_v11, %v6886_v0  ;;  %v4962_v9 = vpop.eup %4961  ;;  %v2273_v27 = vadd.f32 1.0, %v4960_v56  ;;  %4965 = vtanh.f32 %v2811_v36 }
 0x34e   : > { %v1834_v31 = vrot.slane %v1769_v49, 7  ;;  %v1930_v57 = vrot.slane %v1769_v49, 1  ;;  %v2873_v1 = vadd.f32 1.0, %v4962_v9  ;;  %v6996_v54 = vmul.f32 %v2872_v17, %v6893_v14 }
 0x34f   : > { %v1832_v53 = vrot.slane %v1768_v23, 7  ;;  %v1928_v63 = vrot.slane %v1768_v23, 1  ;;  %v1680_v22 = vpop.permute.xlu0 %1679  ;;  %v2281_v0 = vmul.f32 %v2273_v27, %v6908_v28  ;;  %v7011_v28 = vmul.f32 %v2685_v50, %v6969_v33 }
 0x350   : > { %v1912_v18 = vsel %vm1273_vm2, -1e+30, %v1834_v31  ;;  %v1678_v2 = vpop.permute.xlu1 %1677  ;;  %v1771_v59 = vadd.f32 %v1680_v22, %v6874_v25  ;;  %v7008_v25 = vmul.f32 %v2873_v1, %v6900_v7 }
 0x351   : > { %v1833_v19 = vsel %vm1273_vm2, %v1831_v37, %v1832_v53  ;;  %v1929_v58 = vsel %vm1504_vm3, %v1927_v41, %v1928_v63  ;;  %v2007_v47 = vsel %vm1504_vm3, %v1928_v63, -1e+30  ;;  %v2025_v11 = vmax.f32 %v1912_v18, %v1769_v49 }
 0x352   : > { %v2024_v36 = vmax.f32 %v1833_v19, %v1768_v23  ;;  %v2055_v56 = vmax.f32 %v2023_v46, %v1929_v58  ;;  %v1770_v14 = vadd.f32 %v1678_v2, %v6903_v48  ;;  %v1837_v17 = vrot.slane %v1771_v59, 7 }
 0x353   : > { %v1933_v9 = vrot.slane %v1771_v59, 1  ;;  %v2285_v61 = vpack.c.bf16 %v2281_v0, %v6937_v12  ;;  %v1684_v22 = vpop.permute.xlu0 %1683  ;;  %v2933_v1 = vpack.c.bf16 %v7008_v25, %v6996_v54  ;;  %v8783_v46 = vpack.c.bf16 %v6911_v3, %v6906_v16 }
 0x354   : > { %v2056_v53 = vmax.f32 %v2024_v36, %v2007_v47  ;;  %v1835_v27 = vrot.slane %v1770_v14, 7  ;;  %v1931_v37 = vrot.slane %v1770_v14, 1  ;;  %v1913_v63 = vsel %vm1273_vm2, -1e+30, %v1837_v17  ;;  %v1682_v41 = vpop.permute.xlu1 %1681 }
 0x355   : > { %v2027_v34 = vmax.f32 %v1913_v63, %v1771_v59  ;;  %4683 = vmatmul.mubr.msk.bf16.vlgmr.msra.gmra.mrb[0].mxu1 %vm2119_vm7, %v2285_v61  ;;  %v1772_v48 = vadd.f32 %v1682_v41, %v6898_v29  ;;  %v1773_v12 = vadd.f32 %v1684_v22, %v6890_v44  ;;  %v7028_v61 = vmul.f32 %v2716_v10, %v6965_v45  ;;  %v4964_v44 = vpop.eup %4963 }
 0x356   : > { %v1836_v7 = vsel %vm1273_vm2, %v1834_v31, %v1835_v27  ;;  %v1932_v50 = vsel %vm1504_vm3, %v1930_v57, %v1931_v37  ;;  %v2008_v49 = vsel %vm1504_vm3, %v1931_v37, -1e+30  ;;  %4687 = vmatpush3.bf16.msra.mxu1 %v6802_v24  ;;  %4688 = vmatprep.mubr.msk.bf16.mxu1 %vm902_vm1, %v8783_v46  ;;  %v2874_v58 = vadd.f32 1.0, %v4964_v44 }
 0x357   : > { %v2026_v29 = vmax.f32 %v1836_v7, %v1770_v14  ;;  %v7030_v23 = vmax.f32 %v2025_v11, %v1932_v50  ;;  %v1838_v18 = vrot.slane %v1772_v48, 7  ;;  %v1934_v31 = vrot.slane %v1772_v48, 1  ;;  %v1688_v2 = vpop.permute.xlu0 %1687  ;;  %v4966_v57 = vpop.eup %4965 }
 0x358   : > { %v1840_v59 = vrot.slane %v1773_v12, 7  ;;  %v1936_v0 = vrot.slane %v1773_v12, 1  ;;  %v1686_v19 = vpop.permute.xlu1 %1685  ;;  %v1775_v24 = vadd.f32 %v1688_v2, %v6929_v30 }
 0x359   : > { %v2058_v16 = vmax.f32 %v2026_v29, %v2008_v49  ;;  %v2087_v3 = vmax.f32 %v2055_v56, %v7030_v23  ;;  %v1839_v10 = vsel %vm1273_vm2, %v1837_v17, %v1838_v18  ;;  %v1935_v47 = vsel %vm1504_vm3, %v1933_v9, %v1934_v31 }
 0x35a   : > { %v2009_v11 = vsel %vm1504_vm3, %v1934_v31, -1e+30  ;;  %v2028_v36 = vmax.f32 %v1839_v10, %v1772_v48  ;;  %v2059_v14 = vmax.f32 %v2027_v34, %v1935_v47  ;;  %v1914_v22 = vsel %vm1273_vm2, -1e+30, %v1840_v59 }
 0x35b   : > { %v2088_v27 = vmax.f32 %v2056_v53, %v2058_v16  ;;  %v2103_v37 = vmax.f32 %v2087_v3, -1e+30  ;;  %v2029_v63 = vmax.f32 %v1914_v22, %v1773_v12  ;;  %v1774_v41 = vadd.f32 %v1686_v19, %v6920_v38  ;;  %v1692_v30 = vpop.permute.xlu0 %1691 }
 0x35c   : > { %v2060_v7 = vmax.f32 %v2028_v36, %v2009_v11  ;;  %v1843_v50 = vrot.slane %v1775_v24, 7  ;;  %v1939_v49 = vrot.slane %v1775_v24, 1  ;;  %v1690_v56 = vpop.permute.xlu1 %1689  ;;  %v1777_v17 = vadd.f32 %v1692_v30, %v6946_v13 }
 0x35d   : > { %v2104_v46 = vmax.f32 %v2088_v27, -1e+30  ;;  %2120 = vst.msk [vmem:[#allocation2] sm:$0xff] %vm2119_vm7, %v2103_v37  ;;  %v1841_v9 = vrot.slane %v1774_v41, 7  ;;  %v1937_v48 = vrot.slane %v1774_v41, 1  ;;  %v1776_v34 = vadd.f32 %v1690_v56, %v6974_v52 }
 0x35e   : > { %v8784_v53 = vpack.c.bf16 %v6934_v43, %v6926_v39  ;;  %v1915_v38 = vsel %vm1273_vm2, -1e+30, %v1843_v50  ;;  %v1846_v12 = vrot.slane %v1777_v17, 7  ;;  %v1942_v44 = vrot.slane %v1777_v17, 1 }
 0x35f   : > { %v8785_v29 = vpack.c.bf16 %v6977_v20, %v6962_v6  ;;  %v2875_v13 = vadd.f32 1.0, %v4966_v57  ;;  %2121 = vst.msk [vmem:[#allocation2 + $0x8] sm:$0xff] %vm2119_vm7, %v2104_v46  ;;  %v1842_v18 = vsel %vm1273_vm2, %v1840_v59, %v1841_v9  ;;  %v1938_v52 = vsel %vm1504_vm3, %v1936_v0, %v1937_v48  ;;  %v1696_v31 = vpop.permute.xlu0 %1695 }
 0x360   : > { %4689 = vmatmul.mubr.msk.bf16.vlgmr.msra.gmra.mrb[4].mxu1 %vm902_vm1, %v8784_v53  ;;  %v2010_v39 = vsel %vm1504_vm3, %v1937_v48, -1e+30  ;;  %v2031_v43 = vmax.f32 %v1915_v38, %v1775_v24  ;;  %v2030_v2 = vmax.f32 %v1842_v18, %v1774_v41  ;;  %v2061_v19 = vmax.f32 %v2029_v63, %v1938_v52  ;;  %v1694_v47 = vpop.permute.xlu1 %1693 }
 0x361   : > { %4692 = vmatprep.mubr.msk.bf16.mxu1 %vm902_vm1, %v8785_v29  ;;  %v1844_v3 = vrot.slane %v1776_v34, 7  ;;  %v1940_v10 = vrot.slane %v1776_v34, 1  ;;  %v1916_v6 = vsel %vm1273_vm2, -1e+30, %v1846_v12  ;;  %v1778_v20 = vadd.f32 %v1694_v47, %v6951_v55 }
 0x362   : > { %v1779_v57 = vadd.f32 %v1696_v31, %v6941_v5  ;;  %v2906_v11 = vmul.f32 %v2874_v58, %v6948_v8  ;;  %v2062_v59 = vmax.f32 %v2030_v2, %v2010_v39  ;;  %v2089_v36 = vmax.f32 %v2059_v14, %v2061_v19 }
 0x363   : > { %v1845_v0 = vsel %vm1273_vm2, %v1843_v50, %v1844_v3  ;;  %v1941_v24 = vsel %vm1504_vm3, %v1939_v49, %v1940_v10  ;;  %v2011_v22 = vsel %vm1504_vm3, %v1940_v10, -1e+30  ;;  %v2033_v63 = vmax.f32 %v1916_v6, %v1777_v17 }
 0x364   : > { %v2032_v27 = vmax.f32 %v1845_v0, %v1776_v34  ;;  %v2063_v37 = vmax.f32 %v2031_v43, %v1941_v24  ;;  %v2090_v41 = vmax.f32 %v2060_v7, %v2062_v59  ;;  %v2105_v30 = vmax.f32 %v2089_v36, %v7030_v23  ;;  %v1698_v46 = vpop.permute.xlu1 %1697  ;;  %v5033_v24 = vld [vmem:[%s5809_s22 + $0x70] sm:$0xff] }
 0x365   : > { %v1847_v56 = vrot.slane %v1778_v20, 7  ;;  %v1943_v55 = vrot.slane %v1778_v20, 1  ;;  %v1849_v9 = vrot.slane %v1779_v57, 7  ;;  %v1945_v8 = vrot.slane %v1779_v57, 1 }
 0x366   : > { %v2064_v5 = vmax.f32 %v2032_v27, %v2011_v22  ;;  %v1780_v58 = vadd.f32 %v1698_v46, %v6983_v4  ;;  %v2106_v14 = vmax.f32 %v2090_v41, %v2058_v16  ;;  %2122 = vst.msk [vmem:[#allocation2 + $0x10] sm:$0xff] %vm2119_vm7, %v2105_v30  ;;  %v2136_v49 = vld [vmem:[#allocation2] ss:$2 sm:$0xff]  ;;  %v2907_v16 = vmul.f32 %v2875_v13, %v6955_v35  ;;  %v5034_v41 = vld [vmem:[%s5809_s22 + $0x78] sm:$0xff] }
 0x367   : > { %v1848_v7 = vsel %vm1273_vm2, %v1846_v12, %v1847_v56  ;;  %v1944_v23 = vsel %vm1504_vm3, %v1942_v44, %v1943_v55  ;;  %v2012_v50 = vsel %vm1504_vm3, %v1943_v55, -1e+30  ;;  %v1917_v34 = vsel %vm1273_vm2, -1e+30, %v1849_v9  ;;  %v8786_v46 = vld [vmem:[#allocation49_spill] sm:$0xff] }
 0x368   : > { %4693 = vmatmul.mubr.msk.bf16.gmra.mrb[8].mxu1 %vm902_vm1, %v2933_v1  ;;  %v2034_v17 = vmax.f32 %v1848_v7, %v1778_v20  ;;  %v2065_v48 = vmax.f32 %v2033_v63, %v1944_v23  ;;  %v1850_v4 = vrot.slane %v1780_v58, 7  ;;  %2123 = vst.msk [vmem:[#allocation2 + $0x18] sm:$0xff] %vm2119_vm7, %v2106_v14  ;;  %v2035_v54 = vmax.f32 %v1917_v34, %v1779_v57  ;;  %v5035_v34 = vld [vmem:[%s5809_s22 + $0x80] sm:$0xff] }
 0x369   : > { %v1946_v25 = vrot.slane %v1780_v58, 1  ;;  %v2156_v1 = vmul.f32 %v6663_v15, %v2136_v49  ;;  %v2749_v44 = vmul.f32 %v7011_v28, %v6969_v33  ;;  %v2934_v3 = vpack.c.bf16 %v2907_v16, %v2906_v11 }
 0x36a   : > { %v2066_v53 = vmax.f32 %v2034_v17, %v2012_v50  ;;  %v2091_v38 = vmax.f32 %v2063_v37, %v2065_v48  ;;  %v1851_v12 = vsel %vm1273_vm2, %v1849_v9, %v1850_v4  ;;  %v2780_v13 = vadd.f32 %v7028_v61, %v6965_v45 }
 0x36b   : > { %v1947_v29 = vsel %vm1504_vm3, %v1945_v8, %v1946_v25  ;;  %v2013_v18 = vsel %vm1504_vm3, %v1946_v25, -1e+30  ;;  %v2036_v52 = vmax.f32 %v1851_v12, %v1780_v58  ;;  %v2168_v39 = vadd.f32 %v6667_v21, %v2156_v1  ;;  %4696 = vmatprep.mubr.msk.bf16.mxu1 %vm902_vm1, %v2934_v3 }
 0x36c   : > { %v2092_v43 = vmax.f32 %v2064_v5, %v2066_v53  ;;  %v2107_v31 = vmax.f32 %v2091_v38, %v2061_v19  ;;  %v2067_v2 = vmax.f32 %v2035_v54, %v1947_v29  ;;  %v2781_v47 = vadd.f32 %v2749_v44, %v6969_v33 }
 0x36d   : > { %v2068_v10 = vmax.f32 %v2036_v52, %v2013_v18  ;;  %v2176_v35 = vmax.f32 %v2168_v39, 0.0  ;;  %v2812_v57 = vmul.f32 0.7978846, %v2780_v13  ;;  %v2686_v0 = vmul.f32 0.044715, %v6980_v60 }
 0x36e   : > { %v2108_v28 = vmax.f32 %v2092_v43, %v2062_v59  ;;  %2124 = vst.msk [vmem:[#allocation2 + $0x20] sm:$0xff] %vm2119_vm7, %v2107_v31  ;;  %v2093_v6 = vmax.f32 %v2067_v2, %v6556_v51  ;;  %v2813_v11 = vmul.f32 0.7978846, %v2781_v47  ;;  %v2687_v59 = vmul.f32 0.044715, %v6992_v40 }
 0x36f   : > { %v2094_v20 = vmax.f32 %v2068_v10, %v6561_v62  ;;  %v2190_v19 = vmul.f32 %v6673_v32, %v2176_v35  ;;  %v2138_v61 = vld [vmem:[#allocation2 + $0x10] ss:$2 sm:$0xff]  ;;  %v2588_v51 = vmul.f32 %v5033_v24, %v6735_v26  ;;  %4967 = vtanh.f32 %v2812_v57 }
 0x370   : > { %2125 = vst.msk [vmem:[#allocation2 + $0x28] sm:$0xff] %vm2119_vm7, %v2108_v28  ;;  %v2109_v36 = vmax.f32 %v2093_v6, %v2065_v48  ;;  %v2157_v27 = vmul.f32 %v6663_v15, %v2138_v61  ;;  %4969 = vtanh.f32 %v2813_v11  ;;  %v2718_v37 = vmul.f32 %v2686_v0, %v6980_v60 }
 0x371   : > { %v2110_v22 = vmax.f32 %v2094_v20, %v2066_v53  ;;  %v7097_v62 = vadd.f32 %v6685_v42, %v2190_v19  ;;  %v2719_v63 = vmul.f32 %v2687_v59, %v6992_v40  ;;  %v2589_v30 = vmul.f32 %v5034_v41, %v6735_v26  ;;  %v5036_v53 = vld [vmem:[%s5809_s22 + $0x88] sm:$0xff] }
 0x372   : > { %2126 = vst.msk [vmem:[#allocation2 + $0x30] sm:$0xff] %vm2119_vm7, %v2109_v36  ;;  %v2169_v56 = vadd.f32 %v6667_v21, %v2157_v27  ;;  %v7108_v5 = vadd.f32 %v8786_v46, %v2588_v51  ;;  %v2750_v9 = vmul.f32 %v2718_v37, %v6980_v60  ;;  %v2652_v23 = vmul.f32 0.5, %v6965_v45 }
 0x373   : > { %2127 = vst.msk [vmem:[#allocation2 + $0x38] sm:$0xff] %vm2119_vm7, %v2110_v22  ;;  %v2218_v55 = vmul.f32 0.044715, %v7097_v62  ;;  %v2751_v8 = vmul.f32 %v2719_v63, %v6992_v40  ;;  %v7113_v58 = vadd.f32 %v8786_v46, %v2589_v30  ;;  %v2590_v4 = vmul.f32 %v5035_v34, %v6735_v26  ;;  %v5038_v34 = vld [vmem:[%s5809_s22 + $0x98] sm:$0xff] }
 0x374   : > { %v2177_v14 = vmax.f32 %v2169_v56, 0.0  ;;  %v2688_v50 = vmul.f32 0.044715, %v7108_v5  ;;  %v2782_v49 = vadd.f32 %v2750_v9, %v6980_v60  ;;  %v2591_v45 = vmul.f32 %v5036_v53, %v6735_v26 }
 0x375   : > { %v2226_v7 = vmul.f32 %v2218_v55, %v7097_v62  ;;  %v2783_v17 = vadd.f32 %v2751_v8, %v6992_v40  ;;  %v2689_v48 = vmul.f32 0.044715, %v7113_v58  ;;  %v2653_v39 = vmul.f32 0.5, %v6969_v33 }
 0x376   : > { %v2191_v54 = vmul.f32 %v6673_v32, %v2177_v14  ;;  %v2720_v16 = vmul.f32 %v2688_v50, %v7108_v5  ;;  %v2814_v12 = vmul.f32 0.7978846, %v2782_v49  ;;  %v7139_v10 = vadd.f32 %v8786_v46, %v2590_v4 }
 0x377   : > { %v2234_v25 = vmul.f32 %v2226_v7, %v7097_v62  ;;  %v2140_v1 = vld [vmem:[#allocation2 + $0x20] ss:$2 sm:$0xff]  ;;  %v2815_v44 = vmul.f32 0.7978846, %v2783_v17  ;;  %v2721_v29 = vmul.f32 %v2689_v48, %v7113_v58  ;;  %v7144_v6 = vadd.f32 %v8786_v46, %v2591_v45 }
 0x378   : > { %v2158_v38 = vmul.f32 %v6663_v15, %v2140_v1  ;;  %v7131_v18 = vadd.f32 %v6685_v42, %v2191_v54  ;;  %v2752_v43 = vmul.f32 %v2720_v16, %v7108_v5  ;;  %4971 = vtanh.f32 %v2814_v12 }
 0x379   : > { %v2242_v52 = vadd.f32 %v2234_v25, %v7097_v62  ;;  %v2753_v3 = vmul.f32 %v2721_v29, %v7113_v58  ;;  %v4968_v35 = vpop.eup %4967  ;;  %4973 = vtanh.f32 %v2815_v44  ;;  %v2690_v56 = vmul.f32 0.044715, %v7139_v10 }
 0x37a   : > { %v2142_v31 = vld [vmem:[#allocation2 + $0x30] ss:$2 sm:$0xff]  ;;  %v2170_v2 = vadd.f32 %v6667_v21, %v2158_v38  ;;  %v2219_v13 = vmul.f32 0.044715, %v7131_v18  ;;  %v4970_v33 = vpop.eup %4969  ;;  %v2876_v19 = vadd.f32 1.0, %v4968_v35  ;;  %v2784_v57 = vadd.f32 %v2752_v43, %v7108_v5 }
 0x37b   : > { %v2250_v47 = vmul.f32 0.7978846, %v2242_v52  ;;  %v2159_v28 = vmul.f32 %v6663_v15, %v2142_v31  ;;  %v2877_v61 = vadd.f32 1.0, %v4970_v33  ;;  %v2785_v15 = vadd.f32 %v2753_v3, %v7113_v58 }
 0x37c   : > { %v2178_v20 = vmax.f32 %v2170_v2, 0.0  ;;  %v2227_v11 = vmul.f32 %v2219_v13, %v7131_v18  ;;  %v2908_v59 = vmul.f32 %v2876_v19, %v2652_v23  ;;  %v2816_v24 = vmul.f32 0.7978846, %v2784_v57 }
 0x37d   : > { %4975 = vtanh.f32 %v2250_v47  ;;  %v2171_v36 = vadd.f32 %v6667_v21, %v2159_v28  ;;  %v2909_v27 = vmul.f32 %v2877_v61, %v2653_v39  ;;  %v2817_v63 = vmul.f32 0.7978846, %v2785_v15 }
 0x37e   : > { %v2192_v0 = vmul.f32 %v6673_v32, %v2178_v20  ;;  %v2235_v51 = vmul.f32 %v2227_v11, %v7131_v18  ;;  %4977 = vtanh.f32 %v2816_v24  ;;  %v2654_v9 = vmul.f32 0.5, %v6980_v60 }
 0x37f   : > { %v2179_v22 = vmax.f32 %v2171_v36, 0.0  ;;  %v2935_v30 = vpack.c.bf16 %v2909_v27, %v2908_v59  ;;  %4979 = vtanh.f32 %v2817_v63  ;;  %v2691_v8 = vmul.f32 0.044715, %v7144_v6  ;;  %v5039_v27 = vld [vmem:[%s5809_s22 + $0xa0] sm:$0xff] }
 0x380   : > { %v7153_v37 = vadd.f32 %v6685_v42, %v2192_v0  ;;  %v2243_v41 = vadd.f32 %v2235_v51, %v7131_v18  ;;  %v2722_v23 = vmul.f32 %v2690_v56, %v7139_v10  ;;  %v2655_v48 = vmul.f32 0.5, %v6992_v40  ;;  %v5041_v56 = vld [vmem:[%s5809_s22 + $0xb0] sm:$0xff] }
 0x381   : > { %v2193_v21 = vmul.f32 %v6673_v32, %v2179_v22  ;;  %4697 = vmatmul.mubr.msk.bf16.gmra.mrb[12].mxu1 %vm902_vm1, %v2935_v30  ;;  %v5037_v32 = vld [vmem:[%s5809_s22 + $0x90] sm:$0xff]  ;;  %v2723_v60 = vmul.f32 %v2691_v8, %v7144_v6  ;;  %v2593_v4 = vmul.f32 %v5038_v34, %v6735_v26  ;;  %v2656_v35 = vmul.f32 0.5, %v7108_v5 }
 0x382   : > { %v2220_v55 = vmul.f32 0.044715, %v7153_v37  ;;  %v2251_v14 = vmul.f32 0.7978846, %v2243_v41  ;;  %v2592_v50 = vmul.f32 %v5037_v32, %v6735_v26  ;;  %v4972_v49 = vpop.eup %4971  ;;  %v2754_v53 = vmul.f32 %v2722_v23, %v7139_v10 }
 0x383   : > { %v7162_v7 = vadd.f32 %v6685_v42, %v2193_v21  ;;  %v2210_v42 = vmul.f32 0.5, %v7097_v62  ;;  %v2878_v25 = vadd.f32 1.0, %v4972_v49  ;;  %v4974_v1 = vpop.eup %4973  ;;  %v2755_v45 = vmul.f32 %v2723_v60, %v7144_v6  ;;  %v5040_v21 = vld [vmem:[%s5809_s22 + $0xa8] sm:$0xff]  ;;  %v5042_v49 = vld [vmem:[%s5809_s22 + $0xb8] sm:$0xff] }
 0x384   : > { %v2228_v17 = vmul.f32 %v2220_v55, %v7153_v37  ;;  %4981 = vtanh.f32 %v2251_v14  ;;  %v7179_v40 = vadd.f32 %v8786_v46, %v2592_v50  ;;  %v2879_v44 = vadd.f32 1.0, %v4974_v1 }
 0x385   : > { %v2221_v54 = vmul.f32 0.044715, %v7162_v7  ;;  %v2910_v29 = vmul.f32 %v2878_v25, %v2654_v9  ;;  %v7183_v62 = vadd.f32 %v8786_v46, %v2593_v4  ;;  %v2786_v43 = vadd.f32 %v2754_v53, %v7139_v10 }
 0x386   : > { %v2236_v16 = vmul.f32 %v2228_v17, %v7153_v37  ;;  %v2787_v31 = vadd.f32 %v2755_v45, %v7144_v6  ;;  %v2911_v3 = vmul.f32 %v2879_v44, %v2655_v48  ;;  %v2657_v13 = vmul.f32 0.5, %v7113_v58 }
 0x387   : > { %v4976_v38 = vpop.eup %4975  ;;  %v2229_v12 = vmul.f32 %v2221_v54, %v7162_v7  ;;  %v2818_v33 = vmul.f32 0.7978846, %v2786_v43  ;;  %v2692_v36 = vmul.f32 0.044715, %v7179_v40  ;;  %v2211_v0 = vmul.f32 0.5, %v7131_v18 }
 0x388   : > { %v2266_v52 = vadd.f32 1.0, %v4976_v38  ;;  %v2244_v39 = vadd.f32 %v2236_v16, %v7153_v37  ;;  %v4978_v47 = vpop.eup %4977  ;;  %v2819_v20 = vmul.f32 0.7978846, %v2787_v31  ;;  %v2936_v57 = vpack.c.bf16 %v2911_v3, %v2910_v29 }
 0x389   : > { %v2237_v2 = vmul.f32 %v2229_v12, %v7162_v7  ;;  %v2880_v11 = vadd.f32 1.0, %v4978_v47  ;;  %v4980_v61 = vpop.eup %4979  ;;  %v2693_v5 = vmul.f32 0.044715, %v7183_v62  ;;  %v2724_v51 = vmul.f32 %v2692_v36, %v7179_v40 }
 0x38a   : > { %v2252_v28 = vmul.f32 0.7978846, %v2244_v39  ;;  %v2274_v59 = vmul.f32 %v2266_v52, %v2210_v42  ;;  %4700 = vmatprep.mubr.msk.bf16.mxu1 %vm902_vm1, %v2936_v57  ;;  %v2881_v15 = vadd.f32 1.0, %v4980_v61  ;;  %v2594_v18 = vmul.f32 %v5039_v27, %v6735_v26 }
 0x38b   : > { %v2245_v19 = vadd.f32 %v2237_v2, %v7162_v7  ;;  %v2912_v24 = vmul.f32 %v2880_v11, %v2656_v35  ;;  %v2725_v22 = vmul.f32 %v2693_v5, %v7183_v62  ;;  %v2595_v30 = vmul.f32 %v5040_v21, %v6735_v26 }
 0x38c   : > { %4983 = vtanh.f32 %v2252_v28  ;;  %v2913_v41 = vmul.f32 %v2881_v15, %v2657_v13  ;;  %v2596_v55 = vmul.f32 %v5041_v56, %v6735_v26  ;;  %v2756_v8 = vmul.f32 %v2724_v51, %v7179_v40 }
 0x38d   : > { %v2253_v58 = vmul.f32 0.7978846, %v2245_v19  ;;  %4985 = vtanh.f32 %v2818_v33  ;;  %v2757_v14 = vmul.f32 %v2725_v22, %v7183_v62  ;;  %v7207_v23 = vadd.f32 %v8786_v46, %v2594_v18 }
 0x38e   : > { %4987 = vtanh.f32 %v2819_v20  ;;  %v4982_v63 = vpop.eup %4981  ;;  %v2937_v32 = vpack.c.bf16 %v2913_v41, %v2912_v24  ;;  %v7210_v50 = vadd.f32 %v8786_v46, %v2595_v30  ;;  %v2597_v17 = vmul.f32 %v5042_v49, %v6735_v26  ;;  %v5043_v49 = vld [vmem:[%s5809_s22 + $0xc0] sm:$0xff] }
 0x38f   : > { %4989 = vtanh.f32 %v2253_v58  ;;  %v2267_v9 = vadd.f32 1.0, %v4982_v63  ;;  %v7215_v48 = vadd.f32 %v8786_v46, %v2596_v55  ;;  %v2788_v34 = vadd.f32 %v2756_v8, %v7179_v40 }
 0x390   : > { %v2789_v4 = vadd.f32 %v2757_v14, %v7183_v62  ;;  %v2694_v42 = vmul.f32 0.044715, %v7207_v23  ;;  %4701 = vmatmul.mubr.msk.bf16.gmra.mrb[16].mxu1 %vm902_vm1, %v2937_v32  ;;  %v2695_v54 = vmul.f32 0.044715, %v7210_v50  ;;  %v7223_v25 = vadd.f32 %v8786_v46, %v2597_v17 }
 0x391   : > { %v2275_v60 = vmul.f32 %v2267_v9, %v2211_v0  ;;  %v2696_v1 = vmul.f32 0.044715, %v7215_v48  ;;  %v2820_v53 = vmul.f32 0.7978846, %v2788_v34  ;;  %v2658_v39 = vmul.f32 0.5, %v7139_v10 }
 0x392   : > { %v2821_v45 = vmul.f32 0.7978846, %v2789_v4  ;;  %v2726_v38 = vmul.f32 %v2694_v42, %v7207_v23  ;;  %v2727_v12 = vmul.f32 %v2695_v54, %v7210_v50  ;;  %v2697_v44 = vmul.f32 0.044715, %v7223_v25  ;;  %v5045_v54 = vld [vmem:[%s5809_s22 + $0xd0] sm:$0xff] }
 0x393   : > { %v2282_v16 = vpack.c.bf16 %v2275_v60, %v2274_v59  ;;  %v2728_v29 = vmul.f32 %v2696_v1, %v7215_v48  ;;  %v2659_v43 = vmul.f32 0.5, %v7144_v6  ;;  %4991 = vtanh.f32 %v2820_v53  ;;  %v5044_v60 = vld [vmem:[%s5809_s22 + $0xc8] sm:$0xff] }
 0x394   : > { %v2758_v31 = vmul.f32 %v2726_v38, %v7207_v23  ;;  %v2212_v3 = vmul.f32 0.5, %v7153_v37  ;;  %4993 = vtanh.f32 %v2821_v45  ;;  %v2759_v35 = vmul.f32 %v2727_v12, %v7210_v50 }
 0x395   : > { %4678 = vmatprep.mubr.msk.bf16.mxu0 %vm2119_vm7, %v2282_v16  ;;  %v2729_v13 = vmul.f32 %v2697_v44, %v7223_v25  ;;  %v2760_v10 = vmul.f32 %v2728_v29, %v7215_v48  ;;  %v2213_v6 = vmul.f32 0.5, %v7162_v7  ;;  %v2660_v63 = vmul.f32 0.5, %v7179_v40 }
 0x396   : > { %v4984_v52 = vpop.eup %4983  ;;  %v2790_v20 = vadd.f32 %v2758_v31, %v7207_v23  ;;  %v2791_v11 = vadd.f32 %v2759_v35, %v7210_v50  ;;  %v2661_v21 = vmul.f32 0.5, %v7183_v62  ;;  %v2598_v17 = vmul.f32 %v5043_v49, %v6735_v26 }
 0x397   : > { %v4986_v2 = vpop.eup %4985  ;;  %v2268_v28 = vadd.f32 1.0, %v4984_v52  ;;  %v2761_v37 = vmul.f32 %v2729_v13, %v7223_v25  ;;  %v2792_v59 = vadd.f32 %v2760_v10, %v7215_v48  ;;  %v2599_v40 = vmul.f32 %v5044_v60, %v6735_v26  ;;  %v5046_v52 = vld [vmem:[%s5809_s22 + $0xd8] sm:$0xff] }
 0x398   : > { %v4988_v47 = vpop.eup %4987  ;;  %v2882_v33 = vadd.f32 1.0, %v4986_v2  ;;  %v2822_v0 = vmul.f32 0.7978846, %v2790_v20  ;;  %v2823_v58 = vmul.f32 0.7978846, %v2791_v11  ;;  %v2662_v4 = vmul.f32 0.5, %v7207_v23 }
 0x399   : > { %v4990_v19 = vpop.eup %4989  ;;  %v2883_v57 = vadd.f32 1.0, %v4988_v47  ;;  %v2793_v15 = vadd.f32 %v2761_v37, %v7223_v25  ;;  %v2276_v24 = vmul.f32 %v2268_v28, %v2212_v3  ;;  %v2824_v22 = vmul.f32 0.7978846, %v2792_v59  ;;  %v5047_v37 = vld [vmem:[%s5809_s22 + $0xe0] sm:$0xff] }
 0x39a   : > { %v2269_v36 = vadd.f32 1.0, %v4990_v19  ;;  %v2914_v61 = vmul.f32 %v2882_v33, %v2658_v39  ;;  %4995 = vtanh.f32 %v2822_v0  ;;  %v2663_v62 = vmul.f32 0.5, %v7210_v50 }
 0x39b   : > { %v2915_v5 = vmul.f32 %v2883_v57, %v2659_v43  ;;  %4997 = vtanh.f32 %v2823_v58  ;;  %v2825_v7 = vmul.f32 0.7978846, %v2793_v15  ;;  %v2600_v1 = vmul.f32 %v5045_v54, %v6735_v26  ;;  %v5049_v58 = vld [vmem:[%s5809_s22 + $0xf0] sm:$0xff] }
 0x39c   : > { %v2277_v51 = vmul.f32 %v2269_v36, %v2213_v6  ;;  %4999 = vtanh.f32 %v2824_v22  ;;  %v2664_v45 = vmul.f32 0.5, %v7215_v48  ;;  %v2665_v38 = vmul.f32 0.5, %v7223_v25 }
 0x39d   : > { %v2938_v27 = vpack.c.bf16 %v2915_v5, %v2914_v61  ;;  %5001 = vtanh.f32 %v2825_v7  ;;  %v4992_v41 = vpop.eup %4991  ;;  %v7260_v12 = vadd.f32 %v8786_v46, %v2598_v17  ;;  %v7263_v50 = vadd.f32 %v8786_v46, %v2599_v40  ;;  %v5048_v61 = vld [vmem:[%s5809_s22 + $0xe8] sm:$0xff] }
 0x39e   : > { %v2283_v18 = vpack.c.bf16 %v2277_v51, %v2276_v24  ;;  %v4994_v30 = vpop.eup %4993  ;;  %v2884_v56 = vadd.f32 1.0, %v4992_v41  ;;  %v2601_v39 = vmul.f32 %v5046_v52, %v6735_v26  ;;  %v7269_v48 = vadd.f32 %v8786_v46, %v2600_v1  ;;  %v5050_v24 = vld [vmem:[%s5809_s22 + $0xf8] sm:$0xff]  ;;  %s4599_s22 = sshll.u32 %s5520_s19, 7 }
 0x39f   : > { %4704 = vmatprep.mubr.msk.bf16.mxu1 %vm902_vm1, %v2938_v27  ;;  %v2885_v55 = vadd.f32 1.0, %v4994_v30  ;;  %v2698_v2 = vmul.f32 0.044715, %v7260_v12  ;;  %v2699_v3 = vmul.f32 0.044715, %v7263_v50  ;;  %v2602_v36 = vmul.f32 %v5047_v37, %v6735_v26 }
 0x3a0   : > { %4679 = vmatmul.mubr.msk.bf16.vlgmr.msra.gmra.mrb[32].mxu0 %vm2119_vm7, %v2283_v18  ;;  %v2916_v9 = vmul.f32 %v2884_v56, %v2660_v63  ;;  %v7273_v35 = vadd.f32 %v8786_v46, %v2601_v39  ;;  %v2700_v33 = vmul.f32 0.044715, %v7269_v48  ;;  %v2603_v0 = vmul.f32 %v5048_v61, %v6735_v26 }
 0x3a1   : > { %v2917_v8 = vmul.f32 %v2885_v55, %v2661_v21  ;;  %v2730_v28 = vmul.f32 %v2698_v2, %v7260_v12  ;;  %v2731_v20 = vmul.f32 %v2699_v3, %v7263_v50  ;;  %v2604_v15 = vmul.f32 %v5049_v58, %v6735_v26 }
 0x3a2   : > { %v2701_v6 = vmul.f32 0.044715, %v7273_v35  ;;  %v2732_v11 = vmul.f32 %v2700_v33, %v7269_v48  ;;  %v2605_v51 = vmul.f32 %v5050_v24, %v6735_v26  ;;  %v2638_v7 = vadd.f32 %v8786_v46, %v2602_v36 }
 0x3a3   : > { %v2939_v32 = vpack.c.bf16 %v2917_v8, %v2916_v9  ;;  %v2762_v19 = vmul.f32 %v2730_v28, %v7260_v12  ;;  %v2763_v57 = vmul.f32 %v2731_v20, %v7263_v50  ;;  %v2639_v18 = vadd.f32 %v8786_v46, %v2603_v0 }
 0x3a4   : > { %v4996_v14 = vpop.eup %4995  ;;  %v2733_v5 = vmul.f32 %v2701_v6, %v7273_v35  ;;  %v2764_v27 = vmul.f32 %v2732_v11, %v7269_v48  ;;  %v2640_v21 = vadd.f32 %v8786_v46, %v2604_v15  ;;  %v2641_v55 = vadd.f32 %v8786_v46, %v2605_v51 }
 0x3a5   : > { %v4998_v34 = vpop.eup %4997  ;;  %v2886_v42 = vadd.f32 1.0, %v4996_v14  ;;  %4705 = vmatmul.mubr.msk.bf16.gmra.mrb[20].mxu1 %vm902_vm1, %v2939_v32  ;;  %v2794_v59 = vadd.f32 %v2762_v19, %v7260_v12  ;;  %v2795_v22 = vadd.f32 %v2763_v57, %v7263_v50  ;;  %v2702_v9 = vmul.f32 0.044715, %v2638_v7 }
 0x3a6   : > { %v5000_v16 = vpop.eup %4999  ;;  %v2887_v53 = vadd.f32 1.0, %v4998_v34  ;;  %v2765_v41 = vmul.f32 %v2733_v5, %v7273_v35  ;;  %v2796_v56 = vadd.f32 %v2764_v27, %v7269_v48  ;;  %v2703_v8 = vmul.f32 0.044715, %v2639_v18 }
 0x3a7   : > { %v5002_v44 = vpop.eup %5001  ;;  %v2918_v29 = vmul.f32 %v2886_v42, %v2662_v4  ;;  %v2888_v23 = vadd.f32 1.0, %v5000_v16  ;;  %v2826_v63 = vmul.f32 0.7978846, %v2794_v59  ;;  %v2827_v30 = vmul.f32 0.7978846, %v2795_v22 }
 0x3a8   : > { %v2919_v43 = vmul.f32 %v2887_v53, %v2663_v62  ;;  %v2889_v31 = vadd.f32 1.0, %v5002_v44  ;;  %v2797_v26 = vadd.f32 %v2765_v41, %v7273_v35  ;;  %v2828_v14 = vmul.f32 0.7978846, %v2796_v56 }
 0x3a9   : > { %v2920_v25 = vmul.f32 %v2888_v23, %v2664_v45  ;;  %5003 = vtanh.f32 %v2826_v63  ;;  %v2734_v49 = vmul.f32 %v2702_v9, %v2638_v7  ;;  %v2735_v17 = vmul.f32 %v2703_v8, %v2639_v18 }
 0x3aa   : > { %v2940_v13 = vpack.c.bf16 %v2919_v43, %v2918_v29  ;;  %v2921_v47 = vmul.f32 %v2889_v31, %v2665_v38  ;;  %5005 = vtanh.f32 %v2827_v30  ;;  %v2829_v32 = vmul.f32 0.7978846, %v2797_v26 }
 0x3ab   : > { %v2704_v60 = vmul.f32 0.044715, %v2640_v21  ;;  %5007 = vtanh.f32 %v2828_v14  ;;  %v2705_v40 = vmul.f32 0.044715, %v2641_v55  ;;  %v2766_v34 = vmul.f32 %v2734_v49, %v2638_v7 }
 0x3ac   : > { %4708 = vmatprep.mubr.msk.bf16.mxu1 %vm902_vm1, %v2940_v13  ;;  %v2941_v10 = vpack.c.bf16 %v2921_v47, %v2920_v25  ;;  %5009 = vtanh.f32 %v2829_v32  ;;  %v2767_v4 = vmul.f32 %v2735_v17, %v2639_v18  ;;  %v2666_v44 = vmul.f32 0.5, %v7260_v12 }
 0x3ad   : > { %v2736_v62 = vmul.f32 %v2704_v60, %v2640_v21  ;;  %v2737_v42 = vmul.f32 %v2705_v40, %v2641_v55  ;;  %v2798_v54 = vadd.f32 %v2766_v34, %v2638_v7  ;;  %v2667_v52 = vmul.f32 0.5, %v7263_v50 }
 0x3ae   : > { %4709 = vmatmul.mubr.msk.bf16.gmra.mrb[24].mxu1 %vm902_vm1, %v2941_v10  ;;  %v2799_v46 = vadd.f32 %v2767_v4, %v2639_v18  ;;  %v2668_v3 = vmul.f32 0.5, %v7269_v48  ;;  %v2669_v28 = vmul.f32 0.5, %v7273_v35  ;;  %v2670_v11 = vmul.f32 0.5, %v2638_v7 }
 0x3af   : > { %v2768_v1 = vmul.f32 %v2736_v62, %v2640_v21  ;;  %v2769_v16 = vmul.f32 %v2737_v42, %v2641_v55  ;;  %v2830_v53 = vmul.f32 0.7978846, %v2798_v54  ;;  %v2671_v36 = vmul.f32 0.5, %v2639_v18 }
 0x3b0   : > { %v2831_v45 = vmul.f32 0.7978846, %v2799_v46  ;;  %v2672_v0 = vmul.f32 0.5, %v2640_v21  ;;  %v2673_v5 = vmul.f32 0.5, %v2641_v55 }
 0x3b1   : > { %v2800_v38 = vadd.f32 %v2768_v1, %v2640_v21  ;;  %v2801_v29 = vadd.f32 %v2769_v16, %v2641_v55  ;;  %5011 = vtanh.f32 %v2830_v53 }
 0x3b2   : > { %5013 = vtanh.f32 %v2831_v45 }
 0x3b3   : > { %v5004_v23 = vpop.eup %5003  ;;  %v2832_v39 = vmul.f32 0.7978846, %v2800_v38  ;;  %v2833_v2 = vmul.f32 0.7978846, %v2801_v29 }
 0x3b4   : > { %v5006_v43 = vpop.eup %5005  ;;  %v2890_v31 = vadd.f32 1.0, %v5004_v23 }
 0x3b5   : > { %v2891_v25 = vadd.f32 1.0, %v5006_v43  ;;  %5015 = vtanh.f32 %v2832_v39  ;;  %v5008_v13 = vpop.eup %5007 }
 0x3b6   : > { %v2922_v47 = vmul.f32 %v2890_v31, %v2666_v44  ;;  %5017 = vtanh.f32 %v2833_v2  ;;  %v5010_v12 = vpop.eup %5009  ;;  %v2892_v20 = vadd.f32 1.0, %v5008_v13 }
 0x3b7   : > { %v2923_v33 = vmul.f32 %v2891_v25, %v2667_v52  ;;  %v2893_v10 = vadd.f32 1.0, %v5010_v12 }
 0x3b8   : > { %v2924_v19 = vmul.f32 %v2892_v20, %v2668_v3 }
 0x3b9   : > { %v2942_v50 = vpack.c.bf16 %v2923_v33, %v2922_v47  ;;  %v2925_v6 = vmul.f32 %v2893_v10, %v2669_v28 }
 0x3bb   : > { %4712 = vmatprep.mubr.msk.bf16.mxu1 %vm902_vm1, %v2942_v50  ;;  %v2943_v57 = vpack.c.bf16 %v2925_v6, %v2924_v19  ;;  %v5012_v37 = vpop.eup %5011 }
 0x3bc   : > { %v5014_v48 = vpop.eup %5013  ;;  %v2894_v61 = vadd.f32 1.0, %v5012_v37 }
 0x3bd   : > { %4713 = vmatmul.mubr.msk.bf16.gmra.mrb[28].mxu1 %vm902_vm1, %v2943_v57  ;;  %v2895_v59 = vadd.f32 1.0, %v5014_v48 }
 0x3be   : > { %v2926_v15 = vmul.f32 %v2894_v61, %v2670_v11 }
 0x3bf   : > { %v5016_v35 = vpop.eup %5015  ;;  %v2927_v51 = vmul.f32 %v2895_v59, %v2671_v36 }
 0x3c0   : > { %v5018_v58 = vpop.eup %5017  ;;  %v2896_v24 = vadd.f32 1.0, %v5016_v35 }
 0x3c1   : > { %v2897_v22 = vadd.f32 1.0, %v5018_v58  ;;  %v2944_v63 = vpack.c.bf16 %v2927_v51, %v2926_v15 }
 0x3c2   : > { %v2928_v27 = vmul.f32 %v2896_v24, %v2672_v0 }
 0x3c3   : > { %v2929_v41 = vmul.f32 %v2897_v22, %v2673_v5  ;;  %4716 = vmatprep.mubr.msk.bf16.mxu1 %vm902_vm1, %v2944_v63 }
 0x3c5   : > { %v2945_v7 = vpack.c.bf16 %v2929_v41, %v2928_v27 }
 0x3c7   : > { %4717 = vmatmul.mubr.msk.bf16.gmra.mrb[32].mxu1 %vm902_vm1, %v2945_v7  ;;  %vm4353_vm1 = vcmask 195584  }
 0x428   : > { %v7311_v18 = vpop.f32.mrb[0].mxu1 }
 0x429   : > { %8787 = vst [vmem:[#allocation41_spill] sm:$0xff] %v7311_v18  ;;  %v7313_v30 = vpop.f32.mrb[1].mxu1  ;;  %v2415_v56 = vrot.slane %v7311_v18, 7  ;;  %v2471_v55 = vrot.slane %v7311_v18, 1 }
 0x42a   : > { %8788 = vst [vmem:[#allocation39_spill] sm:$0xff] %v7313_v30  ;;  %v7315_v21 = vpop.f32.mrb[2].mxu1  ;;  %v8662_v14 = vrot.slane %v7313_v30, 7  ;;  %v8661_v17 = vrot.slane %v7313_v30, 1 }
 0x42b   : > { %8789 = vst [vmem:[#allocation42_spill] sm:$0xff] %v7315_v21  ;;  %v2417_v26 = vrot.slane %v7315_v21, 7  ;;  %v8660_v9 = vrot.slane %v7315_v21, 1  ;;  %v7321_v8 = vpop.f32.mrb[3].mxu1 }
 0x42c   : > { %8790 = vst [vmem:[#allocation56_spill] sm:$0xff] %v7321_v8  ;;  %v2413_v32 = vrot.slane %v7321_v8, 7  ;;  %v2469_v49 = vrot.slane %v7321_v8, 1 }
 0x42d   : > { %v7328_v60 = vsel %vm1273_vm2, %v2415_v56, %v2417_v26  ;;  %v7333_v40 = vsel %vm1504_vm3, %v2471_v55, %v8660_v9 }
 0x42e   : > { %v7336_v34 = vsel %vm1273_vm2, %v2413_v32, %v2415_v56  ;;  %v7341_v4 = vsel %vm1273_vm2, %v8662_v14, %v2413_v32  ;;  %v7346_v62 = vsel %vm1504_vm3, %v8661_v17, %v2469_v49  ;;  %v7349_v42 = vsel %vm1504_vm3, %v2469_v49, %v2471_v55 }
 0x433   : > { %v7351_v54 = vpop.f32.mrb[4].mxu1 }
 0x434   : > { %v3315_v46 = vrot.slane %v7351_v54, 7  ;;  %v3539_v1 = vrot.slane %v7351_v54, 1  ;;  %v7355_v16 = vpop.f32.mrb[5].mxu1 }
 0x435   : > { %v8659_v53 = vrot.slane %v7355_v16, 7  ;;  %v3536_v45 = vrot.slane %v7355_v16, 1  ;;  %v7359_v38 = vpop.f32.mrb[6].mxu1 }
 0x436   : > { %v3317_v44 = vrot.slane %v7359_v38, 7  ;;  %v3541_v29 = vrot.slane %v7359_v38, 1  ;;  %v7363_v23 = vpop.f32.mrb[7].mxu1 }
 0x437   : > { %v3313_v52 = vrot.slane %v7363_v23, 7  ;;  %v3537_v39 = vrot.slane %v7363_v23, 1 }
 0x438   : > { %v7368_v43 = vsel %vm1273_vm2, %v3315_v46, %v3317_v44  ;;  %v7371_v31 = vsel %vm1504_vm3, %v3539_v1, %v3541_v29 }
 0x439   : > { %v7376_v2 = vsel %vm1273_vm2, %v8659_v53, %v3313_v52  ;;  %v7379_v25 = vsel %vm1273_vm2, %v3313_v52, %v3315_v46  ;;  %v7382_v3 = vsel %vm1504_vm3, %v3537_v39, %v3539_v1  ;;  %v7385_v13 = vsel %vm1504_vm3, %v3536_v45, %v3537_v39 }
 0x43b   : > { %v7387_v47 = vpop.f32.mrb[8].mxu1 }
 0x43c   : > { %v3323_v28 = vrot.slane %v7387_v47, 7  ;;  %v3547_v12 = vrot.slane %v7387_v47, 1  ;;  %v7391_v33 = vpop.f32.mrb[9].mxu1 }
 0x43d   : > { %v3319_v20 = vrot.slane %v7391_v33, 7  ;;  %v3543_v10 = vrot.slane %v7391_v33, 1  ;;  %v7395_v50 = vpop.f32.mrb[10].mxu1 }
 0x43e   : > { %v3325_v19 = vrot.slane %v7395_v50, 7  ;;  %v3549_v6 = vrot.slane %v7395_v50, 1  ;;  %v7399_v57 = vpop.f32.mrb[11].mxu1 }
 0x43f   : > { %v3321_v11 = vrot.slane %v7399_v57, 7  ;;  %v3545_v37 = vrot.slane %v7399_v57, 1  ;;  %v7404_v36 = vsel %vm1273_vm2, %v3317_v44, %v3319_v20  ;;  %v7407_v48 = vsel %vm1504_vm3, %v3541_v29, %v3543_v10 }
 0x440   : > { %v7410_v61 = vsel %vm1273_vm2, %v3323_v28, %v3325_v19  ;;  %v7413_v0 = vsel %vm1504_vm3, %v3547_v12, %v3549_v6 }
 0x441   : > { %v7416_v35 = vsel %vm1273_vm2, %v3319_v20, %v3321_v11  ;;  %v7419_v59 = vsel %vm1273_vm2, %v3321_v11, %v3323_v28  ;;  %v7422_v5 = vsel %vm1504_vm3, %v3545_v37, %v3547_v12  ;;  %v7425_v58 = vsel %vm1504_vm3, %v3543_v10, %v3545_v37 }
 0x454   : > { %v7427_v15 = vpop.f32.mrb[12].mxu1 }
 0x455   : > { %v3331_v24 = vrot.slane %v7427_v15, 7  ;;  %v3555_v51 = vrot.slane %v7427_v15, 1  ;;  %v7431_v22 = vpop.f32.mrb[13].mxu1 }
 0x456   : > { %v3327_v27 = vrot.slane %v7431_v22, 7  ;;  %v3551_v63 = vrot.slane %v7431_v22, 1  ;;  %v7435_v41 = vpop.f32.mrb[14].mxu1 }
 0x457   : > { %v3333_v7 = vrot.slane %v7435_v41, 7  ;;  %v3557_v56 = vrot.slane %v7435_v41, 1  ;;  %v7439_v55 = vpop.f32.mrb[15].mxu1 }
 0x458   : > { %v3329_v26 = vrot.slane %v7439_v55, 7  ;;  %v3553_v32 = vrot.slane %v7439_v55, 1  ;;  %v7444_v49 = vsel %vm1273_vm2, %v3325_v19, %v3327_v27  ;;  %v7447_v46 = vsel %vm1504_vm3, %v3549_v6, %v3551_v63 }
 0x459   : > { %v7450_v1 = vsel %vm1273_vm2, %v3331_v24, %v3333_v7  ;;  %v7453_v45 = vsel %vm1504_vm3, %v3555_v51, %v3557_v56 }
 0x45a   : > { %v7456_v44 = vsel %vm1273_vm2, %v3327_v27, %v3329_v26  ;;  %v7459_v29 = vsel %vm1273_vm2, %v3329_v26, %v3331_v24  ;;  %v7462_v52 = vsel %vm1504_vm3, %v3553_v32, %v3555_v51  ;;  %v7465_v39 = vsel %vm1504_vm3, %v3551_v63, %v3553_v32 }
 0x45b   : > { %8791 = vst [vmem:[#allocation32_spill] sm:$0xff] %v7459_v29  ;;  %8792 = vst [vmem:[#allocation51_spill] sm:$0xff] %v7462_v52 }
 0x45c   : > { %8793 = vst [vmem:[#allocation33_spill] sm:$0xff] %v7465_v39 }
 0x463   : > { %v7467_v28 = vpop.f32.mrb[16].mxu1 }
 0x464   : > { %8794 = vst [vmem:[#allocation31_spill] sm:$0xff] %v7467_v28  ;;  %v7469_v12 = vpop.f32.mrb[17].mxu1  ;;  %v3339_v6 = vrot.slane %v7467_v28, 7  ;;  %v3563_v11 = vrot.slane %v7467_v28, 1 }
 0x465   : > { %8795 = vst [vmem:[#allocation58_spill] sm:$0xff] %v7469_v12  ;;  %v3335_v20 = vrot.slane %v7469_v12, 7  ;;  %v3559_v10 = vrot.slane %v7469_v12, 1  ;;  %v7473_v19 = vpop.f32.mrb[18].mxu1 }
 0x466   : > { %8796 = vst [vmem:[#allocation34_spill] sm:$0xff] %v7473_v19  ;;  %v3341_v37 = vrot.slane %v7473_v19, 7  ;;  %v3565_v24 = vrot.slane %v7473_v19, 1  ;;  %v7479_v51 = vpop.f32.mrb[19].mxu1 }
 0x467   : > { %8797 = vst [vmem:[#allocation36_spill] sm:$0xff] %v7479_v51  ;;  %v3337_v27 = vrot.slane %v7479_v51, 7  ;;  %v3561_v63 = vrot.slane %v7479_v51, 1  ;;  %v7484_v26 = vsel %vm1273_vm2, %v3333_v7, %v3335_v20  ;;  %v7487_v32 = vsel %vm1504_vm3, %v3557_v56, %v3559_v10 }
 0x468   : > { %8798 = vst [vmem:[#allocation37_spill] sm:$0xff] %v7484_v26  ;;  %8799 = vst [vmem:[#allocation35_spill] sm:$0xff] %v7487_v32  ;;  %v7490_v53 = vsel %vm1504_vm3, %v3563_v11, %v3565_v24  ;;  %v7493_v9 = vsel %vm1273_vm2, %v3339_v6, %v3341_v37 }
 0x469   : > { %8800 = vst [vmem:[#allocation57_spill] sm:$0xff] %v7490_v53  ;;  %8801 = vst [vmem:[#allocation55_spill] sm:$0xff] %v7493_v9  ;;  %v7496_v17 = vsel %vm1273_vm2, %v3337_v27, %v3339_v6  ;;  %v7499_v14 = vsel %vm1273_vm2, %v3335_v20, %v3337_v27  ;;  %v7502_v12 = vsel %vm1504_vm3, %v3561_v63, %v3563_v11  ;;  %v8809_v9 = vrot.slane %v7313_v30, 7 }
 0x46a   : > { %8802 = vst [vmem:[#allocation38_spill] sm:$0xff] %v7496_v17  ;;  %8803 = vst [vmem:[#allocation43_spill] sm:$0xff] %v7499_v14  ;;  %v7505_v7 = vsel %vm1504_vm3, %v3559_v10, %v3561_v63 }
 0x46b   : > { %8804 = vst [vmem:[#allocation44_spill] sm:$0xff] %v7502_v12  ;;  %8805 = vst [vmem:[#allocation40_spill] sm:$0xff] %v7505_v7 }
 0x473   : > { %v7507_v56 = vpop.f32.mrb[32].mxu0 }
 0x474   : > { %8806 = vst [vmem:[#allocation50_spill] sm:$0xff] %v7507_v56  ;;  %2378 = vrot.lane.b32.xlu0 %v7507_v56, %s5433_s20  ;;  %v2336_v32 = vpop.f32.mrb[33].mxu0  ;;  %v2407_v6 = vrot.slane %v7507_v56, 7  ;;  %v2463_v17 = vrot.slane %v7507_v56, 1 }
 0x475   : > { %v7511_v53 = vpop.f32.mrb[34].mxu0  ;;  %v2404_v27 = vrot.slane %v2336_v32, 7  ;;  %v2460_v63 = vrot.slane %v2336_v32, 1 }
 0x476   : > { %8807 = vst [vmem:[#allocation52_spill] sm:$0xff] %v7511_v53  ;;  %v2409_v20 = vrot.slane %v7511_v53, 7  ;;  %v2465_v11 = vrot.slane %v7511_v53, 1  ;;  %2380 = vrot.lane.b32.xlu1 %v7511_v53, %s5433_s20  ;;  %v7519_v10 = vpop.f32.mrb[35].mxu0  ;;  %v8810_v53 = vrot.slane %v7313_v30, 1 }
 0x477   : > { %8808 = vst [vmem:[#allocation53_spill] sm:$0xff] %v7519_v10  ;;  %v2405_v7 = vrot.slane %v7519_v10, 7  ;;  %v2461_v12 = vrot.slane %v7519_v10, 1 }
 0x478   : > { %2374 = vrot.lane.b32.xlu0 %v2336_v32, %s5433_s20  ;;  %v2410_v14 = vsel %vm1273_vm2, %v2407_v6, %v2409_v20  ;;  %v2466_v56 = vsel %vm1504_vm3, %v2463_v17, %v2465_v11  ;;  %v2412_v26 = vsel %vm1273_vm2, %v2409_v20, %v8809_v9  ;;  %v2468_v51 = vsel %vm1504_vm3, %v2465_v11, %v8810_v53  ;;  %v7538_v52 = vpop.f32.mrb[20].mxu1 }
 0x479   : > { %v2406_v28 = vsel %vm1273_vm2, %v2404_v27, %v2405_v7  ;;  %v2408_v19 = vsel %vm1273_vm2, %v2405_v7, %v2407_v6  ;;  %v2464_v39 = vsel %vm1504_vm3, %v2461_v12, %v2463_v17  ;;  %v2462_v32 = vsel %vm1504_vm3, %v2460_v63, %v2461_v12  ;;  %8811 = vst [vmem:[#allocation59_spill] sm:$0xff] %v7538_v52  ;;  %v7541_v9 = vpop.f32.mrb[21].mxu1 }
 0x47a   : > { %2376 = vrot.lane.b32.xlu1 %v7519_v10, %s5433_s20  ;;  %8812 = vst [vmem:[#allocation60_spill] sm:$0xff] %v7541_v9  ;;  %v3343_v20 = vrot.slane %v7541_v9, 7  ;;  %v3567_v53 = vrot.slane %v7541_v9, 1  ;;  %v7546_v7 = vpop.f32.mrb[22].mxu1  ;;  %v3571_v11 = vrot.slane %v7538_v52, 1  ;;  %v8817_v10 = vld [vmem:[#allocation28_spill] sm:$0xff] }
 0x47b   : > { %8813 = vst [vmem:[#allocation48_spill] sm:$0xff] %v7546_v7  ;;  %v7555_v12 = vpop.f32.mrb[23].mxu1  ;;  %v3349_v63 = vrot.slane %v7546_v7, 7  ;;  %vm2484_vm8 = vcmp.lt.s32.totalorder %v8817_v10, 7 }
 0x47c   : > { %2425 = vrot.lane.b32.xlu0 %v2410_v14, %s5434_s12  ;;  %v7549_v17 = vsel %vm1273_vm2, %v3341_v37, %v3343_v20  ;;  %v7552_v6 = vsel %vm1504_vm3, %v3565_v24, %v3567_v53  ;;  %8816 = vst [vmem:[#allocation45_spill] sm:$0xff] %v7555_v12  ;;  %v3347_v14 = vrot.slane %v7538_v52, 7  ;;  %v3345_v37 = vrot.slane %v7555_v12, 7 }
 0x47d   : > { %8814 = vst [vmem:[#allocation46_spill] sm:$0xff] %v7549_v17  ;;  %8815 = vst [vmem:[#allocation47_spill] sm:$0xff] %v7552_v6  ;;  %v3569_v24 = vrot.slane %v7555_v12, 1  ;;  %v2489_v17 = vsel %vm2484_vm8, %v2466_v56, 0.0 }
 0x47e   : > { %2419 = vrot.lane.b32.xlu1 %v2404_v27, %s5434_s12  ;;  %v3573_v27 = vrot.slane %v7546_v7, 1  ;;  %v7577_v7 = vsel %vm1273_vm2, %v3347_v14, %v3349_v63 }
 0x47f   : > { %8820 = vst [vmem:[#allocation61_spill] sm:$0xff] %v7577_v7  ;;  %v7590_v56 = vsel %vm1504_vm3, %v3569_v24, %v3571_v11  ;;  %v7593_v29 = vsel %vm1504_vm3, %v3567_v53, %v3569_v24  ;;  %v2493_v53 = vsel %vm2484_vm8, %v7333_v40, 0.0  ;;  %v2491_v24 = vsel %vm2484_vm8, %v7346_v62, 0.0 }
 0x480   : > { %2421 = vrot.lane.b32.xlu0 %v2406_v28, %s5434_s12  ;;  %v2488_v28 = vsel %vm2484_vm8, %v2464_v39, 0.0  ;;  %v7580_v12 = vsel %vm1504_vm3, %v3571_v11, %v3573_v27  ;;  %v7584_v39 = vsel %vm1273_vm2, %v3345_v37, %v3347_v14  ;;  %v2492_v62 = vsel %vm2484_vm8, %v7349_v42, 0.0 }
 0x481   : > { %v7567_v6 = vpop.f32.mrb[24].mxu1  ;;  %v8826_v42 = vrot.slane %v7355_v16, 7 }
 0x482   : > { %2423 = vrot.lane.b32.xlu1 %v2408_v19, %s5434_s12  ;;  %8818 = vst [vmem:[#allocation49_spill] sm:$0xff] %v7567_v6  ;;  %v7572_v9 = vpop.f32.mrb[25].mxu1  ;;  %v3579_v11 = vrot.slane %v7567_v6, 1 }
 0x483   : > { %8819 = vst [vmem:[#allocation28_spill] sm:$0xff] %v7572_v9  ;;  %v3351_v19 = vrot.slane %v7572_v9, 7  ;;  %v3575_v52 = vrot.slane %v7572_v9, 1 }
 0x484   : > { %2505 = vrot.lane.b32.xlu0 %v2488_v28, %s5435_s18  ;;  %v7587_v28 = vsel %vm1273_vm2, %v3343_v20, %v3345_v37  ;;  %v2490_v20 = vsel %vm2484_vm8, %v2468_v51, 0.0  ;;  %v3355_v51 = vrot.slane %v7567_v6, 7 }
 0x485   : > { %v7596_v9 = vsel %vm1273_vm2, %v3349_v63, %v3351_v19  ;;  %v7599_v7 = vsel %vm1504_vm3, %v3573_v27, %v3575_v52 }
 0x486   : > { %2507 = vrot.lane.b32.xlu1 %v2489_v17, %s5435_s18  ;;  %v2487_v17 = vsel %vm2484_vm8, %v2462_v32, 0.0  ;;  %v7618_v32 = vpop.f32.mrb[26].mxu1 }
 0x487   : > { %8821 = vst [vmem:[#allocation62_spill] sm:$0xff] %v7618_v32  ;;  %v7628_v14 = vpop.f32.mrb[27].mxu1  ;;  %v3581_v63 = vrot.slane %v7618_v32, 1 }
 0x488   : > { %2386 = vrot.lane.b32.xlu0 %v7311_v18, %s5433_s20  ;;  %8823 = vst [vmem:[#allocation63_spill] sm:$0xff] %v7628_v14  ;;  %v3577_v27 = vrot.slane %v7628_v14, 1 }
 0x48a   : > { %2503 = vrot.lane.b32.xlu1 %v2487_v17, %s5435_s18  ;;  %v7666_v18 = vsel %vm1504_vm3, %v3577_v27, %v3579_v11 }
 0x48c   : > { %2382 = vrot.lane.b32.xlu0 %v7313_v30, %s5433_s20 }
 0x48e   : > { %2384 = vrot.lane.b32.xlu1 %v7321_v8, %s5433_s20  ;;  %v7669_v8 = vsel %vm1504_vm3, %v3575_v52, %v3577_v27  ;;  %v3633_v27 = vsel %vm1602_vm4, %v7382_v3, 0.0 }
 0x490   : > { %2433 = vrot.lane.b32.xlu0 %v7328_v60, %s5434_s12  ;;  %v8822_v60 = vrot.slane %v7315_v21, 1  ;;  %v7640_v37 = vpop.f32.mrb[28].mxu1 }
 0x491   : > { %v7645_v17 = vpop.f32.mrb[29].mxu1 }
 0x492   : > { %2427 = vrot.lane.b32.xlu1 %v2412_v26, %s5434_s12  ;;  %v2483_v26 = vsel %vm1504_vm3, %v8822_v60, 0.0  ;;  %v3359_v60 = vrot.slane %v7645_v17, 7  ;;  %v7693_v52 = vpop.f32.mrb[30].mxu1 }
 0x493   : > { %v2494_v40 = vsel %vm2484_vm8, %v2483_v26, 0.0  ;;  %v3583_v26 = vrot.slane %v7645_v17, 1 }
 0x494   : > { %2509 = vrot.lane.b32.xlu0 %v2490_v20, %s5435_s18 }
 0x496   : > { %2431 = vrot.lane.b32.xlu1 %v7336_v34, %s5434_s12  ;;  %v3357_v34 = vrot.slane %v7618_v32, 7 }
 0x498   : > { %2429 = vrot.lane.b32.xlu0 %v7341_v4, %s5434_s12  ;;  %v3353_v4 = vrot.slane %v7628_v14, 7  ;;  %v7648_v20 = vsel %vm1273_vm2, %v3355_v51, %v3357_v34 }
 0x49a   : > { %2515 = vrot.lane.b32.xlu1 %v2493_v53, %s5435_s18  ;;  %v7651_v53 = vsel %vm1504_vm3, %v3579_v11, %v3581_v63  ;;  %v7660_v21 = vsel %vm1273_vm2, %v3351_v19, %v3353_v4  ;;  %v3363_v19 = vrot.slane %v7640_v37, 7  ;;  %v7698_v11 = vpop.f32.mrb[31].mxu1 }
 0x49c   : > { %2517 = vrot.lane.b32.xlu0 %v2494_v40, %s5435_s18  ;;  %v7657_v40 = vsel %vm1273_vm2, %v3353_v4, %v3355_v51  ;;  %v7676_v51 = vsel %vm1504_vm3, %v3581_v63, %v3583_v26  ;;  %v7704_v63 = vpop.f32.mrb[32].mxu1 }
 0x49d   : > { %8825 = vst [vmem:[#allocation65_spill] sm:$0xff] %v7676_v51  ;;  %8827 = vst [vmem:[#allocation66_spill] sm:$0xff] %v7704_v63 }
 0x49e   : > { %2511 = vrot.lane.b32.xlu1 %v2491_v24, %s5435_s18  ;;  %v7673_v24 = vsel %vm1273_vm2, %v3357_v34, %v3359_v60  ;;  %v3589_v34 = vrot.slane %v7693_v52, 1 }
 0x49f   : > { %8824 = vst [vmem:[#allocation64_spill] sm:$0xff] %v7673_v24 }
 0x4a0   : > { %2513 = vrot.lane.b32.xlu0 %v2492_v62, %s5435_s18 }
 0x4a2   : > { %3192 = vrot.lane.b32.xlu1 %v7351_v54, %s5433_s20 }
 0x4a4   : > { %3194 = vrot.lane.b32.xlu0 %v7359_v38, %s5433_s20 }
 0x4a6   : > { %3188 = vrot.lane.b32.xlu1 %v7355_v16, %s5433_s20  ;;  %v3361_v16 = vrot.slane %v7698_v11, 7 }
 0x4a8   : > { %3190 = vrot.lane.b32.xlu0 %v7363_v23, %s5433_s20  ;;  %v3587_v23 = vrot.slane %v7640_v37, 1  ;;  %v7727_v24 = vsel %vm1273_vm2, %v3359_v60, %v3361_v16  ;;  %v3371_v60 = vrot.slane %v7704_v63, 7 }
 0x4aa   : > { %3381 = vrot.lane.b32.xlu1 %v7368_v43, %s5434_s12  ;;  %v3365_v43 = vrot.slane %v7693_v52, 7  ;;  %v7721_v51 = vsel %vm1504_vm3, %v3587_v23, %v3589_v34 }
 0x4ab   : > { %8830 = vst [vmem:[#allocation54_spill] sm:$0xff] %v7721_v51 }
 0x4ac   : > { %3375 = vrot.lane.b32.xlu0 %v8826_v42, %s5434_s12  ;;  %v7718_v30 = vsel %vm1273_vm2, %v3363_v19, %v3365_v43 }
 0x4ae   : > { %3700 = vrot.lane.b32.xlu1 %v7371_v31, %s5435_s18  ;;  %v3585_v31 = vrot.slane %v7698_v11, 1 }
 0x4b0   : > { %3377 = vrot.lane.b32.xlu0 %v7376_v2, %s5434_s12  ;;  %v7709_v2 = vpop.f32.mrb[33].mxu1  ;;  %v7732_v3 = vsel %vm1504_vm3, %v3585_v31, %v3587_v23 }
 0x4b1   : > { %8828 = vst [vmem:[#allocation67_spill] sm:$0xff] %v7709_v2  ;;  %v3367_v62 = vrot.slane %v7709_v2, 7  ;;  %v3591_v42 = vrot.slane %v7709_v2, 1 }
 0x4b2   : > { %3379 = vrot.lane.b32.xlu1 %v7379_v25, %s5434_s12  ;;  %v7724_v25 = vsel %vm1273_vm2, %v3361_v16, %v3363_v19 }
 0x4b3   : > { %v7738_v2 = vsel %vm1273_vm2, %v3365_v43, %v3367_v62  ;;  %v7741_v51 = vsel %vm1504_vm3, %v3589_v34, %v3591_v42 }
 0x4b4   : > { %3698 = vrot.lane.b32.xlu0 %v3633_v27, %s5435_s18  ;;  %v7735_v27 = vsel %vm1504_vm3, %v3583_v26, %v3585_v31  ;;  %v7764_v26 = vpop.f32.mrb[34].mxu1 }
 0x4b5   : > { %v7767_v19 = vpop.f32.mrb[35].mxu1 }
 0x4b6   : > { %3696 = vrot.lane.b32.xlu1 %v7385_v13, %s5435_s18  ;;  %v3635_v13 = vsel %vm1602_vm4, %v7407_v48, 0.0  ;;  %v3373_v48 = vrot.slane %v7764_v26, 7  ;;  %v3593_v23 = vrot.slane %v7767_v19, 1 }
 0x4b8   : > { %3202 = vrot.lane.b32.xlu0 %v7395_v50, %s5433_s20  ;;  %v7780_v43 = vsel %vm1273_vm2, %v3371_v60, %v3373_v48  ;;  %v7789_v16 = vsel %vm1504_vm3, %v3591_v42, %v3593_v23  ;;  %v8832_v42 = vld [vmem:[#allocation51_spill] sm:$0xff]  ;;  %v8838_v48 = vld [vmem:[#allocation36_spill] sm:$0xff] }
 0x4ba   : > { %3200 = vrot.lane.b32.xlu1 %v7387_v47, %s5433_s20 }
 0x4bc   : > { %3198 = vrot.lane.b32.xlu0 %v7399_v57, %s5433_s20 }
 0x4be   : > { %3196 = vrot.lane.b32.xlu1 %v7391_v33, %s5433_s20 }
 0x4c0   : > { %3383 = vrot.lane.b32.xlu0 %v7404_v36, %s5434_s12  ;;  %v3595_v36 = vrot.slane %v7704_v63, 1  ;;  %v8845_v63 = vld [vmem:[#allocation38_spill] sm:$0xff] }
 0x4c2   : > { %3389 = vrot.lane.b32.xlu1 %v7410_v61, %s5434_s12  ;;  %v8690_v61 = vrot.slane %v7764_v26, 1  ;;  %v7792_v31 = vsel %vm1504_vm3, %v3593_v23, %v3595_v36  ;;  %v8840_v23 = vld [vmem:[#allocation58_spill] sm:$0xff] }
 0x4c4   : > { %3702 = vrot.lane.b32.xlu0 %v3635_v13, %s5435_s18 }
 0x4c6   : > { %3708 = vrot.lane.b32.xlu1 %v7413_v0, %s5435_s18  ;;  %v3369_v0 = vrot.slane %v7767_v19, 7 }
 0x4c8   : > { %3385 = vrot.lane.b32.xlu0 %v7416_v35, %s5434_s12  ;;  %v3637_v35 = vsel %vm1602_vm4, %v7422_v5, 0.0  ;;  %v7783_v34 = vsel %vm1273_vm2, %v3367_v62, %v3369_v0  ;;  %v7797_v5 = vsel %vm1504_vm3, %v3595_v36, %v8690_v61  ;;  %v8831_v62 = vld [vmem:[#allocation32_spill] sm:$0xff] }
 0x4ca   : > { %3387 = vrot.lane.b32.xlu1 %v7419_v59, %s5434_s12  ;;  %v7786_v59 = vsel %vm1273_vm2, %v3369_v0, %v3371_v60  ;;  %v8837_v60 = vld [vmem:[#allocation31_spill] sm:$0xff] }
 0x4cc   : > { %3706 = vrot.lane.b32.xlu0 %v3637_v35, %s5435_s18 }
 0x4ce   : > { %3704 = vrot.lane.b32.xlu1 %v7425_v58, %s5435_s18  ;;  %v3639_v58 = vsel %vm1602_vm4, %v7447_v46, 0.0  ;;  %v8834_v46 = vld [vmem:[#allocation33_spill] sm:$0xff] }
 0x4d0   : > { %3210 = vrot.lane.b32.xlu0 %v7435_v41, %s5433_s20 }
 0x4d2   : > { %3208 = vrot.lane.b32.xlu1 %v7427_v15, %s5433_s20 }
 0x4d4   : > { %3206 = vrot.lane.b32.xlu0 %v7439_v55, %s5433_s20 }
 0x4d6   : > { %3204 = vrot.lane.b32.xlu1 %v7431_v22, %s5433_s20 }
 0x4d8   : > { %3391 = vrot.lane.b32.xlu0 %v7444_v49, %s5434_s12  ;;  %v3641_v49 = vsel %vm1602_vm4, %v8832_v42, 0.0  ;;  %v8842_v42 = vld [vmem:[#allocation57_spill] sm:$0xff] }
 0x4da   : > { %3397 = vrot.lane.b32.xlu1 %v7450_v1, %s5434_s12 }
 0x4dc   : > { %3710 = vrot.lane.b32.xlu0 %v3639_v58, %s5435_s18  ;;  %v8841_v58 = vld [vmem:[#allocation37_spill] sm:$0xff] }
 0x4de   : > { %3716 = vrot.lane.b32.xlu1 %v7453_v45, %s5435_s18  ;;  %v8836_v45 = vld [vmem:[#allocation34_spill] sm:$0xff] }
 0x4e0   : > { %3393 = vrot.lane.b32.xlu0 %v7456_v44, %s5434_s12 }
 0x4e2   : > { %3395 = vrot.lane.b32.xlu1 %v8831_v62, %s5434_s12 }
 0x4e4   : > { %3714 = vrot.lane.b32.xlu0 %v3641_v49, %s5435_s18 }
 0x4e6   : > { %v7827_v1 = vpop.permute.xlu0 %2378  ;;  %3712 = vrot.lane.b32.xlu1 %v8834_v46, %s5435_s18  ;;  %v8844_v46 = vld [vmem:[#allocation55_spill] sm:$0xff] }
 0x4e7   : > { %8833 = vst [vmem:[#allocation32_spill] sm:$0xff] %v7827_v1 }
 0x4e8   : > { %v7831_v13 = vpop.permute.xlu1 %2380  ;;  %3218 = vrot.lane.b32.xlu0 %v8836_v45, %s5433_s20 }
 0x4e9   : > { %8835 = vst [vmem:[#allocation51_spill] sm:$0xff] %v7831_v13  ;;  %v8846_v13 = vld [vmem:[#allocation35_spill] sm:$0xff] }
 0x4ea   : > { %v7835_v44 = vpop.permute.xlu0 %2374  ;;  %3216 = vrot.lane.b32.xlu1 %v8837_v60, %s5433_s20  ;;  %v8850_v60 = vld [vmem:[#allocation44_spill] sm:$0xff] }
 0x4ec   : > { %v7839_v36 = vpop.permute.xlu1 %2376  ;;  %3214 = vrot.lane.b32.xlu0 %v8838_v48, %s5433_s20 }
 0x4ee   : > { %v7843_v0 = vpop.permute.xlu0 %2425  ;;  %3212 = vrot.lane.b32.xlu1 %v8840_v23, %s5433_s20 }
 0x4ef   : > { %8839 = vst [vmem:[#allocation33_spill] sm:$0xff] %v7843_v0  ;;  %v3643_v0 = vsel %vm1602_vm4, %v8846_v13, 0.0  ;;  %v8852_v13 = vld [vmem:[#allocation40_spill] sm:$0xff] }
 0x4f0   : > { %v7847_v35 = vpop.permute.xlu1 %2419  ;;  %3399 = vrot.lane.b32.xlu0 %v8841_v58, %s5434_s12 }
 0x4f2   : > { %v7851_v62 = vpop.permute.xlu0 %2421  ;;  %3724 = vrot.lane.b32.xlu1 %v8842_v42, %s5435_s18  ;;  %v8849_v42 = vld [vmem:[#allocation43_spill] sm:$0xff] }
 0x4f4   : > { %v7855_v49 = vpop.permute.xlu1 %2423  ;;  %3405 = vrot.lane.b32.xlu0 %v8844_v46, %s5434_s12  ;;  %v3645_v46 = vsel %vm1602_vm4, %v8850_v60, 0.0 }
 0x4f5   : > { %8843 = vst [vmem:[#allocation36_spill] sm:$0xff] %v7855_v49  ;;  %v8858_v49 = vld [vmem:[#allocation45_spill] sm:$0xff] }
 0x4f6   : > { %v7859_v61 = vpop.permute.xlu0 %2505  ;;  %3403 = vrot.lane.b32.xlu1 %v8845_v63, %s5434_s12 }
 0x4f8   : > { %v7866_v58 = vpop.permute.xlu1 %2507  ;;  %3718 = vrot.lane.b32.xlu0 %v3643_v0, %s5435_s18  ;;  %v8854_v0 = vld [vmem:[#allocation48_spill] sm:$0xff] }
 0x4f9   : > { %8847 = vst [vmem:[#allocation58_spill] sm:$0xff] %v7866_v58 }
 0x4fa   : > { %v7869_v1 = vpop.permute.xlu0 %2386  ;;  %3401 = vrot.lane.b32.xlu1 %v8849_v42, %s5434_s12  ;;  %v8856_v42 = vld [vmem:[#allocation59_spill] sm:$0xff] }
 0x4fb   : > { %8848 = vst [vmem:[#allocation37_spill] sm:$0xff] %v7869_v1 }
 0x4fc   : > { %v7876_v45 = vpop.permute.xlu1 %2503  ;;  %3722 = vrot.lane.b32.xlu0 %v3645_v46, %s5435_s18 }
 0x4fe   : > { %v7879_v63 = vpop.permute.xlu0 %2382  ;;  %3720 = vrot.lane.b32.xlu1 %v8852_v13, %s5435_s18 }
 0x4ff   : > { %8851 = vst [vmem:[#allocation57_spill] sm:$0xff] %v7879_v63  ;;  %v8860_v63 = vld [vmem:[#allocation60_spill] sm:$0xff] }
 0x500   : > { %v7883_v58 = vpop.permute.xlu1 %2384  ;;  %3226 = vrot.lane.b32.xlu0 %v8854_v0, %s5433_s20 }
 0x501   : > { %8853 = vst [vmem:[#allocation55_spill] sm:$0xff] %v7883_v58  ;;  %v8862_v58 = vld [vmem:[#allocation61_spill] sm:$0xff] }
 0x502   : > { %v7887_v1 = vpop.permute.xlu0 %2433  ;;  %3224 = vrot.lane.b32.xlu1 %v8856_v42, %s5433_s20  ;;  %v8865_v42 = vld [vmem:[#allocation47_spill] sm:$0xff] }
 0x503   : > { %8855 = vst [vmem:[#allocation38_spill] sm:$0xff] %v7887_v1  ;;  %v8863_v1 = vld [vmem:[#allocation46_spill] sm:$0xff] }
 0x504   : > { %v7891_v60 = vpop.permute.xlu1 %2427  ;;  %3222 = vrot.lane.b32.xlu0 %v8858_v49, %s5433_s20 }
 0x505   : > { %8857 = vst [vmem:[#allocation35_spill] sm:$0xff] %v7891_v60  ;;  %v3647_v60 = vsel %vm1602_vm4, %v8865_v42, 0.0 }
 0x506   : > { %v7895_v46 = vpop.permute.xlu0 %2509  ;;  %3220 = vrot.lane.b32.xlu1 %v8860_v63, %s5433_s20 }
 0x507   : > { %8859 = vst [vmem:[#allocation43_spill] sm:$0xff] %v7895_v46 }
 0x508   : > { %v7899_v13 = vpop.permute.xlu1 %2431  ;;  %3413 = vrot.lane.b32.xlu0 %v8862_v58, %s5434_s12  ;;  %v3649_v58 = vsel %vm1602_vm4, %v7590_v56, 0.0  ;;  %v8870_v56 = vld [vmem:[#allocation28_spill] sm:$0xff] }
 0x509   : > { %8861 = vst [vmem:[#allocation44_spill] sm:$0xff] %v7899_v13 }
 0x50a   : > { %3407 = vrot.lane.b32.xlu1 %v8863_v1, %s5434_s12  ;;  %v7905_v0 = vpop.permute.xlu0 %2429 }
 0x50b   : > { %8864 = vst [vmem:[#allocation40_spill] sm:$0xff] %v7905_v0 }
 0x50c   : > { %v7910_v49 = vpop.permute.xlu1 %2515  ;;  %3726 = vrot.lane.b32.xlu0 %v3647_v60, %s5435_s18 }
 0x50d   : > { %8866 = vst [vmem:[#allocation60_spill] sm:$0xff] %v7910_v49 }
 0x50e   : > { %3732 = vrot.lane.b32.xlu1 %v7580_v12, %s5435_s18  ;;  %v7915_v13 = vpop.permute.xlu0 %2517 }
 0x50f   : > { %8867 = vst [vmem:[#allocation61_spill] sm:$0xff] %v7915_v13 }
 0x510   : > { %v7917_v46 = vpop.permute.xlu1 %2511  ;;  %3411 = vrot.lane.b32.xlu0 %v7584_v39, %s5434_s12 }
 0x511   : > { %8868 = vst [vmem:[#allocation46_spill] sm:$0xff] %v7917_v46 }
 0x512   : > { %3409 = vrot.lane.b32.xlu1 %v7587_v28, %s5434_s12  ;;  %v7923_v1 = vpop.permute.xlu0 %2513 }
 0x513   : > { %8869 = vst [vmem:[#allocation47_spill] sm:$0xff] %v7923_v1  ;;  %v3651_v1 = vsel %vm1602_vm4, %v7599_v7, 0.0 }
 0x514   : > { %v7928_v42 = vpop.permute.xlu1 %3192  ;;  %3730 = vrot.lane.b32.xlu0 %v3649_v58, %s5435_s18 }
 0x516   : > { %3728 = vrot.lane.b32.xlu1 %v7593_v29, %s5435_s18  ;;  %v7933_v12 = vpop.permute.xlu0 %3194 }
 0x518   : > { %v3189_v60 = vpop.permute.xlu1 %3188  ;;  %3234 = vrot.lane.b32.xlu0 %v7618_v32, %s5433_s20 }
 0x519   : > { %v3280_v7 = vadd.f32 %v3189_v60, %v7391_v33 }
 0x51a   : > { %3232 = vrot.lane.b32.xlu1 %v7567_v6, %s5433_s20  ;;  %v3191_v39 = vpop.permute.xlu0 %3190 }
 0x51c   : > { %v3382_v28 = vpop.permute.xlu1 %3381  ;;  %3230 = vrot.lane.b32.xlu0 %v7628_v14, %s5433_s20 }
 0x51e   : > { %3228 = vrot.lane.b32.xlu1 %v8870_v56, %s5433_s20  ;;  %v3376_v58 = vpop.permute.xlu0 %3375 }
 0x51f   : > { %v3471_v29 = vsel %vm1273_vm2, 0.0, %v3376_v58 }
 0x520   : > { %v3701_v13 = vpop.permute.xlu1 %3700  ;;  %3421 = vrot.lane.b32.xlu0 %v7648_v20, %s5434_s12  ;;  %v3472_v0 = vsel %vm1434_vm5, %v3471_v29, 0.0 }
 0x521   : > { %v3504_v6 = vadd.f32 %v7351_v54, %v3472_v0 }
 0x522   : > { %3415 = vrot.lane.b32.xlu1 %v7596_v9, %s5434_s12  ;;  %v3378_v49 = vpop.permute.xlu0 %3377 }
 0x523   : > { %v3505_v32 = vadd.f32 %v7359_v38, %v3378_v49 }
 0x524   : > { %v3380_v46 = vpop.permute.xlu1 %3379  ;;  %3734 = vrot.lane.b32.xlu0 %v3651_v1, %s5435_s18 }
 0x525   : > { %v3474_v9 = vsel %vm1434_vm5, %v3380_v46, 0.0 }
 0x526   : > { %3740 = vrot.lane.b32.xlu1 %v7651_v53, %s5435_s18  ;;  %v3699_v20 = vpop.permute.xlu0 %3698  ;;  %v3506_v1 = vadd.f32 %v3474_v9, %v3280_v7  ;;  %v3653_v53 = vsel %vm1602_vm4, %v7666_v18, 0.0 }
 0x527   : > { %v3793_v58 = vadd.f32 %v3699_v20, %v3505_v32 }
 0x528   : > { %v3697_v14 = vpop.permute.xlu1 %3696  ;;  %3419 = vrot.lane.b32.xlu0 %v7657_v40, %s5434_s12  ;;  %v3794_v60 = vadd.f32 %v3701_v13, %v3506_v1 }
 0x529   : > { %v3792_v29 = vadd.f32 %v3697_v14, %v3504_v6  ;;  %v3857_v32 = vrot.slane %v3793_v58, 7  ;;  %v3953_v49 = vrot.slane %v3793_v58, 1 }
 0x52a   : > { %3417 = vrot.lane.b32.xlu1 %v7660_v21, %s5434_s12  ;;  %v7965_v38 = vpop.permute.xlu0 %3202 }
 0x52b   : > { %v3856_v54 = vrot.slane %v3792_v29, 7  ;;  %v3952_v0 = vrot.slane %v3792_v29, 1  ;;  %v4032_v20 = vsel %vm1504_vm3, %v3953_v49, -1e+30 }
 0x52c   : > { %v7970_v33 = vpop.permute.xlu1 %3200  ;;  %3738 = vrot.lane.b32.xlu0 %v3653_v53, %s5435_s18 }
 0x52d   : > { %v3858_v6 = vsel %vm1273_vm2, %v3856_v54, %v3857_v32  ;;  %v3936_v14 = vsel %vm1273_vm2, -1e+30, %v3856_v54  ;;  %v3954_v21 = vsel %vm1504_vm3, %v3952_v0, %v3953_v49  ;;  %v3281_v32 = vadd.f32 %v3191_v39, %v7399_v57 }
 0x52e   : > { %v4048_v40 = vmax.f32 %v3936_v14, %v3792_v29  ;;  %v4049_v46 = vmax.f32 %v3858_v6, %v3793_v58  ;;  %3736 = vrot.lane.b32.xlu1 %v7669_v8, %s5435_s18  ;;  %v7978_v18 = vpop.permute.xlu0 %3198  ;;  %v3859_v29 = vrot.slane %v3794_v60, 7  ;;  %v3955_v57 = vrot.slane %v3794_v60, 1 }
 0x52f   : > { %v3507_v8 = vadd.f32 %v3382_v28, %v3281_v32  ;;  %v3283_v28 = vadd.f32 %v7395_v50, %v7933_v12  ;;  %v8872_v32 = vld [vmem:[#allocation65_spill] sm:$0xff]  ;;  %v3282_v50 = vadd.f32 %v7387_v47, %v7928_v42 }
 0x530   : > { %v4080_v9 = vmax.f32 %v4048_v40, %v3954_v21  ;;  %v3197_v7 = vpop.permute.xlu1 %3196  ;;  %3242 = vrot.lane.b32.xlu0 %v7693_v52, %s5433_s20  ;;  %v4081_v53 = vmax.f32 %v4049_v46, %v4032_v20  ;;  %v3937_v1 = vsel %vm1273_vm2, -1e+30, %v3859_v29  ;;  %v8871_v21 = vld [vmem:[#allocation64_spill] sm:$0xff] }
 0x531   : > { %v4050_v14 = vmax.f32 %v3937_v1, %v3794_v60 }
 0x532   : > { %3240 = vrot.lane.b32.xlu1 %v7640_v37, %s5433_s20  ;;  %v3384_v58 = vpop.permute.xlu0 %3383 }
 0x534   : > { %v7986_v54 = vpop.permute.xlu1 %3389  ;;  %3238 = vrot.lane.b32.xlu0 %v7698_v11, %s5433_s20 }
 0x536   : > { %3236 = vrot.lane.b32.xlu1 %v7645_v17, %s5433_s20  ;;  %v3703_v13 = vpop.permute.xlu0 %3702 }
 0x537   : > { %v3795_v49 = vadd.f32 %v3703_v13, %v3507_v8  ;;  %v3655_v8 = vsel %vm1602_vm4, %v8872_v32, 0.0 }
 0x538   : > { %v3709_v0 = vpop.permute.xlu1 %3708  ;;  %3429 = vrot.lane.b32.xlu0 %v7718_v30, %s5434_s12  ;;  %v3476_v30 = vsel %vm1434_vm5, %v3384_v58, 0.0 }
 0x539   : > { %v3860_v39 = vrot.slane %v3795_v49, 7  ;;  %v3956_v6 = vrot.slane %v3795_v49, 1 }
 0x53a   : > { %3423 = vrot.lane.b32.xlu1 %v8871_v21, %s5434_s12  ;;  %v3386_v40 = vpop.permute.xlu0 %3385  ;;  %v8873_v21 = vld [vmem:[#allocation54_spill] sm:$0xff] }
 0x53b   : > { %v3861_v46 = vsel %vm1273_vm2, %v3859_v29, %v3860_v39  ;;  %v3957_v20 = vsel %vm1504_vm3, %v3955_v57, %v3956_v6  ;;  %v4033_v12 = vsel %vm1504_vm3, %v3956_v6, -1e+30  ;;  %v3509_v29 = vadd.f32 %v3386_v40, %v3283_v28 }
 0x53c   : > { %v4051_v13 = vmax.f32 %v3861_v46, %v3795_v49  ;;  %v8006_v60 = vmax.f32 %v4050_v14, %v3957_v20  ;;  %v3388_v1 = vpop.permute.xlu1 %3387  ;;  %3742 = vrot.lane.b32.xlu0 %v3655_v8, %s5435_s18  ;;  %v3508_v49 = vadd.f32 %v3476_v30, %v3282_v50  ;;  %v3284_v20 = vadd.f32 %v3197_v7, %v7431_v22 }
 0x53d   : > { %v3478_v14 = vsel %vm1434_vm5, %v3388_v1, 0.0  ;;  %v3657_v22 = vsel %vm1602_vm4, %v7732_v3, 0.0 }
 0x53e   : > { %v8012_v57 = vmax.f32 %v4051_v13, %v4033_v12  ;;  %v4112_v39 = vmax.f32 %v4080_v9, %v8006_v60  ;;  %3748 = vrot.lane.b32.xlu1 %v8873_v21, %s5435_s18  ;;  %v3707_v58 = vpop.permute.xlu0 %3706  ;;  %v3510_v28 = vadd.f32 %v3478_v14, %v3284_v20  ;;  %v8874_v14 = vld [vmem:[#allocation67_spill] sm:$0xff] }
 0x53f   : > { %v3797_v46 = vadd.f32 %v3707_v58, %v3509_v29 }
 0x540   : > { %v4113_v47 = vmax.f32 %v4081_v53, %v8012_v57  ;;  %v4128_v42 = vmax.f32 %v4112_v39, -1e+30  ;;  %v3705_v6 = vpop.permute.xlu1 %3704  ;;  %3427 = vrot.lane.b32.xlu0 %v7724_v25, %s5434_s12  ;;  %v3798_v29 = vadd.f32 %v3709_v0, %v3510_v28  ;;  %v2443_v0 = vsel %vm1273_vm2, 0.0, %v7847_v35 }
 0x541   : > { %v3796_v40 = vadd.f32 %v3705_v6, %v3508_v49  ;;  %v3863_v7 = vrot.slane %v3797_v46, 7  ;;  %v3959_v53 = vrot.slane %v3797_v46, 1  ;;  %v3659_v35 = vsel %vm1602_vm4, %v7741_v51, 0.0 }
 0x542   : > { %v4129_v9 = vmax.f32 %v4113_v47, -1e+30  ;;  %4144 = vst.msk [vmem:[#allocation2] sm:$0xff] %vm2119_vm7, %v4128_v42  ;;  %3425 = vrot.lane.b32.xlu1 %v7727_v24, %s5434_s12  ;;  %v8026_v32 = vpop.permute.xlu0 %3210  ;;  %v3865_v20 = vrot.slane %v3798_v29, 7 }
 0x543   : > { %v3862_v8 = vrot.slane %v3796_v40, 7  ;;  %v3958_v30 = vrot.slane %v3796_v40, 1  ;;  %v4034_v39 = vsel %vm1504_vm3, %v3959_v53, -1e+30 }
 0x544   : > { %4145 = vst.msk [vmem:[#allocation2 + $0x8] sm:$0xff] %vm2119_vm7, %v4129_v9  ;;  %v8032_v25 = vpop.permute.xlu1 %3208  ;;  %3746 = vrot.lane.b32.xlu0 %v3657_v22, %s5435_s18  ;;  %v2535_v9 = vld [vmem:[#allocation14] sm:$0x3] }
 0x545   : > { %v3864_v13 = vsel %vm1273_vm2, %v3862_v8, %v3863_v7  ;;  %v3938_v24 = vsel %vm1273_vm2, -1e+30, %v3862_v8  ;;  %v3960_v1 = vsel %vm1504_vm3, %v3958_v30, %v3959_v53  ;;  %v8875_v7 = vld [vmem:[#allocation29_spill] sm:$0xff] }
 0x546   : > { %v4052_v50 = vmax.f32 %v3938_v24, %v3796_v40  ;;  %v4053_v12 = vmax.f32 %v3864_v13, %v3797_v46  ;;  %3744 = vrot.lane.b32.xlu1 %v7735_v27, %s5435_s18  ;;  %v8040_v3 = vpop.permute.xlu0 %3206  ;;  %v3285_v27 = vadd.f32 %v7978_v18, %v7439_v55  ;;  %v2444_v40 = vsel %vm1434_vm5, %v2443_v0, 0.0  ;;  %v8876_v8 = vld [vmem:[#allocation53_spill] sm:$0xff]  ;;  %v8877_v24 = vld [vmem:[#allocation50_spill] sm:$0xff] }
 0x547   : > { %v3939_v55 = vsel %vm1273_vm2, -1e+30, %v3865_v20  ;;  %v8075_v53 = vrot.slane %v2535_v9, %v8875_v7  ;;  %v2452_v30 = vadd.f32 %v2444_v40, %v8876_v8 }
 0x548   : > { %v4084_v21 = vmax.f32 %v4052_v50, %v3960_v1  ;;  %v8043_v58 = vpop.permute.xlu1 %3204  ;;  %3246 = vrot.lane.b32.xlu0 %v7767_v19, %s5433_s20  ;;  %v8047_v49 = vmax.f32 %v4053_v12, %v4034_v39  ;;  %v3511_v42 = vadd.f32 %v7986_v54, %v3285_v27  ;;  %v4054_v13 = vmax.f32 %v3939_v55, %v3798_v29  ;;  %v4168_v12 = vld [vmem:[#allocation18] sm:$0x3] }
 0x549   : > { %v2396_v1 = vadd.f32 %v8877_v24, %v7835_v44  ;;  %v3287_v50 = vadd.f32 %v7435_v41, %v7965_v38  ;;  %v2527_v27 = vadd.f32 %v7876_v45, %v2452_v30  ;;  %v3286_v41 = vadd.f32 %v7427_v15, %v7970_v33 }
 0x54a   : > { %3244 = vrot.lane.b32.xlu1 %v8874_v14, %s5433_s20  ;;  %v3392_v46 = vpop.permute.xlu0 %3391  ;;  %s490_s20 = scalar_lea.vmem [#allocation20], %s4561_s26 }
 0x54c   : > { %v8055_v47 = vpop.permute.xlu1 %3397  ;;  %3437 = vrot.lane.b32.xlu0 %v7780_v43, %s5434_s12  ;;  %v3961_v43 = vrot.slane %v3798_v29, 1  ;;  %v3480_v29 = vsel %vm1434_vm5, %v3392_v46, 0.0 }
 0x54d   : > { %v3512_v15 = vadd.f32 %v3480_v29, %v3286_v41 }
 0x54e   : > { %3431 = vrot.lane.b32.xlu1 %v7738_v2, %s5434_s12  ;;  %v3711_v6 = vpop.permute.xlu0 %3710  ;;  %v2445_v2 = vsel %vm1434_vm5, %v7851_v62, 0.0 }
 0x54f   : > { %v3799_v18 = vadd.f32 %v3711_v6, %v3511_v42  ;;  %v2453_v44 = vadd.f32 %v2445_v2, %v2396_v1  ;;  %v8097_v6 = vrot.slane %v4168_v12, %v8875_v7 }
 0x550   : > { %v8068_v28 = vpop.permute.xlu1 %3716  ;;  %3750 = vrot.lane.b32.xlu0 %v3659_v35, %s5435_s18  ;;  %v3661_v35 = vsel %vm1602_vm4, %v7792_v31, 0.0 }
 0x551   : > { %v3866_v54 = vrot.slane %v3799_v18, 7  ;;  %v3962_v22 = vrot.slane %v3799_v18, 1  ;;  %v2528_v7 = vadd.f32 %v7859_v61, %v2453_v44 }
 0x552   : > { %3433 = vrot.lane.b32.xlu1 %v7783_v34, %s5434_s12  ;;  %v3394_v51 = vpop.permute.xlu0 %3393 }
 0x553   : > { %v3867_v39 = vsel %vm1273_vm2, %v3865_v20, %v3866_v54  ;;  %v3963_v62 = vsel %vm1504_vm3, %v3961_v43, %v3962_v22  ;;  %v4035_v38 = vsel %vm1504_vm3, %v3962_v22, -1e+30  ;;  %v3513_v20 = vadd.f32 %v3394_v51, %v3287_v50  ;;  %v8879_v43 = vld [vmem:[#allocation30_spill] sm:$0xff] }
 0x554   : > { %v4055_v0 = vmax.f32 %v3867_v39, %v3799_v18  ;;  %v8089_v42 = vmax.f32 %v4054_v13, %v3963_v62  ;;  %v3396_v34 = vpop.permute.xlu1 %3395  ;;  %3435 = vrot.lane.b32.xlu0 %v7786_v59, %s5434_s12  ;;  %v8878_v59 = vrot.slane %v7764_v26, 1  ;;  %v4160_v18 = vld [vmem:[#allocation2] ss:$2 sm:$0xff]  ;;  %v8111_v54 = vrot.slane %v2535_v9, %v8879_v43  ;;  %s4379_s12 = sshll.u32 %s490_s20, 4  ;;  %s8579_s12 = int_to_ptr.vmem [resolvable:$true] %s4379_s12 }
 0x555   : > { %v8122_v31 = vrot.slane %v4168_v12, %v8879_v43  ;;  %v4173_v9 = vmul.f32 %v8097_v6, %v4160_v18  ;;  %v3288_v13 = vadd.f32 %v8043_v58, %v8840_v23  ;;  %v2541_v39 = vmul.f32 %v8075_v53, %v2528_v7  ;;  %s5333_s19 = scalar_lea.vmem %s8579_s12, 128 }
 0x556   : > { %v8099_v45 = vmax.f32 %v4055_v0, %v4035_v38  ;;  %v4114_v46 = vmax.f32 %v4084_v21, %v8089_v42  ;;  %3752 = vrot.lane.b32.xlu1 %v7789_v16, %s5435_s18  ;;  %v3715_v40 = vpop.permute.xlu0 %3714  ;;  %v3631_v55 = vsel %vm1504_vm3, %v8878_v59, 0.0  ;;  %v2540_v21 = vmul.f32 %v8075_v53, %v2527_v27  ;;  %p5334_p1 = scmp.ne.s32.totalorder %s8579_s12, %s5333_s19 }
 0x557   : > { %v3801_v33 = vadd.f32 %v3715_v40, %v3513_v20  ;;  %v3663_v30 = vsel %vm1602_vm4, %v3631_v55, 0.0  ;;  %v2553_v40 = vadd.f32 %v8111_v54, %v2541_v39  ;;  %vm4359_vm4 = vcmask 392192  }
 0x558   : > { %v4115_v16 = vmax.f32 %v8047_v49, %v8099_v45  ;;  %v4130_v22 = vmax.f32 %v4114_v46, %v8006_v60  ;;  %v3713_v2 = vpop.permute.xlu1 %3712  ;;  %3754 = vrot.lane.b32.xlu0 %v3661_v35, %s5435_s18  ;;  %v3482_v60 = vsel %vm1434_vm5, %v3396_v34, 0.0  ;;  %v2552_v50 = vadd.f32 %v8111_v54, %v2540_v21  ;;  %v8880_v35 = vld [vmem:[#allocation52_spill] sm:$0xff]  ;;  %p5335_p2 = pnand %p5334_p1, %p8912_p3 }
 0x559   : > { %v3800_v8 = vadd.f32 %v3713_v2, %v3512_v15  ;;  %v3869_v61 = vrot.slane %v3801_v33, 7  ;;  %v3965_v51 = vrot.slane %v3801_v33, 1  ;;  %v4185_v34 = vadd.f32 %v8122_v31, %v4173_v9 }
 0x55a   : > { %v4131_v49 = vmax.f32 %v4115_v16, %v8012_v57  ;;  %4146 = vst.msk [vmem:[#allocation2 + $0x10] sm:$0xff] %vm2119_vm7, %v4130_v22  ;;  %3756 = vrot.lane.b32.xlu1 %v7797_v5, %s5435_s18  ;;  %v8133_v4 = vpop.permute.xlu0 %3218  ;;  %v3514_v57 = vadd.f32 %v3482_v60, %v3288_v13  ;;  %v2560_v20 = vmax.f32 %v2552_v50, 0.0  ;;  %v2397_v43 = vadd.f32 %v8880_v35, %v7839_v36  ;;  %v8881_v22 = vld [vmem:[#allocation36_spill] sm:$0xff]  ;;  %v8883_v13 = vld [vmem:[#allocation31_spill] sm:$0xff]  ;;  %p5336_p8 = pneg %p5335_p2 }
 0x55b   : > { %v3868_v24 = vrot.slane %v3800_v8, 7  ;;  %v3964_v1 = vrot.slane %v3800_v8, 1  ;;  %v4036_v0 = vsel %vm1504_vm3, %v3965_v51, -1e+30  ;;  %v3289_v21 = vadd.f32 %v8040_v3, %v8838_v48 }
 0x55c   : > { %4147 = vst.msk [vmem:[#allocation2 + $0x18] sm:$0xff] %vm2119_vm7, %v4131_v49  ;;  %v8137_v23 = vpop.permute.xlu1 %3216  ;;  %3758 = vrot.lane.b32.xlu0 %v3663_v30, %s5435_s18  ;;  %v3802_v46 = vadd.f32 %v8068_v28, %v3514_v57  ;;  %v8154_v18 = vadd.f32 %v4185_v34, %v2560_v20  ;;  %v2446_v28 = vsel %vm1434_vm5, %v8881_v22, 0.0  ;;  %v2561_v2 = vmax.f32 %v2553_v40, 0.0  ;;  %v8882_v30 = vld [vmem:[#allocation34_spill] sm:$0xff] }
 0x55d   : > { %v3870_v58 = vsel %vm1273_vm2, %v3868_v24, %v3869_v61  ;;  %v3940_v12 = vsel %vm1273_vm2, -1e+30, %v3868_v24  ;;  %v3966_v5 = vsel %vm1504_vm3, %v3964_v1, %v3965_v51  ;;  %v3291_v9 = vadd.f32 %v8882_v30, %v8026_v32 }
 0x55e   : > { %v4056_v62 = vmax.f32 %v3940_v12, %v3800_v8  ;;  %v4057_v27 = vmax.f32 %v3870_v58, %v3801_v33  ;;  %v8144_v29 = vpop.permute.xlu0 %3214  ;;  %v3871_v16 = vrot.slane %v3802_v46, 7  ;;  %v3290_v36 = vadd.f32 %v8883_v13, %v8032_v25 }
 0x55f   : > { %v3515_v49 = vadd.f32 %v8055_v47, %v3289_v21  ;;  %v4248_v48 = vrot.slane %v8154_v18, 2  ;;  %v4231_v61 = vrot.slane %v8154_v18, 1  ;;  %v4282_v51 = vrot.slane %v8154_v18, 4 }
 0x560   : > { %v8148_v44 = vmax.f32 %v4056_v62, %v3966_v5  ;;  %v3213_v41 = vpop.permute.xlu1 %3212  ;;  %v8150_v38 = vmax.f32 %v4057_v27, %v4036_v0  ;;  %v4265_v24 = vrot.slane %v8154_v18, 3  ;;  %v3941_v1 = vsel %vm1273_vm2, -1e+30, %v3871_v16 }
 0x561   : > { %v4316_v50 = vrot.slane %v8154_v18, 6  ;;  %v4299_v32 = vrot.slane %v8154_v18, 5  ;;  %v4333_v25 = vrot.slane %v8154_v18, 7  ;;  %v3967_v34 = vrot.slane %v3802_v46, 1 }
 0x562   : > { %v3400_v59 = vpop.permute.xlu0 %3399 }
 0x563   : > { %v4161_v55 = vld [vmem:[#allocation2 + $0x10] ss:$2 sm:$0xff]  ;;  %v3484_v47 = vsel %vm1434_vm5, %v3400_v59, 0.0 }
 0x564   : > { %v4174_v15 = vmul.f32 %v8097_v6, %v4161_v55  ;;  %v8157_v33 = vpop.permute.xlu1 %3724 }
 0x566   : > { %v8166_v7 = vpop.permute.xlu0 %3405  ;;  %v4186_v8 = vadd.f32 %v8122_v31, %v4174_v15 }
 0x568   : > { %v3404_v3 = vpop.permute.xlu1 %3403  ;;  %v4194_v60 = vadd.f32 %v4186_v8, %v2561_v2  ;;  %v4058_v2 = vmax.f32 %v3941_v1, %v3802_v46  ;;  %v3516_v8 = vadd.f32 %v3484_v47, %v3290_v36 }
 0x56a   : > { %v3719_v57 = vpop.permute.xlu0 %3718  ;;  %v4249_v58 = vrot.slane %v4194_v60, 1  ;;  %v8185_v12 = vsel %vm4210_vm9, %v4194_v60, %v4231_v61  ;;  %v4283_v5 = vrot.slane %v4194_v60, 3  ;;  %v4266_v62 = vrot.slane %v4194_v60, 2 }
 0x56b   : > { %v3803_v39 = vadd.f32 %v3719_v57, %v3515_v49  ;;  %v4317_v27 = vrot.slane %v4194_v60, 5  ;;  %v4300_v0 = vrot.slane %v4194_v60, 4  ;;  %v4334_v15 = vrot.slane %v4194_v60, 6 }
 0x56c   : > { %v3402_v20 = vpop.permute.xlu1 %3401  ;;  %v8188_v40 = vsel %vm4210_vm9, %v4249_v58, %v4248_v48  ;;  %v8191_v55 = vsel %vm4210_vm9, %v4283_v5, %v4282_v51  ;;  %v8194_v22 = vsel %vm4210_vm9, %v4266_v62, %v4265_v24  ;;  %v3486_v48 = vsel %vm1434_vm5, %v3404_v3, 0.0 }
 0x56d   : > { %v3872_v59 = vrot.slane %v3803_v39, 7  ;;  %v3968_v35 = vrot.slane %v3803_v39, 1  ;;  %v3517_v21 = vadd.f32 %v3402_v20, %v3291_v9  ;;  %v8197_v13 = vsel %vm4210_vm9, %v4317_v27, %v4316_v50 }
 0x56e   : > { %v3723_v30 = vpop.permute.xlu0 %3722  ;;  %v8200_v49 = vsel %vm4210_vm9, %v4300_v0, %v4299_v32  ;;  %v3292_v24 = vadd.f32 %v3213_v41, %v8860_v63  ;;  %v8210_v1 = vsel %vm4210_vm9, %v4334_v15, %v4333_v25  ;;  %v2454_v50 = vadd.f32 %v2446_v28, %v2397_v43 }
 0x56f   : > { %v3873_v61 = vsel %vm1273_vm2, %v3871_v16, %v3872_v59  ;;  %v3969_v51 = vsel %vm1504_vm3, %v3967_v34, %v3968_v35  ;;  %v3805_v9 = vadd.f32 %v3723_v30, %v3517_v21  ;;  %v4037_v32 = vsel %vm1504_vm3, %v3968_v35, -1e+30  ;;  %v8884_v34 = vld [vmem:[#allocation58_spill] sm:$0xff] }
 0x570   : > { %v4059_v57 = vmax.f32 %v3873_v61, %v3803_v39  ;;  %v8207_v46 = vmax.f32 %v4058_v2, %v3969_v51  ;;  %v3721_v36 = vpop.permute.xlu1 %3720  ;;  %v3518_v58 = vadd.f32 %v3486_v48, %v3292_v24  ;;  %v4209_v63 = vrot.slane %v4194_v60, 7 }
 0x571   : > { %v3804_v47 = vadd.f32 %v3721_v36, %v3516_v8  ;;  %v3875_v41 = vrot.slane %v3805_v9, 7  ;;  %v3971_v39 = vrot.slane %v3805_v9, 1 }
 0x572   : > { %v8213_v3 = vmax.f32 %v4059_v57, %v4037_v32  ;;  %v4116_v16 = vmax.f32 %v8148_v44, %v8207_v46  ;;  %v8217_v5 = vpop.permute.xlu0 %3226  ;;  %v8226_v0 = vsel %vm4210_vm9, %v4209_v63, %v8154_v18  ;;  %v2529_v44 = vadd.f32 %v8884_v34, %v2454_v50 }
 0x573   : > { %v3874_v62 = vrot.slane %v3804_v47, 7  ;;  %v3970_v27 = vrot.slane %v3804_v47, 1  ;;  %v3806_v21 = vadd.f32 %v8157_v33, %v3518_v58  ;;  %v4038_v18 = vsel %vm1504_vm3, %v3971_v39, -1e+30  ;;  %v8886_v58 = vld [vmem:[#allocation39_spill] sm:$0xff] }
 0x574   : > { %v4117_v25 = vmax.f32 %v8150_v38, %v8213_v3  ;;  %v4132_v43 = vmax.f32 %v4116_v16, %v8089_v42  ;;  %v8222_v28 = vpop.permute.xlu1 %3224  ;;  %v2542_v48 = vmul.f32 %v8075_v53, %v2529_v44  ;;  %v8887_v16 = vld [vmem:[#allocation32_spill] sm:$0xff] }
 0x575   : > { %v3876_v20 = vsel %vm1273_vm2, %v3874_v62, %v3875_v41  ;;  %v3942_v60 = vsel %vm1273_vm2, -1e+30, %v3874_v62  ;;  %v3972_v15 = vsel %vm1504_vm3, %v3970_v27, %v3971_v39  ;;  %v3877_v24 = vrot.slane %v3806_v21, 7  ;;  %v8888_v41 = vld [vmem:[#allocation33_spill] sm:$0xff] }
 0x576   : > { %v4133_v59 = vmax.f32 %v4117_v25, %v8099_v45  ;;  %4148 = vst.msk [vmem:[#allocation2 + $0x20] sm:$0xff] %vm2119_vm7, %v4132_v43  ;;  %v4060_v38 = vmax.f32 %v3942_v60, %v3804_v47  ;;  %v4061_v42 = vmax.f32 %v3876_v20, %v3805_v9  ;;  %v8234_v35 = vpop.permute.xlu0 %3222  ;;  %v8885_v45 = vld [vmem:[#allocation45_spill] sm:$0xff]  ;;  %v2554_v57 = vadd.f32 %v8111_v54, %v2542_v48 }
 0x577   : > { %v3293_v51 = vadd.f32 %v8144_v29, %v8885_v45  ;;  %v3943_v50 = vsel %vm1273_vm2, -1e+30, %v3877_v24  ;;  %v2398_v63 = vadd.f32 %v8887_v16, %v8886_v58  ;;  %v2447_v39 = vsel %vm1434_vm5, %v8888_v41, 0.0 }
 0x578   : > { %4149 = vst.msk [vmem:[#allocation2 + $0x28] sm:$0xff] %vm2119_vm7, %v4133_v59  ;;  %v4092_v2 = vmax.f32 %v4060_v38, %v3972_v15  ;;  %v3221_v8 = vpop.permute.xlu1 %3220  ;;  %v4093_v30 = vmax.f32 %v4061_v42, %v4038_v18  ;;  %v2562_v27 = vmax.f32 %v2554_v57, 0.0  ;;  %v3973_v25 = vrot.slane %v3806_v21, 1  ;;  %v8889_v15 = vld [vmem:[#allocation48_spill] sm:$0xff]  ;;  %v8890_v38 = vld [vmem:[#allocation59_spill] sm:$0xff] }
 0x579   : > { %v3519_v33 = vadd.f32 %v8166_v7, %v3293_v51  ;;  %v4062_v7 = vmax.f32 %v3943_v50, %v3806_v21  ;;  %v3295_v59 = vadd.f32 %v8889_v15, %v8133_v4  ;;  %v3294_v42 = vadd.f32 %v8890_v38, %v8137_v23 }
 0x57a   : > { %v8240_v61 = vpop.permute.xlu0 %3413  ;;  %v2455_v45 = vadd.f32 %v2447_v39, %v2398_v63 }
 0x57c   : > { %v3408_v9 = vpop.permute.xlu1 %3407 }
 0x57d   : > { %v3488_v44 = vsel %vm1434_vm5, %v3408_v9, 0.0 }
 0x57e   : > { %v3727_v36 = vpop.permute.xlu0 %3726 }
 0x57f   : > { %v3807_v32 = vadd.f32 %v3727_v36, %v3519_v33  ;;  %v4162_v47 = vld [vmem:[#allocation2 + $0x20] ss:$2 sm:$0xff]  ;;  %v3296_v33 = vadd.f32 %v3221_v8, %v8870_v56  ;;  %v3520_v36 = vadd.f32 %v3488_v44, %v3294_v42 }
 0x580   : > { %v3733_v62 = vpop.permute.xlu1 %3732  ;;  %v4175_v29 = vmul.f32 %v8097_v6, %v4162_v47  ;;  %v8891_v8 = vld [vmem:[#allocation43_spill] sm:$0xff] }
 0x581   : > { %v3878_v43 = vrot.slane %v3807_v32, 7  ;;  %v3974_v34 = vrot.slane %v3807_v32, 1  ;;  %v2530_v39 = vadd.f32 %v8891_v8, %v2455_v45 }
 0x582   : > { %v3412_v20 = vpop.permute.xlu0 %3411  ;;  %v4187_v60 = vadd.f32 %v8122_v31, %v4175_v29 }
 0x583   : > { %v3879_v18 = vsel %vm1273_vm2, %v3877_v24, %v3878_v43  ;;  %v3975_v48 = vsel %vm1504_vm3, %v3973_v25, %v3974_v34  ;;  %v4039_v50 = vsel %vm1504_vm3, %v3974_v34, -1e+30  ;;  %v3490_v24 = vsel %vm1434_vm5, %v3412_v20, 0.0 }
 0x584   : > { %v4063_v51 = vmax.f32 %v3879_v18, %v3807_v32  ;;  %v8262_v21 = vmax.f32 %v4062_v7, %v3975_v48  ;;  %v3410_v57 = vpop.permute.xlu1 %3409  ;;  %v4195_v9 = vadd.f32 %v4187_v60, %v2562_v27 }
 0x585   : > { %v3521_v47 = vadd.f32 %v3410_v57, %v3295_v59 }
 0x586   : > { %v8266_v4 = vmax.f32 %v4063_v51, %v4039_v50  ;;  %v4118_v23 = vmax.f32 %v4092_v2, %v8262_v21  ;;  %v3731_v58 = vpop.permute.xlu0 %3730  ;;  %v8273_v32 = vsel %vm4213_vm10, %v4195_v9, %v8188_v40  ;;  %v4233_v63 = vrot.slane %v4195_v9, 7 }
 0x587   : > { %v3809_v16 = vadd.f32 %v3731_v58, %v3521_v47  ;;  %v4285_v41 = vrot.slane %v4195_v9, 2  ;;  %v4268_v56 = vrot.slane %v4195_v9, 1  ;;  %v3522_v2 = vadd.f32 %v3490_v24, %v3296_v33 }
 0x588   : > { %v4119_v29 = vmax.f32 %v4093_v30, %v8266_v4  ;;  %v4134_v27 = vmax.f32 %v4118_v23, %v8207_v46  ;;  %v3729_v25 = vpop.permute.xlu1 %3728  ;;  %v8280_v34 = vsel %vm4213_vm10, %v4233_v63, %v8185_v12  ;;  %v2543_v12 = vmul.f32 %v8075_v53, %v2530_v39 }
 0x589   : > { %v3808_v43 = vadd.f32 %v3729_v25, %v3520_v36  ;;  %v8288_v44 = vsel %vm4213_vm10, %v4285_v41, %v8191_v55  ;;  %v4269_v46 = vsel %vm4213_vm10, %v4268_v56, %v8194_v22  ;;  %v3881_v30 = vrot.slane %v3809_v16, 7  ;;  %v8895_v25 = vld [vmem:[#allocation51_spill] sm:$0xff] }
 0x58a   : > { %v4135_v40 = vmax.f32 %v4119_v29, %v8213_v3  ;;  %4150 = vst.msk [vmem:[#allocation2 + $0x30] sm:$0xff] %vm2119_vm7, %v4134_v27  ;;  %v8284_v7 = vpop.permute.xlu0 %3234  ;;  %v3977_v20 = vrot.slane %v3809_v16, 1  ;;  %v4319_v59 = vrot.slane %v4195_v9, 4  ;;  %v4302_v38 = vrot.slane %v4195_v9, 3 }
 0x58b   : > { %v3880_v60 = vrot.slane %v3808_v43, 7  ;;  %v3976_v15 = vrot.slane %v3808_v43, 1  ;;  %v4336_v42 = vrot.slane %v4195_v9, 5  ;;  %v3810_v18 = vadd.f32 %v3733_v62, %v3522_v2 }
 0x58c   : > { %4151 = vst.msk [vmem:[#allocation2 + $0x38] sm:$0xff] %vm2119_vm7, %v4135_v40  ;;  %v8294_v3 = vpop.permute.xlu1 %3232  ;;  %v4320_v33 = vsel %vm4213_vm10, %v4319_v59, %v8197_v13  ;;  %v8305_v36 = vsel %vm4213_vm10, %v4302_v38, %v8200_v49  ;;  %v4040_v50 = vsel %vm1504_vm3, %v3977_v20, -1e+30  ;;  %v4212_v47 = vrot.slane %v4195_v9, 6  ;;  %v8892_v49 = vld [vmem:[#allocation63_spill] sm:$0xff] }
 0x58d   : > { %v3882_v55 = vsel %vm1273_vm2, %v3880_v60, %v3881_v30  ;;  %v3944_v48 = vsel %vm1273_vm2, -1e+30, %v3880_v60  ;;  %v3978_v22 = vsel %vm1504_vm3, %v3976_v15, %v3977_v20  ;;  %v8310_v62 = vsel %vm4213_vm10, %v4336_v42, %v8210_v1  ;;  %v8893_v9 = vld [vmem:[#allocation35_spill] sm:$0xff]  ;;  %v8896_v15 = vld [vmem:[#allocation49_spill] sm:$0xff] }
 0x58e   : > { %v4064_v45 = vmax.f32 %v3944_v48, %v3808_v43  ;;  %v4065_v51 = vmax.f32 %v3882_v55, %v3809_v16  ;;  %v8299_v57 = vpop.permute.xlu0 %3230  ;;  %v8314_v16 = vsel %vm4213_vm10, %v4212_v47, %v8226_v0  ;;  %v2555_v13 = vadd.f32 %v8111_v54, %v2543_v12  ;;  %v8894_v0 = vld [vmem:[#allocation56_spill] sm:$0xff] }
 0x58f   : > { %v3883_v63 = vrot.slane %v3810_v18, 7  ;;  %v3297_v56 = vadd.f32 %v8234_v35, %v8892_v49  ;;  %v2448_v29 = vsel %vm1434_vm5, %v8893_v9, 0.0  ;;  %v2399_v2 = vadd.f32 %v8895_v25, %v8894_v0  ;;  %v8897_v49 = vld [vmem:[#allocation62_spill] sm:$0xff] }
 0x590   : > { %v4096_v23 = vmax.f32 %v4064_v45, %v3978_v22  ;;  %v3229_v24 = vpop.permute.xlu1 %3228  ;;  %v4097_v58 = vmax.f32 %v4065_v51, %v4040_v50  ;;  %v2563_v43 = vmax.f32 %v2555_v13, 0.0  ;;  %v3298_v12 = vadd.f32 %v8896_v15, %v8222_v28 }
 0x591   : > { %v3523_v27 = vadd.f32 %v8240_v61, %v3297_v56  ;;  %v3945_v40 = vsel %vm1273_vm2, -1e+30, %v3883_v63  ;;  %v2456_v60 = vadd.f32 %v2448_v29, %v2399_v2  ;;  %v3979_v42 = vrot.slane %v3810_v18, 1 }
 0x592   : > { %v8317_v41 = vpop.permute.xlu0 %3421  ;;  %v4066_v55 = vmax.f32 %v3945_v40, %v3810_v18  ;;  %v3299_v56 = vadd.f32 %v8897_v49, %v8217_v5  ;;  %v3300_v15 = vadd.f32 %v3229_v24, %v7645_v17 }
 0x593   : > { %v4163_v8 = vld [vmem:[#allocation2 + $0x30] ss:$2 sm:$0xff] }
 0x594   : > { %v3416_v39 = vpop.permute.xlu1 %3415  ;;  %v4176_v1 = vmul.f32 %v8097_v6, %v4163_v8 }
 0x595   : > { %v3492_v59 = vsel %vm1434_vm5, %v3416_v39, 0.0 }
 0x596   : > { %v3735_v30 = vpop.permute.xlu0 %3734  ;;  %v4188_v20 = vadd.f32 %v8122_v31, %v4176_v1  ;;  %v3524_v28 = vadd.f32 %v3492_v59, %v3298_v12 }
 0x597   : > { %v3811_v35 = vadd.f32 %v3735_v30, %v3523_v27 }
 0x598   : > { %v3741_v38 = vpop.permute.xlu1 %3740  ;;  %v4196_v61 = vadd.f32 %v4188_v20, %v2563_v43 }
 0x599   : > { %v3884_v48 = vrot.slane %v3811_v35, 7  ;;  %v3980_v22 = vrot.slane %v3811_v35, 1 }
 0x59a   : > { %v3420_v45 = vpop.permute.xlu0 %3419  ;;  %v4252_v51 = vrot.slane %v4196_v61, 7  ;;  %v4235_v50 = vrot.slane %v4196_v61, 6  ;;  %v4287_v47 = vrot.slane %v4196_v61, 1  ;;  %v8335_v13 = vsel %vm4216_vm11, %v4196_v61, %v4269_v46 }
 0x59b   : > { %v3885_v8 = vsel %vm1273_vm2, %v3883_v63, %v3884_v48  ;;  %v3981_v39 = vsel %vm1504_vm3, %v3979_v42, %v3980_v22  ;;  %v4041_v1 = vsel %vm1504_vm3, %v3980_v22, -1e+30  ;;  %v4321_v63 = vrot.slane %v4196_v61, 3  ;;  %v8898_v42 = vld [vmem:[#allocation46_spill] sm:$0xff] }
 0x59c   : > { %v4067_v18 = vmax.f32 %v3885_v8, %v3811_v35  ;;  %v8342_v9 = vmax.f32 %v4066_v55, %v3981_v39  ;;  %v3418_v29 = vpop.permute.xlu1 %3417  ;;  %v8346_v27 = vsel %vm4216_vm11, %v4252_v51, %v8273_v32  ;;  %v8350_v0 = vsel %vm4216_vm11, %v4235_v50, %v8280_v34 }
 0x59d   : > { %v3525_v46 = vadd.f32 %v3418_v29, %v3299_v56  ;;  %v8354_v5 = vsel %vm4216_vm11, %v4287_v47, %v8288_v44  ;;  %v3494_v43 = vsel %vm1434_vm5, %v3420_v45, 0.0  ;;  %v4304_v32 = vrot.slane %v4196_v61, 2 }
 0x59e   : > { %v8356_v25 = vmax.f32 %v4067_v18, %v4041_v1  ;;  %v4120_v2 = vmax.f32 %v4096_v23, %v8342_v9  ;;  %v3739_v40 = vpop.permute.xlu0 %3738  ;;  %v8362_v20 = vsel %vm4216_vm11, %v4321_v63, %v4320_v33  ;;  %v4338_v34 = vrot.slane %v4196_v61, 4 }
 0x59f   : > { %v3813_v30 = vadd.f32 %v3739_v40, %v3525_v46  ;;  %v4215_v35 = vrot.slane %v4196_v61, 5  ;;  %v2531_v23 = vadd.f32 %v8898_v42, %v2456_v60  ;;  %v8370_v48 = vsel %vm4216_vm11, %v4304_v32, %v8305_v36 }
 0x5a0   : > { %v4121_v44 = vmax.f32 %v4097_v58, %v8356_v25  ;;  %v4136_v12 = vmax.f32 %v4120_v2, %v8262_v21  ;;  %v3737_v59 = vpop.permute.xlu1 %3736  ;;  %v3526_v33 = vadd.f32 %v3494_v43, %v3300_v15  ;;  %v8378_v17 = vsel %vm4216_vm11, %v4338_v34, %v8310_v62  ;;  %v8901_v34 = vld [vmem:[#allocation41_spill] sm:$0xff] }
 0x5a1   : > { %v3812_v55 = vadd.f32 %v3737_v59, %v3524_v28  ;;  %v8382_v21 = vsel %vm4216_vm11, %v4215_v35, %v8314_v16  ;;  %v3887_v24 = vrot.slane %v3813_v30, 7  ;;  %v3983_v58 = vrot.slane %v3813_v30, 1 }
 0x5a2   : > { %v4137_v22 = vmax.f32 %v4121_v44, %v8266_v4  ;;  %4152 = vst.msk [vmem:[#allocation2 + $0x40] sm:$0xff] %vm2119_vm7, %v4136_v12  ;;  %v8374_v61 = vpop.permute.xlu0 %3242  ;;  %v2544_v62 = vmul.f32 %v8075_v53, %v2531_v23  ;;  %v3814_v47 = vadd.f32 %v3741_v38, %v3526_v33  ;;  %v3301_v63 = vadd.f32 %v8299_v57, %v7698_v11  ;;  %v8899_v38 = vld [vmem:[#allocation40_spill] sm:$0xff] }
 0x5a3   : > { %v3886_v60 = vrot.slane %v3812_v55, 7  ;;  %v3982_v36 = vrot.slane %v3812_v55, 1  ;;  %v4042_v28 = vsel %vm1504_vm3, %v3983_v58, -1e+30  ;;  %v2449_v43 = vsel %vm1434_vm5, %v8899_v38, 0.0 }
 0x5a4   : > { %4153 = vst.msk [vmem:[#allocation2 + $0x48] sm:$0xff] %vm2119_vm7, %v4137_v22  ;;  %v8385_v4 = vpop.permute.xlu1 %3240  ;;  %v2556_v18 = vadd.f32 %v8111_v54, %v2544_v62  ;;  %v3889_v29 = vrot.slane %v3814_v47, 7  ;;  %v3527_v15 = vadd.f32 %v8317_v41, %v3301_v63  ;;  %v3303_v57 = vadd.f32 %v7693_v52, %v8284_v7 }
 0x5a5   : > { %v3888_v45 = vsel %vm1273_vm2, %v3886_v60, %v3887_v24  ;;  %v3946_v51 = vsel %vm1273_vm2, -1e+30, %v3886_v60  ;;  %v3984_v50 = vsel %vm1504_vm3, %v3982_v36, %v3983_v58  ;;  %v3985_v22 = vrot.slane %v3814_v47, 1 }
 0x5a6   : > { %v4068_v49 = vmax.f32 %v3946_v51, %v3812_v55  ;;  %v4069_v16 = vmax.f32 %v3888_v45, %v3813_v30  ;;  %v8391_v56 = vpop.permute.xlu0 %3238  ;;  %v8900_v30 = vld [vmem:[#allocation57_spill] sm:$0xff]  ;;  %v2564_v44 = vmax.f32 %v2556_v18, 0.0  ;;  %v3947_v12 = vsel %vm1273_vm2, -1e+30, %v3889_v29 }
 0x5a7   : > { %v2400_v35 = vadd.f32 %v8901_v34, %v8900_v30  ;;  %v3302_v55 = vadd.f32 %v7640_v37, %v8294_v3  ;;  %v4070_v58 = vmax.f32 %v3947_v12, %v3814_v47 }
 0x5a8   : > { %v4100_v8 = vmax.f32 %v4068_v49, %v3984_v50  ;;  %v3237_v39 = vpop.permute.xlu1 %3236  ;;  %v8394_v1 = vmax.f32 %v4069_v16, %v4042_v28 }
 0x5a9   : > { %v2457_v11 = vadd.f32 %v2449_v43, %v2400_v35  ;;  %v3304_v60 = vadd.f32 %v3237_v39, %v8874_v14 }
 0x5aa   : > { %v8397_v46 = vpop.permute.xlu0 %3429 }
 0x5ab   : > { %v4164_v2 = vld [vmem:[#allocation2 + $0x40] ss:$2 sm:$0xff] }
 0x5ac   : > { %v3424_v40 = vpop.permute.xlu1 %3423  ;;  %v4177_v32 = vmul.f32 %v8097_v6, %v4164_v2 }
 0x5ad   : > { %v3496_v33 = vsel %vm1434_vm5, %v3424_v40, 0.0 }
 0x5ae   : > { %v3743_v59 = vpop.permute.xlu0 %3742  ;;  %v4189_v42 = vadd.f32 %v8122_v31, %v4177_v32  ;;  %v3528_v37 = vadd.f32 %v3496_v33, %v3302_v55 }
 0x5af   : > { %v3815_v23 = vadd.f32 %v3743_v59, %v3527_v15  ;;  %v8902_v15 = vld [vmem:[#allocation47_spill] sm:$0xff] }
 0x5b0   : > { %v3749_v41 = vpop.permute.xlu1 %3748  ;;  %v4197_v24 = vadd.f32 %v4189_v42, %v2564_v44  ;;  %v2532_v44 = vadd.f32 %v8902_v15, %v2457_v11  ;;  %v8903_v42 = vld [vmem:[#allocation55_spill] sm:$0xff] }
 0x5b1   : > { %v3890_v36 = vrot.slane %v3815_v23, 7  ;;  %v3986_v45 = vrot.slane %v3815_v23, 1 }
 0x5b2   : > { %v3428_v51 = vpop.permute.xlu0 %3427  ;;  %v4254_v50 = vrot.slane %v4197_v24, 6  ;;  %v4237_v62 = vrot.slane %v4197_v24, 5  ;;  %v8419_v52 = vsel %vm4219_vm12, %v4197_v24, %v8354_v5  ;;  %v4271_v7 = vrot.slane %v4197_v24, 7 }
 0x5b3   : > { %v3891_v3 = vsel %vm1273_vm2, %v3889_v29, %v3890_v36  ;;  %v3987_v49 = vsel %vm1504_vm3, %v3985_v22, %v3986_v45  ;;  %v3498_v47 = vsel %vm1434_vm5, %v3428_v51, 0.0  ;;  %v4043_v14 = vsel %vm1504_vm3, %v3986_v45, -1e+30 }
 0x5b4   : > { %v4071_v16 = vmax.f32 %v3891_v3, %v3815_v23  ;;  %v8426_v28 = vmax.f32 %v4070_v58, %v3987_v49  ;;  %v3426_v39 = vpop.permute.xlu1 %3425  ;;  %v8430_v18 = vsel %vm4219_vm12, %v4254_v50, %v8346_v27  ;;  %v8434_v63 = vsel %vm4219_vm12, %v4237_v62, %v8350_v0  ;;  %v8905_v23 = vld [vmem:[#allocation44_spill] sm:$0xff] }
 0x5b5   : > { %v3529_v5 = vadd.f32 %v3426_v39, %v3303_v57  ;;  %v8438_v29 = vsel %vm4219_vm12, %v4271_v7, %v8335_v13  ;;  %v4323_v2 = vrot.slane %v4197_v24, 2  ;;  %v3530_v40 = vadd.f32 %v3498_v47, %v3304_v60  ;;  %v8906_v47 = vld [vmem:[#allocation60_spill] sm:$0xff] }
 0x5b6   : > { %v8440_v38 = vmax.f32 %v4071_v16, %v4043_v14  ;;  %v4122_v43 = vmax.f32 %v4100_v8, %v8426_v28  ;;  %v3747_v32 = vpop.permute.xlu0 %3746  ;;  %v4306_v30 = vrot.slane %v4197_v24, 1  ;;  %v4340_v35 = vrot.slane %v4197_v24, 3  ;;  %v8904_v8 = vld [vmem:[#allocation42_spill] sm:$0xff] }
 0x5b7   : > { %v3817_v34 = vadd.f32 %v3747_v32, %v3529_v5  ;;  %v8445_v27 = vsel %vm4219_vm12, %v4323_v2, %v8362_v20  ;;  %v4218_v0 = vrot.slane %v4197_v24, 4  ;;  %v2401_v57 = vadd.f32 %v8904_v8, %v8903_v42 }
 0x5b8   : > { %v4123_v13 = vmax.f32 %v8394_v1, %v8440_v38  ;;  %v4138_v12 = vmax.f32 %v4122_v43, %v8342_v9  ;;  %v3745_v59 = vpop.permute.xlu1 %3744  ;;  %v2450_v55 = vsel %vm1434_vm5, %v8905_v23, 0.0  ;;  %v8458_v20 = vsel %vm4219_vm12, %v4306_v30, %v8370_v48 }
 0x5b9   : > { %v3816_v22 = vadd.f32 %v3745_v59, %v3528_v37  ;;  %v3818_v1 = vadd.f32 %v3749_v41, %v3530_v40  ;;  %v8464_v9 = vsel %vm4219_vm12, %v4340_v35, %v8378_v17  ;;  %v8468_v24 = vsel %vm4219_vm12, %v4218_v0, %v8382_v21 }
 0x5ba   : > { %v4139_v11 = vmax.f32 %v4123_v13, %v8356_v25  ;;  %4154 = vst.msk [vmem:[#allocation2 + $0x50] sm:$0xff] %vm2119_vm7, %v4138_v12  ;;  %v3247_v33 = vpop.permute.xlu0 %3246  ;;  %v3893_v58 = vrot.slane %v3817_v34, 7  ;;  %v3989_v60 = vrot.slane %v3817_v34, 1  ;;  %v2458_v48 = vadd.f32 %v2450_v55, %v2401_v57 }
 0x5bb   : > { %v3892_v36 = vrot.slane %v3816_v22, 7  ;;  %v3988_v45 = vrot.slane %v3816_v22, 1  ;;  %v2545_v51 = vmul.f32 %v8075_v53, %v2532_v44  ;;  %v3305_v37 = vadd.f32 %v8391_v56, %v7767_v19  ;;  %v8907_v44 = vld [vmem:[#allocation66_spill] sm:$0xff] }
 0x5bc   : > { %4155 = vst.msk [vmem:[#allocation2 + $0x58] sm:$0xff] %vm2119_vm7, %v4139_v11  ;;  %v3245_v25 = vpop.permute.xlu1 %3244  ;;  %v3895_v3 = vrot.slane %v3818_v1, 7  ;;  %v4044_v49 = vsel %vm1504_vm3, %v3989_v60, -1e+30  ;;  %v2533_v14 = vadd.f32 %v8906_v47, %v2458_v48  ;;  %v3306_v13 = vadd.f32 %v8907_v44, %v8385_v4 }
 0x5bd   : > { %v3894_v41 = vsel %vm1273_vm2, %v3892_v36, %v3893_v58  ;;  %v3948_v50 = vsel %vm1273_vm2, -1e+30, %v3892_v36  ;;  %v3990_v17 = vsel %vm1504_vm3, %v3988_v45, %v3989_v60  ;;  %v2557_v16 = vadd.f32 %v8111_v54, %v2545_v51 }
 0x5be   : > { %v4072_v62 = vmax.f32 %v3948_v50, %v3816_v22  ;;  %v4073_v7 = vmax.f32 %v3894_v41, %v3817_v34  ;;  %v3438_v21 = vpop.permute.xlu0 %3437  ;;  %v3531_v43 = vadd.f32 %v8397_v46, %v3305_v37  ;;  %v3949_v32 = vsel %vm1273_vm2, -1e+30, %v3895_v3 }
 0x5bf   : > { %v8483_v35 = vmul.f32 %v8075_v53, %v2533_v14  ;;  %v2565_v19 = vmax.f32 %v2557_v16, 0.0  ;;  %v3991_v12 = vrot.slane %v3818_v1, 1  ;;  %v3307_v42 = vadd.f32 %v7764_v26, %v8374_v61 }
 0x5c0   : > { %v4104_v39 = vmax.f32 %v4072_v62, %v3990_v17  ;;  %v3432_v5 = vpop.permute.xlu1 %3431  ;;  %v4105_v2 = vmax.f32 %v4073_v7, %v4044_v49  ;;  %v4074_v8 = vmax.f32 %v3949_v32, %v3818_v1  ;;  %v3535_v4 = vadd.f32 %v3438_v21, %v3247_v33 }
 0x5c1   : > { %v3500_v56 = vsel %vm1434_vm5, %v3432_v5, 0.0 }
 0x5c2   : > { %v3751_v40 = vpop.permute.xlu0 %3750  ;;  %v3532_v55 = vadd.f32 %v3500_v56, %v3306_v13 }
 0x5c3   : > { %v3819_v30 = vadd.f32 %v3751_v40, %v3531_v43  ;;  %v4165_v34 = vld [vmem:[#allocation2 + $0x50] ss:$2 sm:$0xff] }
 0x5c4   : > { %v3434_v0 = vpop.permute.xlu1 %3433  ;;  %v4178_v15 = vmul.f32 %v8097_v6, %v4165_v34 }
 0x5c5   : > { %v3896_v46 = vrot.slane %v3819_v30, 7  ;;  %v3992_v59 = vrot.slane %v3819_v30, 1  ;;  %v3533_v61 = vadd.f32 %v3434_v0, %v3307_v42 }
 0x5c6   : > { %v3436_v57 = vpop.permute.xlu0 %3435  ;;  %v4190_v23 = vadd.f32 %v8122_v31, %v4178_v15 }
 0x5c7   : > { %v3897_v22 = vsel %vm1273_vm2, %v3895_v3, %v3896_v46  ;;  %v3993_v11 = vsel %vm1504_vm3, %v3991_v12, %v3992_v59  ;;  %v3502_v58 = vsel %vm1434_vm5, %v3436_v57, 0.0  ;;  %v4045_v26 = vsel %vm1504_vm3, %v3992_v59, -1e+30 }
 0x5c8   : > { %v4075_v60 = vmax.f32 %v3897_v22, %v3819_v30  ;;  %v8497_v36 = vmax.f32 %v4074_v8, %v3993_v11  ;;  %v3753_v45 = vpop.permute.xlu1 %3752  ;;  %v4198_v48 = vadd.f32 %v4190_v23, %v2565_v19  ;;  %v3534_v1 = vadd.f32 %v3502_v58, %v3245_v25  ;;  %v8908_v11 = vld [vmem:[#allocation38_spill] sm:$0xff] }
 0x5c9   : > { %v3820_v51 = vadd.f32 %v3753_v45, %v3532_v55  ;;  %v2451_v58 = vsel %vm1434_vm5, %v8908_v11, 0.0  ;;  %vm4361_vm5 = vcmask 457728  }
 0x5ca   : > { %v8500_v41 = vmax.f32 %v4075_v60, %v4045_v26  ;;  %v4124_v50 = vmax.f32 %v4104_v39, %v8497_v36  ;;  %v3755_v17 = vpop.permute.xlu0 %3754  ;;  %v4256_v62 = vrot.slane %v4198_v48, 5  ;;  %v4239_v7 = vrot.slane %v4198_v48, 4 }
 0x5cb   : > { %v3898_v37 = vrot.slane %v3820_v51, 7  ;;  %v3994_v3 = vrot.slane %v3820_v51, 1  ;;  %v3821_v33 = vadd.f32 %v3755_v17, %v3533_v61  ;;  %v4290_v21 = vrot.slane %v4198_v48, 7  ;;  %v8909_v61 = vld [vmem:[#allocation37_spill] sm:$0xff] }
 0x5cc   : > { %v4125_v49 = vmax.f32 %v4105_v2, %v8500_v41  ;;  %v4140_v47 = vmax.f32 %v4124_v50, %v8426_v28  ;;  %v3757_v14 = vpop.permute.xlu1 %3756  ;;  %v8507_v25 = vsel %vm4222_vm13, %v4256_v62, %v8430_v18  ;;  %v8511_v16 = vsel %vm4222_vm13, %v4239_v7, %v8434_v63  ;;  %v8910_v62 = vld [vmem:[#allocation61_spill] sm:$0xff] }
 0x5cd   : > { %v3950_v39 = vsel %vm1273_vm2, -1e+30, %v3898_v37  ;;  %v3899_v5 = vrot.slane %v3821_v33, 7  ;;  %v3995_v43 = vrot.slane %v3821_v33, 1  ;;  %v3822_v40 = vadd.f32 %v3757_v14, %v3534_v1 }
 0x5ce   : > { %v4141_v32 = vmax.f32 %v4125_v49, %v8440_v38  ;;  %4156 = vst.msk [vmem:[#allocation2 + $0x60] sm:$0xff] %vm2119_vm7, %v4140_v47  ;;  %v4076_v2 = vmax.f32 %v3950_v39, %v3820_v51  ;;  %v3759_v28 = vpop.permute.xlu0 %3758  ;;  %v4291_v30 = vsel %vm4222_vm13, %v4290_v21, %v8419_v52  ;;  %v4273_v18 = vrot.slane %v4198_v48, 6 }
 0x5cf   : > { %v3900_v34 = vsel %vm1273_vm2, %v3898_v37, %v3899_v5  ;;  %v3996_v63 = vsel %vm1504_vm3, %v3994_v3, %v3995_v43  ;;  %v4046_v19 = vsel %vm1504_vm3, %v3995_v43, -1e+30  ;;  %v3901_v56 = vrot.slane %v3822_v40, 7 }
 0x5d0   : > { %4157 = vst.msk [vmem:[#allocation2 + $0x68] sm:$0xff] %vm2119_vm7, %v4141_v32  ;;  %v4077_v0 = vmax.f32 %v3900_v34, %v3821_v33  ;;  %v4108_v15 = vmax.f32 %v4076_v2, %v3996_v63  ;;  %v3997_v38 = vrot.slane %v3822_v40, 1  ;;  %v3823_v44 = vadd.f32 %v3759_v28, %v3535_v4 }
 0x5d1   : > { %v3951_v13 = vsel %vm1273_vm2, -1e+30, %v3901_v56  ;;  %v4274_v12 = vsel %vm4222_vm13, %v4273_v18, %v8438_v29  ;;  %v4325_v52 = vrot.slane %v4198_v48, 1  ;;  %v4308_v46 = vsel %vm4222_vm13, %v4198_v48, %v8458_v20 }
 0x5d2   : > { %v4109_v59 = vmax.f32 %v4077_v0, %v4046_v19  ;;  %v4078_v42 = vmax.f32 %v3951_v13, %v3822_v40  ;;  %v3902_v8 = vrot.slane %v3823_v44, 7  ;;  %v3998_v57 = vrot.slane %v3823_v44, 1 }
 0x5d3   : > { %v4326_v23 = vsel %vm4222_vm13, %v4325_v52, %v8445_v27  ;;  %v4342_v55 = vrot.slane %v4198_v48, 2  ;;  %v4221_v22 = vrot.slane %v4198_v48, 3  ;;  %v2558_v27 = vadd.f32 %v8111_v54, %v8483_v35 }
 0x5d4   : > { %v3903_v4 = vsel %vm1273_vm2, %v3901_v56, %v3902_v8  ;;  %v3999_v29 = vsel %vm1504_vm3, %v3997_v38, %v3998_v57  ;;  %v4047_v48 = vsel %vm1504_vm3, %v3998_v57, -1e+30  ;;  %v2459_v10 = vadd.f32 %v2451_v58, %v8909_v61 }
 0x5d5   : > { %v4079_v60 = vmax.f32 %v3903_v4, %v3823_v44  ;;  %v4110_v45 = vmax.f32 %v4078_v42, %v3999_v29  ;;  %v4343_v20 = vsel %vm4222_vm13, %v4342_v55, %v8464_v9  ;;  %v4223_v26 = vsel %vm4222_vm13, %v4221_v22, %v8468_v24 }
 0x5d6   : > { %v2534_v7 = vadd.f32 %v8910_v62, %v2459_v10  ;;  %v2566_v3 = vmax.f32 %v2558_v27, 0.0  ;;  %vm4355_vm2 = vcmask 261120   ;;  %vm4357_vm3 = vcmask 326656  }
 0x5d7   : > { %v4111_v1 = vmax.f32 %v4079_v60, %v4047_v48  ;;  %v4126_v51 = vmax.f32 %v4108_v15, %v4110_v45  ;;  %v4166_v50 = vld [vmem:[#allocation2 + $0x60] ss:$2 sm:$0xff] }
 0x5d8   : > { %v4179_v17 = vmul.f32 %v8097_v6, %v4166_v50  ;;  %v2547_v21 = vmul.f32 %v8075_v53, %v2534_v7 }
 0x5d9   : > { %v4127_v37 = vmax.f32 %v4109_v59, %v4111_v1  ;;  %v4142_v9 = vmax.f32 %v4126_v51, %v8497_v36 }
 0x5da   : > { %v4191_v24 = vadd.f32 %v8122_v31, %v4179_v17  ;;  %v2559_v63 = vadd.f32 %v8111_v54, %v2547_v21 }
 0x5db   : > { %v4143_v33 = vmax.f32 %v4127_v37, %v8500_v41  ;;  %4158 = vst.msk [vmem:[#allocation2 + $0x70] sm:$0xff] %vm2119_vm7, %v4142_v9 }
 0x5dc   : > { %v4199_v35 = vadd.f32 %v4191_v24, %v2566_v3  ;;  %v2567_v0 = vmax.f32 %v2559_v63, 0.0 }
 0x5dd   : > { %4159 = vst.msk [vmem:[#allocation2 + $0x78] sm:$0xff] %vm2119_vm7, %v4143_v33 }
 0x5de   : > { %v4258_v49 = vrot.slane %v4199_v35, 4  ;;  %v4241_v47 = vrot.slane %v4199_v35, 3  ;;  %v4292_v14 = vrot.slane %v4199_v35, 6  ;;  %v4275_v39 = vrot.slane %v4199_v35, 5 }
 0x5df   : > { %v4327_v5 = vsel %vm4225_vm14, %v4199_v35, %v4326_v23  ;;  %v4309_v36 = vrot.slane %v4199_v35, 7  ;;  %v4344_v43 = vrot.slane %v4199_v35, 1  ;;  %v4224_v40 = vrot.slane %v4199_v35, 2 }
 0x5e0   : > { %v4259_v41 = vsel %vm4225_vm14, %v4258_v49, %v8507_v25  ;;  %v4242_v32 = vsel %vm4225_vm14, %v4241_v47, %v8511_v16  ;;  %v4293_v2 = vsel %vm4225_vm14, %v4292_v14, %v4291_v30  ;;  %v4276_v53 = vsel %vm4225_vm14, %v4275_v39, %v4274_v12 }
 0x5e1   : > { %v4310_v28 = vsel %vm4225_vm14, %v4309_v36, %v4308_v46  ;;  %v4345_v18 = vsel %vm4225_vm14, %v4344_v43, %v4343_v20  ;;  %v4226_v34 = vsel %vm4225_vm14, %v4224_v40, %v4223_v26 }
 0x5e4   : > { %v4167_v19 = vld [vmem:[#allocation2 + $0x70] ss:$2 sm:$0xff] }
 0x5e5   : > { %v4180_v56 = vmul.f32 %v8097_v6, %v4167_v19 }
 0x5e7   : > { %v4192_v25 = vadd.f32 %v8122_v31, %v4180_v56 }
 0x5e9   : > { %v4200_v15 = vadd.f32 %v4192_v25, %v2567_v0 }
 0x5eb   : > { %v4260_v16 = vrot.slane %v4200_v15, 3  ;;  %v4243_v38 = vrot.slane %v4200_v15, 2  ;;  %v4227_v30 = vrot.slane %v4200_v15, 1  ;;  %v4294_v12 = vrot.slane %v4200_v15, 5 }
 0x5ec   : > { %v4277_v52 = vrot.slane %v4200_v15, 4  ;;  %v4328_v46 = vrot.slane %v4200_v15, 7  ;;  %v4311_v59 = vrot.slane %v4200_v15, 6  ;;  %v4346_v57 = vsel %vm4228_vm15, %v4200_v15, %v4345_v18 }
 0x5ed   : > { %v4261_v44 = vsel %vm4228_vm15, %v4260_v16, %v4259_v41  ;;  %v4244_v13 = vsel %vm4228_vm15, %v4243_v38, %v4242_v32  ;;  %v4229_v6 = vsel %vm4228_vm15, %v4227_v30, %v4226_v34  ;;  %v4295_v54 = vsel %vm4228_vm15, %v4294_v12, %v4293_v2 }
 0x5ee   : > { %4262 = vrot.lane.b32.xlu0 %v4261_v44, %s5436_s29  ;;  %4245 = vrot.lane.b32.xlu1 %v4244_v13, %s5437_s17  ;;  %v4278_v31 = vsel %vm4228_vm15, %v4277_v52, %v4276_v53  ;;  %v4329_v42 = vsel %vm4228_vm15, %v4328_v46, %v4327_v5  ;;  %v4312_v8 = vsel %vm4228_vm15, %v4311_v59, %v4310_v28  ;;  %s8911_s17 = sld [smem:[#allocation69_spill]] }
 0x5f2   : > { %4296 = vrot.lane.b32.xlu0 %v4295_v54, %s5438_s24  ;;  %4279 = vrot.lane.b32.xlu1 %v4278_v31, %s5439_s10  ;;  %s4366_s10 = scalar_lea.sflag [#allocation5], %s5805_s30 }
 0x5f4   : > { %s8577_s24 = scalar_lea.hbm %s8911_s17, %s4599_s22 }
 0x5f6   : > { %4330 = vrot.lane.b32.xlu0 %v4329_v42, %s5440_s1  ;;  %4313 = vrot.lane.b32.xlu1 %v4312_v8, %s5441_s27  ;;  %s5443_s1 = smov [#allocation20]  }
 0x5f7   : > { %s5337_s27 = sshll.u32 %s5443_s1, 4  ;;  %s5338_s27 = int_to_ptr.vmem [resolvable:$false] %s5337_s27 }
 0x5f8   : > { %p5340_p6 = scmp.lt.s32.totalorder %s8579_s12, %s5338_s27 }
 0x5fa   : > { %4347 = vrot.lane.b32.xlu1 %v4346_v57, %s5442_s21  ;;  %s5339_s21 = scalar_lea.vmem %s5338_s27, 256 }
 0x5fb   : > { %p5341_p4 = scmp.lt.s32.totalorder %s5339_s21, %s5333_s19 }
 0x5fd   : > { %p5342_p11 = por %p5341_p4, %p5340_p6 }
 0x5ff   : > { %p5343_p0 = pnand %p5342_p11, %p5336_p8 }
 0x660   : > { %v4263_v23 = vpop.permute.xlu0 %4262  ;;  %v4246_v55 = vpop.permute.xlu1 %4245 }
 0x661   : > { %v4350_v22 = vsel %vm2119_vm7, %v4229_v6, %v4246_v55 }
 0x662   : > { %v4352_v4 = vsel %vm4351_vm0, %v4350_v22, %v4263_v23 }
 0x664   : > { %v4297_v11 = vpop.permute.xlu0 %4296  ;;  %v4280_v58 = vpop.permute.xlu1 %4279 }
 0x665   : > { %v4354_v29 = vsel %vm4353_vm1, %v4352_v4, %v4280_v58 }
 0x666   : > { %v4356_v45 = vsel %vm4355_vm2, %v4354_v29, %v4297_v11 }
 0x668   : > { %v4314_v60 = vpop.permute.xlu1 %4313  ;;  %v4331_v20 = vpop.permute.xlu0 %4330 }
 0x669   : > { %v4358_v26 = vsel %vm4357_vm3, %v4356_v45, %v4314_v60 }
 0x66a   : > { %v4360_v48 = vsel %vm4359_vm4, %v4358_v26, %v4331_v20 }
 0x66c   : > { %v4348_v27 = vpop.permute.xlu1 %4347 }
 0x66d   : > { %v4362_v61 = vsel %vm4361_vm5, %v4360_v48, %v4348_v27 }
 0x66e   : > { %4364 = vst.msk [vmem:[%s490_s20] sm:$0xff] %vm4363_vm6, %v4362_v61 }
 0x66f   : > { %5346 = shalt.err (!%p5343_p0)
}
 0x670   : > { %s5347_s30 = scalar_lea.hbm %s8577_s24, 128  ;;  %s5351_s20 = scalar_lea.hbm %s8911_s17, 256 }
 0x671   : > { %p5348_p5 = scmp.ne.s32.totalorder %s8577_s24, %s5347_s30  ;;  %p5352_p10 = scmp.lt.u32.totalorder %s8577_s24, %s8911_s17 }
 0x672   : > { %p5353_p12 = scmp.lt.u32.totalorder %s5351_s20, %s5347_s30  ;;  %p5355_p1 = scmp.lt.u32.totalorder %s5347_s30, %s8577_s24 }
 0x673   : > { %p5349_p9 = pnand %p5348_p5, %p8912_p3 }
 0x674   : > { %p5354_p13 = por %p5353_p12, %p5352_p10 }
 0x675   : > { %p5350_p7 = pneg %p5349_p9 }
 0x676   : > { %p5356_p2 = por %p5355_p1, %p5354_p13 }
 0x678   : > { %p5357_p8 = pnand %p5356_p2, %p5350_p7 }
 0x67a   : > { %5360 = shalt.err (!%p5357_p8)
}
 0x67b   : > { %4764 = dma.vmem_to_hbm [thread:$0]  (%p8912_p3), %s8579_s12, 128, %s8577_s24, %s4366_s10  }
 0x67c PF: > { %s4391_s19 = sand.u32 1, %s5407_s13   ;;  %p8913_p6 = scmp.ne.s32.totalorder %s8704_s23, 0 }
 0x67d   : > { %p8914_p4 = scmp.ge.s32.totalorder %s5419_s16, 2  ;;  %s4392_s1 = scalar_lea.sflag [#allocation5], %s4391_s19 }
 0x67f   : > { %p4799_p11 = pnand %p8914_p4, %p8913_p6 }
 0x681   : > { %5402 = dma.done.wait (!%p4799_p11), %s4392_s1, 128  }
 0x682   : > { %5404 = vsyncadd (!%p4799_p11), %s4392_s1, 4294967168  ;;  %p28_p0 = scmp.ge.s32.totalorder %s5732_s25, 4   ;;  %s8915_s13 = smov %s5411_s14 }
 0x683   : > { %s8916_s14 = smov %s5415_s15  ;;  %s8917_s15 = smov %s5744_s28 }
 0x684   : > { %s8918_s16 = smov %s5732_s25  ;;  %30 = sbr.rel (!%p28_p0) target bundleno = 13 (0xd), region = 148 }
 0x68b   :  { %4397 = vsyncpa [#allocation4], 1 }
 0x68c   :  { %4399 = vsyncpa [#allocation4 + $0x1], 1 }
 0x68d   :  { %4400 = vsyncpa [#allocation7], 1 }
 0x68e   :  { %4401 = vsyncpa [#allocation10], 1 }
 0x68f   :  { %4402 = vsyncpa [#allocation13], 1 }
 0x690   :  { %4403 = vsyncpa [#allocation16], 1 }
 0x691   :  { %4404 = vsyncpa [#allocation19], 1 }
 0x692   :  { %4405 = vsyncpa [#allocation5], 1 }
 0x693   :  { %4407 = vsyncpa [#allocation5 + $0x1], 1 }

</bundles_post_ra>
